<compile_context>
chip_gen: v6e
topology: v6e:2x2x1
jax: 0.10.0
libtpu: 0.0.40
codegen_flags: <defaults>
</compile_context>

<pallas_src>
import math

import jax
import jax.numpy as jnp
import numpy as np
from jax import lax
from jax.experimental import pallas as pl
from jax.experimental.pallas import tpu as pltpu  # noqa: F401 (TPU backend)

HIDDEN = 32
N_HEADS = 4
HEAD_DIM = HIDDEN // N_HEADS
PF_DIM = 64
N_LAYERS = 2
OUTPUT_DIM = 50
MAX_LEN = 100
LN_EPS = 1e-5
OUT_PAD = 128           # lane-dense padded fc_out width
ATTN_PAD = 128          # lane-dense padded attention-map width
NEG_INF = -1e10

# --------------------- packed parameter-slab layout (static) -----------------
# weight slab A (HIDDEN rows): per layer [sa_wqkv | sa_wo | ea_wq | ea_wkv | ea_wo | ff_w1], then fc_w (padded to 128)
_WA_WIDTHS = (3 * HIDDEN, HIDDEN, HIDDEN, 2 * HIDDEN, HIDDEN, PF_DIM)
# bias/LN slab: per layer
# [sa_bqkv | sa_bo | ln1_g | ln1_b | ea_bq | ea_bkv | ea_bo | ln2_g | ln2_b | ff_b1 | ff_b2 | ln3_g | ln3_b], then fc_b
_BI_WIDTHS = (3 * HIDDEN, HIDDEN, HIDDEN, HIDDEN,
              HIDDEN, 2 * HIDDEN, HIDDEN, HIDDEN, HIDDEN,
              PF_DIM, HIDDEN, HIDDEN, HIDDEN)


def _prefix(widths):
    offs, o = [], 0
    for w in widths:
        offs.append(o)
        o += w
    return tuple(offs)


_WA_OFFS = _prefix(_WA_WIDTHS)
_BI_OFFS = _prefix(_BI_WIDTHS)
_WA_LAYER = sum(_WA_WIDTHS)          # 320
_BI_LAYER = sum(_BI_WIDTHS)          # 544
_WA_TOTAL = N_LAYERS * _WA_LAYER + OUT_PAD   # 768
_BI_TOTAL = N_LAYERS * _BI_LAYER + OUT_PAD   # 1216


# ----------------------------- fused Pallas kernel ---------------------------

def _decoder_kernel(x_ref, enc_ref, tmask_ref, smask_ref,
                    wA_ref, wB_ref, p_ref, out_ref, attn_ref):
    BLq = x_ref.shape[0]          # B * trg_len  (batch folded on sublanes)
    BLk = enc_ref.shape[0]        # B * src_len
    inv_scale = 1.0 / math.sqrt(HEAD_DIM)

    def wslab(li, idx):           # bf16 weight chunk (static lane slice)
        off = li * _WA_LAYER + _WA_OFFS[idx]
        return wA_ref[:, off:off + _WA_WIDTHS[idx]]

    def pvec(li, idx):            # f32 bias / LN param (1, W)
        off = li * _BI_LAYER + _BI_OFFS[idx]
        return p_ref[:, off:off + _BI_WIDTHS[idx]]

    def layer_norm(y, g, b):
        mu = jnp.mean(y, axis=-1, keepdims=True)
        var = jnp.mean(jnp.square(y - mu), axis=-1, keepdims=True)
        return (y - mu) * lax.rsqrt(var + LN_EPS) * g + b

    def mha(Q, K, V, mask_add, wo_b, bo, collect_attn):
        # Q: (BLq, H) f32; K, V: (BLkv, H) f32; mask_add: (BLq, BLkv) additive
        # (block-diagonal across batches). All batches handled in one shot.
        Qb = Q.astype(jnp.bfloat16)
        Kb = K.astype(jnp.bfloat16)
        Vb = V.astype(jnp.bfloat16)
        ctx_parts, attn_parts = [], []
        for h in range(N_HEADS):                      # static unroll over heads
            lo, hi = h * HEAD_DIM, (h + 1) * HEAD_DIM
            e = lax.dot_general(Qb[:, lo:hi], Kb[:, lo:hi],
                                (((1,), (1,)), ((), ())),
                                preferred_element_type=jnp.float32)
            e = e * inv_scale + mask_add
            mx = jnp.max(e, axis=-1, keepdims=True)
            p = jnp.exp(e - mx)
            a = p * pl.reciprocal(jnp.sum(p, axis=-1, keepdims=True), approx=True)
            if collect_attn:                          # only last-layer cross-attn
                attn_parts.append(a)
            ctx_parts.append(jnp.dot(a.astype(jnp.bfloat16), Vb[:, lo:hi],
                                     preferred_element_type=jnp.float32))
        ctx = jnp.concatenate(ctx_parts, axis=-1)     # (BLq, H) f32
        out = jnp.dot(ctx.astype(jnp.bfloat16), wo_b,
                      preferred_element_type=jnp.float32) + bo
        return out, attn_parts

    x = x_ref[...]                                    # (BLq, H) f32
    enc_b = enc_ref[...].astype(jnp.bfloat16)         # (BLk, H) bf16
    tmask = tmask_ref[...]
    smask = smask_ref[...]

    last_attn = None
    for li in range(N_LAYERS):
        # ---- self attention (fused QKV projection) ----
        qkv = jnp.dot(x.astype(jnp.bfloat16), wslab(li, 0),
                      preferred_element_type=jnp.float32) + pvec(li, 0)
        sa_out, _ = mha(qkv[:, :HIDDEN], qkv[:, HIDDEN:2 * HIDDEN],
                        qkv[:, 2 * HIDDEN:], tmask,
                        wslab(li, 1), pvec(li, 1), False)
        x = layer_norm(x + sa_out, pvec(li, 2), pvec(li, 3))

        # ---- cross attention (fused KV projection of enc_src) ----
        Qc = jnp.dot(x.astype(jnp.bfloat16), wslab(li, 2),
                     preferred_element_type=jnp.float32) + pvec(li, 4)
        kv = jnp.dot(enc_b, wslab(li, 3),
                     preferred_element_type=jnp.float32) + pvec(li, 5)
        is_last = li == N_LAYERS - 1
        ea_out, aparts = mha(Qc, kv[:, :HIDDEN], kv[:, HIDDEN:],
                             smask, wslab(li, 4), pvec(li, 6), is_last)
        if is_last:
            last_attn = aparts
        x = layer_norm(x + ea_out, pvec(li, 7), pvec(li, 8))

        # ---- position-wise feed forward ----
        hmid = jnp.maximum(
            jnp.dot(x.astype(jnp.bfloat16), wslab(li, 5),
                    preferred_element_type=jnp.float32) + pvec(li, 9), 0.0)
        ff = jnp.dot(hmid.astype(jnp.bfloat16),
                     wB_ref[:, li * HIDDEN:(li + 1) * HIDDEN],
                     preferred_element_type=jnp.float32) + pvec(li, 10)
        x = layer_norm(x + ff, pvec(li, 11), pvec(li, 12))

    # ---- output projection (lane-dense padded) + log_softmax ----
    logits = jnp.dot(x.astype(jnp.bfloat16), wA_ref[:, N_LAYERS * _WA_LAYER:],
                     preferred_element_type=jnp.float32) \
        + p_ref[:, N_LAYERS * _BI_LAYER:]
    mlog = jnp.max(logits, axis=-1, keepdims=True)
    z = logits - mlog
    lse = jnp.log(jnp.sum(jnp.exp(z), axis=-1, keepdims=True))
    out_ref[...] = z - lse

    # ---- lane-dense attention-map write (last layer cross-attn, all heads) ----
    stacked = jnp.concatenate(last_attn, axis=0)      # (N_HEADS*BLq, BLk) f32
    pad = jnp.zeros((N_HEADS * BLq, ATTN_PAD - BLk), jnp.float32)
    attn_ref[...] = jnp.concatenate([stacked, pad], axis=-1)


# ------------------------------ Decoder wrapper -------------------------------

def _pack_params(params):
    wA_chunks, wB_chunks, p_chunks = [], [], []
    for layer in params["layers"]:
        sa, ea, ff = layer["sa"], layer["ea"], layer["ff"]
        wA_chunks += [
            jnp.concatenate([sa["wq"], sa["wk"], sa["wv"]], axis=1),  # (H, 3H)
            sa["wo"], ea["wq"],
            jnp.concatenate([ea["wk"], ea["wv"]], axis=1),            # (H, 2H)
            ea["wo"], ff["w1"],
        ]
        p_chunks += [
            jnp.concatenate([sa["bq"], sa["bk"], sa["bv"]], axis=1),  # (1, 3H)
            sa["bo"], layer["ln1"]["g"], layer["ln1"]["b"],
            ea["bq"],
            jnp.concatenate([ea["bk"], ea["bv"]], axis=1),            # (1, 2H)
            ea["bo"], layer["ln2"]["g"], layer["ln2"]["b"],
            ff["b1"], ff["b2"], layer["ln3"]["g"], layer["ln3"]["b"],
        ]
        wB_chunks.append(ff["w2"])
    # fc_out padded lane-dense; padded logits forced to -1e9 via the bias so
    # they vanish in the log-softmax (exp underflows to exactly 0).
    fc_w = jnp.zeros((HIDDEN, OUT_PAD), jnp.float32).at[:, :OUTPUT_DIM].set(
        params["fc_out"]["w"])
    fc_b = jnp.full((1, OUT_PAD), -1e9, jnp.float32).at[:, :OUTPUT_DIM].set(
        params["fc_out"]["b"])
    wA = jnp.concatenate(wA_chunks + [fc_w], axis=1).astype(jnp.bfloat16)
    wB = jnp.concatenate(wB_chunks, axis=1).astype(jnp.bfloat16)
    pv = jnp.concatenate(p_chunks + [fc_b], axis=1)           # f32
    return wA, wB, pv


def _block_diag_additive(mask):
    # (B, Lq, Lk) {0,1} mask -> (B*Lq, B*Lk) additive mask: 0 where attended,
    # -1e10 where masked or in an off-diagonal (cross-batch) block.
    B, Lq, Lk = mask.shape
    out = jnp.full((B * Lq, B * Lk), NEG_INF, jnp.float32)
    for bi in range(B):
        out = out.at[bi * Lq:(bi + 1) * Lq, bi * Lk:(bi + 1) * Lk].set(
            (1.0 - mask[bi].astype(jnp.float32)) * NEG_INF)
    return out


@jax.jit
def decoder_forward(trg, enc_src, trg_mask, src_mask, params):
    B, L = trg.shape
    S = enc_src.shape[1]
    H = HIDDEN

    # Embedding gathers + scale + positional add + mask build: tiny JAX glue.
    x0 = params["tok_emb"][trg] * math.sqrt(H) \
        + params["pos_emb"][jnp.arange(L)][None]
    x0 = x0.reshape(B * L, H).astype(jnp.float32)
    enc_flat = enc_src.reshape(B * S, H).astype(jnp.float32)
    tmask_add = _block_diag_additive(trg_mask)
    smask_add = _block_diag_additive(src_mask)

    wA, wB, pv = _pack_params(params)

    out_flat, attn_flat = pl.pallas_call(
        _decoder_kernel,
        out_shape=(
            jax.ShapeDtypeStruct((B * L, OUT_PAD), jnp.float32),
            jax.ShapeDtypeStruct((N_HEADS * B * L, ATTN_PAD), jnp.float32),
        ),
    )(x0, enc_flat, tmask_add, smask_add, wA, wB, pv)

    out = out_flat[:, :OUTPUT_DIM].reshape(B, L, OUTPUT_DIM)
    attn_buf = attn_flat.reshape(N_HEADS, B * L, ATTN_PAD)
    attn = jnp.stack(
        [attn_buf[:, bi * L:(bi + 1) * L, bi * S:(bi + 1) * S] for bi in range(B)],
        axis=0)                                               # (B, N_HEADS, L, S)
    return out, attn


# ---------------------------- Parameter init ---------------------------------

def _linear(kit, in_d, out_d):
    w = jax.random.normal(next(kit), (in_d, out_d), jnp.float32) * 0.05
    b = jax.random.normal(next(kit), (1, out_d), jnp.float32) * 0.05
    return w, b


def init_params(key):
    kit = iter(jax.random.split(key, 256))
    params = {
        "tok_emb": jax.random.normal(next(kit), (OUTPUT_DIM, HIDDEN), jnp.float32) * 0.05,
        "pos_emb": jax.random.normal(next(kit), (MAX_LEN, HIDDEN), jnp.float32) * 0.05,
        "layers": [],
    }
    for _ in range(N_LAYERS):
        layer = {}
        for name in ("sa", "ea"):
            wq, bq = _linear(kit, HIDDEN, HIDDEN)
            wk, bk = _linear(kit, HIDDEN, HIDDEN)
            wv, bv = _linear(kit, HIDDEN, HIDDEN)
            wo, bo = _linear(kit, HIDDEN, HIDDEN)
            layer[name] = dict(wq=wq, bq=bq, wk=wk, bk=bk, wv=wv, bv=bv, wo=wo, bo=bo)
        for name in ("ln1", "ln2", "ln3"):
            layer[name] = {"g": jnp.ones((1, HIDDEN), jnp.float32),
                           "b": jnp.zeros((1, HIDDEN), jnp.float32)}
        w1, b1 = _linear(kit, HIDDEN, PF_DIM)
        w2, b2 = _linear(kit, PF_DIM, HIDDEN)
        layer["ff"] = dict(w1=w1, b1=b1, w2=w2, b2=b2)
        params["layers"].append(layer)
    wout, bout = _linear(kit, HIDDEN, OUTPUT_DIM)
    params["fc_out"] = {"w": wout, "b": bout}
    return params


# ---------------------------- Pure-JAX reference -----------------------------

def ref_forward(trg, enc_src, trg_mask, src_mask, params):
    B, L = trg.shape
    x = params["tok_emb"][trg] * math.sqrt(HIDDEN) + params["pos_emb"][jnp.arange(L)][None]

    def ref_mha(q, kv, mask, p):
        Lq, Lk = q.shape[1], kv.shape[1]
        Q = (q @ p["wq"] + p["bq"]).reshape(B, Lq, N_HEADS, HEAD_DIM).transpose(0, 2, 1, 3)
        K = (kv @ p["wk"] + p["bk"]).reshape(B, Lk, N_HEADS, HEAD_DIM).transpose(0, 2, 1, 3)
        V = (kv @ p["wv"] + p["bv"]).reshape(B, Lk, N_HEADS, HEAD_DIM).transpose(0, 2, 1, 3)
        energy = jnp.einsum("bhqd,bhkd->bhqk", Q, K) / math.sqrt(HEAD_DIM)
        energy = jnp.where(mask[:, None] == 0.0, NEG_INF, energy)
        attn = jax.nn.softmax(energy, axis=-1)
        ctx = jnp.einsum("bhqk,bhkd->bhqd", attn, V).transpose(0, 2, 1, 3).reshape(B, Lq, HIDDEN)
        return ctx @ p["wo"] + p["bo"], attn

    def ref_ln(y, p):
        mu = y.mean(-1, keepdims=True)
        var = ((y - mu) ** 2).mean(-1, keepdims=True)
        return (y - mu) / jnp.sqrt(var + LN_EPS) * p["g"] + p["b"]

    attn = None
    for layer in params["layers"]:
        sa, _ = ref_mha(x, x, trg_mask, layer["sa"])
        x = ref_ln(x + sa, layer["ln1"])
        ea, attn = ref_mha(x, enc_src, src_mask, layer["ea"])
        x = ref_ln(x + ea, layer["ln2"])
        h = jnp.maximum(x @ layer["ff"]["w1"] + layer["ff"]["b1"], 0.0)
        ff = h @ layer["ff"]["w2"] + layer["ff"]["b2"]
        x = ref_ln(x + ff, layer["ln3"])
    logits = x @ params["fc_out"]["w"] + params["fc_out"]["b"]
    return jax.nn.log_softmax(logits, axis=-1), attn


# ----------------------------------- main ------------------------------------

if __name__ == "__main__":
    key = jax.random.PRNGKey(0)
    pkey, tkey, ekey = jax.random.split(key, 3)
    params = init_params(pkey)

    B, TRG_LEN, SRC_LEN = 2, 8, 16
    trg = jax.random.randint(tkey, (B, TRG_LEN), 0, OUTPUT_DIM)
    enc_src = jax.random.normal(ekey, (B, SRC_LEN, HIDDEN), jnp.float32)
    trg_mask = jnp.broadcast_to(jnp.tril(jnp.ones((TRG_LEN, TRG_LEN), jnp.float32)),
                                (B, TRG_LEN, TRG_LEN))
    src_mask = jnp.ones((B, TRG_LEN, SRC_LEN), jnp.float32)

    out, attn = decoder_forward(trg, enc_src, trg_mask, src_mask, params)
    out = jax.block_until_ready(out)
    attn = jax.block_until_ready(attn)

    ref_out, ref_attn = ref_forward(trg, enc_src, trg_mask, src_mask, params)
    np.testing.assert_allclose(np.asarray(out), np.asarray(ref_out), atol=2e-2, rtol=2e-2)
    np.testing.assert_allclose(np.asarray(attn), np.asarray(ref_attn), atol=2e-2, rtol=2e-2)

    print("KERNEL_OK")
</pallas_src>

<mosaic_0001>
module attributes {stable_mosaic.version = 11 : i64} {
  func.func @_decoder_kernel(%arg0: memref<16x32xf32, #tpu.memory_space<vmem>>, %arg1: memref<32x32xf32, #tpu.memory_space<vmem>>, %arg2: memref<16x16xf32, #tpu.memory_space<vmem>>, %arg3: memref<16x32xf32, #tpu.memory_space<vmem>>, %arg4: memref<32x768xbf16, #tpu.memory_space<vmem>>, %arg5: memref<64x64xbf16, #tpu.memory_space<vmem>>, %arg6: memref<1x1216xf32, #tpu.memory_space<vmem>>, %arg7: memref<16x128xf32, #tpu.memory_space<vmem>>, %arg8: memref<64x128xf32, #tpu.memory_space<vmem>>) attributes {dimension_semantics = [], scalar_prefetch = 0 : i64, scratch_operands = 0 : i64, tpu.core_type = #tpu.core_type<tc>} {
    %c0 = arith.constant 0 : index
    %c0_0 = arith.constant 0 : index
    %0 = vector.load %arg0[%c0, %c0_0] : memref<16x32xf32, #tpu.memory_space<vmem>>, vector<16x32xf32>
    %c0_1 = arith.constant 0 : index
    %c0_2 = arith.constant 0 : index
    %1 = vector.load %arg1[%c0_1, %c0_2] : memref<32x32xf32, #tpu.memory_space<vmem>>, vector<32x32xf32>
    %2 = arith.truncf %1 : vector<32x32xf32> to vector<32x32xbf16>
    %c0_3 = arith.constant 0 : index
    %c0_4 = arith.constant 0 : index
    %3 = vector.load %arg2[%c0_3, %c0_4] : memref<16x16xf32, #tpu.memory_space<vmem>>, vector<16x16xf32>
    %c0_5 = arith.constant 0 : index
    %c0_6 = arith.constant 0 : index
    %4 = vector.load %arg3[%c0_5, %c0_6] : memref<16x32xf32, #tpu.memory_space<vmem>>, vector<16x32xf32>
    %5 = arith.truncf %0 : vector<16x32xf32> to vector<16x32xbf16>
    %c0_7 = arith.constant 0 : index
    %c0_8 = arith.constant 0 : index
    %6 = vector.load %arg4[%c0_7, %c0_8] : memref<32x768xbf16, #tpu.memory_space<vmem>>, vector<32x96xbf16>
    %cst = arith.constant dense<0.000000e+00> : vector<16x96xf32>
    %7 = tpu.matmul %5, %6, %cst {dimension_numbers = #tpu.dot_dimension_numbers<[1], [0], [0], [1], [0, 0, 1, 1], [], []>} : vector<16x32xbf16>, vector<32x96xbf16>, vector<16x96xf32> -> vector<16x96xf32>
    %c0_9 = arith.constant 0 : index
    %c0_10 = arith.constant 0 : index
    %8 = vector.load %arg6[%c0_9, %c0_10] : memref<1x1216xf32, #tpu.memory_space<vmem>>, vector<1x96xf32>
    %9 = vector.broadcast %8 : vector<1x96xf32> to vector<16x96xf32>
    %10 = arith.addf %7, %9 : vector<16x96xf32>
    %11 = vector.extract_strided_slice %10 {offsets = [0, 0], sizes = [16, 32], strides = [1, 1]} : vector<16x96xf32> to vector<16x32xf32>
    %12 = vector.extract_strided_slice %10 {offsets = [0, 32], sizes = [16, 32], strides = [1, 1]} : vector<16x96xf32> to vector<16x32xf32>
    %13 = vector.extract_strided_slice %10 {offsets = [0, 64], sizes = [16, 32], strides = [1, 1]} : vector<16x96xf32> to vector<16x32xf32>
    %c0_11 = arith.constant 0 : index
    %c96 = arith.constant 96 : index
    %14 = vector.load %arg4[%c0_11, %c96] : memref<32x768xbf16, #tpu.memory_space<vmem>>, vector<32x32xbf16>
    %c0_12 = arith.constant 0 : index
    %c96_13 = arith.constant 96 : index
    %15 = vector.load %arg6[%c0_12, %c96_13] : memref<1x1216xf32, #tpu.memory_space<vmem>>, vector<1x32xf32>
    %16 = arith.truncf %11 : vector<16x32xf32> to vector<16x32xbf16>
    %17 = arith.truncf %12 : vector<16x32xf32> to vector<16x32xbf16>
    %18 = arith.truncf %13 : vector<16x32xf32> to vector<16x32xbf16>
    %19 = vector.extract_strided_slice %16 {offsets = [0, 0], sizes = [16, 8], strides = [1, 1]} : vector<16x32xbf16> to vector<16x8xbf16>
    %20 = vector.extract_strided_slice %17 {offsets = [0, 0], sizes = [16, 8], strides = [1, 1]} : vector<16x32xbf16> to vector<16x8xbf16>
    %cst_14 = arith.constant dense<0.000000e+00> : vector<16x16xf32>
    %21 = tpu.matmul %19, %20, %cst_14 {dimension_numbers = #tpu.dot_dimension_numbers<[1], [1], [0], [0], [0, 0, 1, 0], [], []>} : vector<16x8xbf16>, vector<16x8xbf16>, vector<16x16xf32> -> vector<16x16xf32>
    %cst_15 = arith.constant 0.353553385 : f32
    %22 = vector.broadcast %cst_15 : f32 to vector<16x16xf32>
    %23 = arith.mulf %21, %22 : vector<16x16xf32>
    %24 = arith.addf %23, %3 : vector<16x16xf32>
    %cst_16 = arith.constant dense<0xFF800000> : vector<16xf32>
    %25 = vector.multi_reduction <maximumf>, %24, %cst_16 [1] : vector<16x16xf32> to vector<16xf32>
    %26 = vector.shape_cast %25 : vector<16xf32> to vector<16x1xf32>
    %27 = vector.broadcast %26 : vector<16x1xf32> to vector<16x16xf32>
    %28 = arith.subf %24, %27 : vector<16x16xf32>
    %29 = math.exp %28 : vector<16x16xf32>
    %cst_17 = arith.constant dense<0.000000e+00> : vector<16xf32>
    %30 = vector.multi_reduction <add>, %29, %cst_17 [1] : vector<16x16xf32> to vector<16xf32>
    %31 = vector.shape_cast %30 : vector<16xf32> to vector<16x1xf32>
    %32 = tpu.reciprocal %31 {approx = true} : vector<16x1xf32> -> vector<16x1xf32>
    %33 = vector.broadcast %32 : vector<16x1xf32> to vector<16x16xf32>
    %34 = arith.mulf %29, %33 : vector<16x16xf32>
    %35 = arith.truncf %34 : vector<16x16xf32> to vector<16x16xbf16>
    %36 = vector.extract_strided_slice %18 {offsets = [0, 0], sizes = [16, 8], strides = [1, 1]} : vector<16x32xbf16> to vector<16x8xbf16>
    %cst_18 = arith.constant dense<0.000000e+00> : vector<16x8xf32>
    %37 = tpu.matmul %35, %36, %cst_18 {dimension_numbers = #tpu.dot_dimension_numbers<[1], [0], [0], [1], [0, 0, 1, 1], [], []>} : vector<16x16xbf16>, vector<16x8xbf16>, vector<16x8xf32> -> vector<16x8xf32>
    %38 = vector.extract_strided_slice %16 {offsets = [0, 8], sizes = [16, 8], strides = [1, 1]} : vector<16x32xbf16> to vector<16x8xbf16>
    %39 = vector.extract_strided_slice %17 {offsets = [0, 8], sizes = [16, 8], strides = [1, 1]} : vector<16x32xbf16> to vector<16x8xbf16>
    %cst_19 = arith.constant dense<0.000000e+00> : vector<16x16xf32>
    %40 = tpu.matmul %38, %39, %cst_19 {dimension_numbers = #tpu.dot_dimension_numbers<[1], [1], [0], [0], [0, 0, 1, 0], [], []>} : vector<16x8xbf16>, vector<16x8xbf16>, vector<16x16xf32> -> vector<16x16xf32>
    %cst_20 = arith.constant 0.353553385 : f32
    %41 = vector.broadcast %cst_20 : f32 to vector<16x16xf32>
    %42 = arith.mulf %40, %41 : vector<16x16xf32>
    %43 = arith.addf %42, %3 : vector<16x16xf32>
    %cst_21 = arith.constant dense<0xFF800000> : vector<16xf32>
    %44 = vector.multi_reduction <maximumf>, %43, %cst_21 [1] : vector<16x16xf32> to vector<16xf32>
    %45 = vector.shape_cast %44 : vector<16xf32> to vector<16x1xf32>
    %46 = vector.broadcast %45 : vector<16x1xf32> to vector<16x16xf32>
    %47 = arith.subf %43, %46 : vector<16x16xf32>
    %48 = math.exp %47 : vector<16x16xf32>
    %cst_22 = arith.constant dense<0.000000e+00> : vector<16xf32>
    %49 = vector.multi_reduction <add>, %48, %cst_22 [1] : vector<16x16xf32> to vector<16xf32>
    %50 = vector.shape_cast %49 : vector<16xf32> to vector<16x1xf32>
    %51 = tpu.reciprocal %50 {approx = true} : vector<16x1xf32> -> vector<16x1xf32>
    %52 = vector.broadcast %51 : vector<16x1xf32> to vector<16x16xf32>
    %53 = arith.mulf %48, %52 : vector<16x16xf32>
    %54 = arith.truncf %53 : vector<16x16xf32> to vector<16x16xbf16>
    %55 = vector.extract_strided_slice %18 {offsets = [0, 8], sizes = [16, 8], strides = [1, 1]} : vector<16x32xbf16> to vector<16x8xbf16>
    %cst_23 = arith.constant dense<0.000000e+00> : vector<16x8xf32>
    %56 = tpu.matmul %54, %55, %cst_23 {dimension_numbers = #tpu.dot_dimension_numbers<[1], [0], [0], [1], [0, 0, 1, 1], [], []>} : vector<16x16xbf16>, vector<16x8xbf16>, vector<16x8xf32> -> vector<16x8xf32>
    %57 = vector.extract_strided_slice %16 {offsets = [0, 16], sizes = [16, 8], strides = [1, 1]} : vector<16x32xbf16> to vector<16x8xbf16>
    %58 = vector.extract_strided_slice %17 {offsets = [0, 16], sizes = [16, 8], strides = [1, 1]} : vector<16x32xbf16> to vector<16x8xbf16>
    %cst_24 = arith.constant dense<0.000000e+00> : vector<16x16xf32>
    %59 = tpu.matmul %57, %58, %cst_24 {dimension_numbers = #tpu.dot_dimension_numbers<[1], [1], [0], [0], [0, 0, 1, 0], [], []>} : vector<16x8xbf16>, vector<16x8xbf16>, vector<16x16xf32> -> vector<16x16xf32>
    %cst_25 = arith.constant 0.353553385 : f32
    %60 = vector.broadcast %cst_25 : f32 to vector<16x16xf32>
    %61 = arith.mulf %59, %60 : vector<16x16xf32>
    %62 = arith.addf %61, %3 : vector<16x16xf32>
    %cst_26 = arith.constant dense<0xFF800000> : vector<16xf32>
    %63 = vector.multi_reduction <maximumf>, %62, %cst_26 [1] : vector<16x16xf32> to vector<16xf32>
    %64 = vector.shape_cast %63 : vector<16xf32> to vector<16x1xf32>
    %65 = vector.broadcast %64 : vector<16x1xf32> to vector<16x16xf32>
    %66 = arith.subf %62, %65 : vector<16x16xf32>
    %67 = math.exp %66 : vector<16x16xf32>
    %cst_27 = arith.constant dense<0.000000e+00> : vector<16xf32>
    %68 = vector.multi_reduction <add>, %67, %cst_27 [1] : vector<16x16xf32> to vector<16xf32>
    %69 = vector.shape_cast %68 : vector<16xf32> to vector<16x1xf32>
    %70 = tpu.reciprocal %69 {approx = true} : vector<16x1xf32> -> vector<16x1xf32>
    %71 = vector.broadcast %70 : vector<16x1xf32> to vector<16x16xf32>
    %72 = arith.mulf %67, %71 : vector<16x16xf32>
    %73 = arith.truncf %72 : vector<16x16xf32> to vector<16x16xbf16>
    %74 = vector.extract_strided_slice %18 {offsets = [0, 16], sizes = [16, 8], strides = [1, 1]} : vector<16x32xbf16> to vector<16x8xbf16>
    %cst_28 = arith.constant dense<0.000000e+00> : vector<16x8xf32>
    %75 = tpu.matmul %73, %74, %cst_28 {dimension_numbers = #tpu.dot_dimension_numbers<[1], [0], [0], [1], [0, 0, 1, 1], [], []>} : vector<16x16xbf16>, vector<16x8xbf16>, vector<16x8xf32> -> vector<16x8xf32>
    %76 = vector.extract_strided_slice %16 {offsets = [0, 24], sizes = [16, 8], strides = [1, 1]} : vector<16x32xbf16> to vector<16x8xbf16>
    %77 = vector.extract_strided_slice %17 {offsets = [0, 24], sizes = [16, 8], strides = [1, 1]} : vector<16x32xbf16> to vector<16x8xbf16>
    %cst_29 = arith.constant dense<0.000000e+00> : vector<16x16xf32>
    %78 = tpu.matmul %76, %77, %cst_29 {dimension_numbers = #tpu.dot_dimension_numbers<[1], [1], [0], [0], [0, 0, 1, 0], [], []>} : vector<16x8xbf16>, vector<16x8xbf16>, vector<16x16xf32> -> vector<16x16xf32>
    %cst_30 = arith.constant 0.353553385 : f32
    %79 = vector.broadcast %cst_30 : f32 to vector<16x16xf32>
    %80 = arith.mulf %78, %79 : vector<16x16xf32>
    %81 = arith.addf %80, %3 : vector<16x16xf32>
    %cst_31 = arith.constant dense<0xFF800000> : vector<16xf32>
    %82 = vector.multi_reduction <maximumf>, %81, %cst_31 [1] : vector<16x16xf32> to vector<16xf32>
    %83 = vector.shape_cast %82 : vector<16xf32> to vector<16x1xf32>
    %84 = vector.broadcast %83 : vector<16x1xf32> to vector<16x16xf32>
    %85 = arith.subf %81, %84 : vector<16x16xf32>
    %86 = math.exp %85 : vector<16x16xf32>
    %cst_32 = arith.constant dense<0.000000e+00> : vector<16xf32>
    %87 = vector.multi_reduction <add>, %86, %cst_32 [1] : vector<16x16xf32> to vector<16xf32>
    %88 = vector.shape_cast %87 : vector<16xf32> to vector<16x1xf32>
    %89 = tpu.reciprocal %88 {approx = true} : vector<16x1xf32> -> vector<16x1xf32>
    %90 = vector.broadcast %89 : vector<16x1xf32> to vector<16x16xf32>
    %91 = arith.mulf %86, %90 : vector<16x16xf32>
    %92 = arith.truncf %91 : vector<16x16xf32> to vector<16x16xbf16>
    %93 = vector.extract_strided_slice %18 {offsets = [0, 24], sizes = [16, 8], strides = [1, 1]} : vector<16x32xbf16> to vector<16x8xbf16>
    %cst_33 = arith.constant dense<0.000000e+00> : vector<16x8xf32>
    %94 = tpu.matmul %92, %93, %cst_33 {dimension_numbers = #tpu.dot_dimension_numbers<[1], [0], [0], [1], [0, 0, 1, 1], [], []>} : vector<16x16xbf16>, vector<16x8xbf16>, vector<16x8xf32> -> vector<16x8xf32>
    %95 = tpu.concatenate %37, %56, %75, %94 in 1 : vector<16x8xf32>, vector<16x8xf32>, vector<16x8xf32>, vector<16x8xf32> -> vector<16x32xf32>
    %96 = arith.truncf %95 : vector<16x32xf32> to vector<16x32xbf16>
    %cst_34 = arith.constant dense<0.000000e+00> : vector<16x32xf32>
    %97 = tpu.matmul %96, %14, %cst_34 {dimension_numbers = #tpu.dot_dimension_numbers<[1], [0], [0], [1], [0, 0, 1, 1], [], []>} : vector<16x32xbf16>, vector<32x32xbf16>, vector<16x32xf32> -> vector<16x32xf32>
    %98 = vector.broadcast %15 : vector<1x32xf32> to vector<16x32xf32>
    %99 = arith.addf %97, %98 : vector<16x32xf32>
    %100 = arith.addf %0, %99 : vector<16x32xf32>
    %c0_35 = arith.constant 0 : index
    %c128 = arith.constant 128 : index
    %101 = vector.load %arg6[%c0_35, %c128] : memref<1x1216xf32, #tpu.memory_space<vmem>>, vector<1x32xf32>
    %c0_36 = arith.constant 0 : index
    %c160 = arith.constant 160 : index
    %102 = vector.load %arg6[%c0_36, %c160] : memref<1x1216xf32, #tpu.memory_space<vmem>>, vector<1x32xf32>
    %cst_37 = arith.constant dense<0.000000e+00> : vector<16xf32>
    %103 = vector.multi_reduction <add>, %100, %cst_37 [1] : vector<16x32xf32> to vector<16xf32>
    %104 = vector.shape_cast %103 : vector<16xf32> to vector<16x1xf32>
    %cst_38 = arith.constant 3.200000e+01 : f32
    %105 = vector.broadcast %cst_38 : f32 to vector<16x1xf32>
    %106 = arith.divf %104, %105 : vector<16x1xf32>
    %107 = vector.broadcast %106 : vector<16x1xf32> to vector<16x32xf32>
    %108 = arith.subf %100, %107 : vector<16x32xf32>
    %109 = arith.mulf %108, %108 : vector<16x32xf32>
    %cst_39 = arith.constant dense<0.000000e+00> : vector<16xf32>
    %110 = vector.multi_reduction <add>, %109, %cst_39 [1] : vector<16x32xf32> to vector<16xf32>
    %111 = vector.shape_cast %110 : vector<16xf32> to vector<16x1xf32>
    %cst_40 = arith.constant 3.200000e+01 : f32
    %112 = vector.broadcast %cst_40 : f32 to vector<16x1xf32>
    %113 = arith.divf %111, %112 : vector<16x1xf32>
    %114 = vector.broadcast %106 : vector<16x1xf32> to vector<16x32xf32>
    %115 = arith.subf %100, %114 : vector<16x32xf32>
    %cst_41 = arith.constant 9.99999974E-6 : f32
    %116 = vector.broadcast %cst_41 : f32 to vector<16x1xf32>
    %117 = arith.addf %113, %116 : vector<16x1xf32>
    %118 = math.rsqrt %117 : vector<16x1xf32>
    %119 = vector.broadcast %118 : vector<16x1xf32> to vector<16x32xf32>
    %120 = arith.mulf %115, %119 : vector<16x32xf32>
    %121 = vector.broadcast %101 : vector<1x32xf32> to vector<16x32xf32>
    %122 = arith.mulf %120, %121 : vector<16x32xf32>
    %123 = vector.broadcast %102 : vector<1x32xf32> to vector<16x32xf32>
    %124 = arith.addf %122, %123 : vector<16x32xf32>
    %125 = arith.truncf %124 : vector<16x32xf32> to vector<16x32xbf16>
    %c0_42 = arith.constant 0 : index
    %c128_43 = arith.constant 128 : index
    %126 = vector.load %arg4[%c0_42, %c128_43] : memref<32x768xbf16, #tpu.memory_space<vmem>>, vector<32x32xbf16>
    %cst_44 = arith.constant dense<0.000000e+00> : vector<16x32xf32>
    %127 = tpu.matmul %125, %126, %cst_44 {dimension_numbers = #tpu.dot_dimension_numbers<[1], [0], [0], [1], [0, 0, 1, 1], [], []>} : vector<16x32xbf16>, vector<32x32xbf16>, vector<16x32xf32> -> vector<16x32xf32>
    %c0_45 = arith.constant 0 : index
    %c192 = arith.constant 192 : index
    %128 = vector.load %arg6[%c0_45, %c192] : memref<1x1216xf32, #tpu.memory_space<vmem>>, vector<1x32xf32>
    %129 = vector.broadcast %128 : vector<1x32xf32> to vector<16x32xf32>
    %130 = arith.addf %127, %129 : vector<16x32xf32>
    %c0_46 = arith.constant 0 : index
    %c160_47 = arith.constant 160 : index
    %131 = vector.load %arg4[%c0_46, %c160_47] : memref<32x768xbf16, #tpu.memory_space<vmem>>, vector<32x64xbf16>
    %cst_48 = arith.constant dense<0.000000e+00> : vector<32x64xf32>
    %132 = tpu.matmul %2, %131, %cst_48 {dimension_numbers = #tpu.dot_dimension_numbers<[1], [0], [0], [1], [0, 0, 1, 1], [], []>} : vector<32x32xbf16>, vector<32x64xbf16>, vector<32x64xf32> -> vector<32x64xf32>
    %c0_49 = arith.constant 0 : index
    %c224 = arith.constant 224 : index
    %133 = vector.load %arg6[%c0_49, %c224] : memref<1x1216xf32, #tpu.memory_space<vmem>>, vector<1x64xf32>
    %134 = vector.broadcast %133 : vector<1x64xf32> to vector<32x64xf32>
    %135 = arith.addf %132, %134 : vector<32x64xf32>
    %136 = vector.extract_strided_slice %135 {offsets = [0, 0], sizes = [32, 32], strides = [1, 1]} : vector<32x64xf32> to vector<32x32xf32>
    %137 = vector.extract_strided_slice %135 {offsets = [0, 32], sizes = [32, 32], strides = [1, 1]} : vector<32x64xf32> to vector<32x32xf32>
    %c0_50 = arith.constant 0 : index
    %c224_51 = arith.constant 224 : index
    %138 = vector.load %arg4[%c0_50, %c224_51] : memref<32x768xbf16, #tpu.memory_space<vmem>>, vector<32x32xbf16>
    %c0_52 = arith.constant 0 : index
    %c288 = arith.constant 288 : index
    %139 = vector.load %arg6[%c0_52, %c288] : memref<1x1216xf32, #tpu.memory_space<vmem>>, vector<1x32xf32>
    %140 = arith.truncf %130 : vector<16x32xf32> to vector<16x32xbf16>
    %141 = arith.truncf %136 : vector<32x32xf32> to vector<32x32xbf16>
    %142 = arith.truncf %137 : vector<32x32xf32> to vector<32x32xbf16>
    %143 = vector.extract_strided_slice %140 {offsets = [0, 0], sizes = [16, 8], strides = [1, 1]} : vector<16x32xbf16> to vector<16x8xbf16>
    %144 = vector.extract_strided_slice %141 {offsets = [0, 0], sizes = [32, 8], strides = [1, 1]} : vector<32x32xbf16> to vector<32x8xbf16>
    %cst_53 = arith.constant dense<0.000000e+00> : vector<16x32xf32>
    %145 = tpu.matmul %143, %144, %cst_53 {dimension_numbers = #tpu.dot_dimension_numbers<[1], [1], [0], [0], [0, 0, 1, 0], [], []>} : vector<16x8xbf16>, vector<32x8xbf16>, vector<16x32xf32> -> vector<16x32xf32>
    %cst_54 = arith.constant 0.353553385 : f32
    %146 = vector.broadcast %cst_54 : f32 to vector<16x32xf32>
    %147 = arith.mulf %145, %146 : vector<16x32xf32>
    %148 = arith.addf %147, %4 : vector<16x32xf32>
    %cst_55 = arith.constant dense<0xFF800000> : vector<16xf32>
    %149 = vector.multi_reduction <maximumf>, %148, %cst_55 [1] : vector<16x32xf32> to vector<16xf32>
    %150 = vector.shape_cast %149 : vector<16xf32> to vector<16x1xf32>
    %151 = vector.broadcast %150 : vector<16x1xf32> to vector<16x32xf32>
    %152 = arith.subf %148, %151 : vector<16x32xf32>
    %153 = math.exp %152 : vector<16x32xf32>
    %cst_56 = arith.constant dense<0.000000e+00> : vector<16xf32>
    %154 = vector.multi_reduction <add>, %153, %cst_56 [1] : vector<16x32xf32> to vector<16xf32>
    %155 = vector.shape_cast %154 : vector<16xf32> to vector<16x1xf32>
    %156 = tpu.reciprocal %155 {approx = true} : vector<16x1xf32> -> vector<16x1xf32>
    %157 = vector.broadcast %156 : vector<16x1xf32> to vector<16x32xf32>
    %158 = arith.mulf %153, %157 : vector<16x32xf32>
    %159 = arith.truncf %158 : vector<16x32xf32> to vector<16x32xbf16>
    %160 = vector.extract_strided_slice %142 {offsets = [0, 0], sizes = [32, 8], strides = [1, 1]} : vector<32x32xbf16> to vector<32x8xbf16>
    %cst_57 = arith.constant dense<0.000000e+00> : vector<16x8xf32>
    %161 = tpu.matmul %159, %160, %cst_57 {dimension_numbers = #tpu.dot_dimension_numbers<[1], [0], [0], [1], [0, 0, 1, 1], [], []>} : vector<16x32xbf16>, vector<32x8xbf16>, vector<16x8xf32> -> vector<16x8xf32>
    %162 = vector.extract_strided_slice %140 {offsets = [0, 8], sizes = [16, 8], strides = [1, 1]} : vector<16x32xbf16> to vector<16x8xbf16>
    %163 = vector.extract_strided_slice %141 {offsets = [0, 8], sizes = [32, 8], strides = [1, 1]} : vector<32x32xbf16> to vector<32x8xbf16>
    %cst_58 = arith.constant dense<0.000000e+00> : vector<16x32xf32>
    %164 = tpu.matmul %162, %163, %cst_58 {dimension_numbers = #tpu.dot_dimension_numbers<[1], [1], [0], [0], [0, 0, 1, 0], [], []>} : vector<16x8xbf16>, vector<32x8xbf16>, vector<16x32xf32> -> vector<16x32xf32>
    %cst_59 = arith.constant 0.353553385 : f32
    %165 = vector.broadcast %cst_59 : f32 to vector<16x32xf32>
    %166 = arith.mulf %164, %165 : vector<16x32xf32>
    %167 = arith.addf %166, %4 : vector<16x32xf32>
    %cst_60 = arith.constant dense<0xFF800000> : vector<16xf32>
    %168 = vector.multi_reduction <maximumf>, %167, %cst_60 [1] : vector<16x32xf32> to vector<16xf32>
    %169 = vector.shape_cast %168 : vector<16xf32> to vector<16x1xf32>
    %170 = vector.broadcast %169 : vector<16x1xf32> to vector<16x32xf32>
    %171 = arith.subf %167, %170 : vector<16x32xf32>
    %172 = math.exp %171 : vector<16x32xf32>
    %cst_61 = arith.constant dense<0.000000e+00> : vector<16xf32>
    %173 = vector.multi_reduction <add>, %172, %cst_61 [1] : vector<16x32xf32> to vector<16xf32>
    %174 = vector.shape_cast %173 : vector<16xf32> to vector<16x1xf32>
    %175 = tpu.reciprocal %174 {approx = true} : vector<16x1xf32> -> vector<16x1xf32>
    %176 = vector.broadcast %175 : vector<16x1xf32> to vector<16x32xf32>
    %177 = arith.mulf %172, %176 : vector<16x32xf32>
    %178 = arith.truncf %177 : vector<16x32xf32> to vector<16x32xbf16>
    %179 = vector.extract_strided_slice %142 {offsets = [0, 8], sizes = [32, 8], strides = [1, 1]} : vector<32x32xbf16> to vector<32x8xbf16>
    %cst_62 = arith.constant dense<0.000000e+00> : vector<16x8xf32>
    %180 = tpu.matmul %178, %179, %cst_62 {dimension_numbers = #tpu.dot_dimension_numbers<[1], [0], [0], [1], [0, 0, 1, 1], [], []>} : vector<16x32xbf16>, vector<32x8xbf16>, vector<16x8xf32> -> vector<16x8xf32>
    %181 = vector.extract_strided_slice %140 {offsets = [0, 16], sizes = [16, 8], strides = [1, 1]} : vector<16x32xbf16> to vector<16x8xbf16>
    %182 = vector.extract_strided_slice %141 {offsets = [0, 16], sizes = [32, 8], strides = [1, 1]} : vector<32x32xbf16> to vector<32x8xbf16>
    %cst_63 = arith.constant dense<0.000000e+00> : vector<16x32xf32>
    %183 = tpu.matmul %181, %182, %cst_63 {dimension_numbers = #tpu.dot_dimension_numbers<[1], [1], [0], [0], [0, 0, 1, 0], [], []>} : vector<16x8xbf16>, vector<32x8xbf16>, vector<16x32xf32> -> vector<16x32xf32>
    %cst_64 = arith.constant 0.353553385 : f32
    %184 = vector.broadcast %cst_64 : f32 to vector<16x32xf32>
    %185 = arith.mulf %183, %184 : vector<16x32xf32>
    %186 = arith.addf %185, %4 : vector<16x32xf32>
    %cst_65 = arith.constant dense<0xFF800000> : vector<16xf32>
    %187 = vector.multi_reduction <maximumf>, %186, %cst_65 [1] : vector<16x32xf32> to vector<16xf32>
    %188 = vector.shape_cast %187 : vector<16xf32> to vector<16x1xf32>
    %189 = vector.broadcast %188 : vector<16x1xf32> to vector<16x32xf32>
    %190 = arith.subf %186, %189 : vector<16x32xf32>
    %191 = math.exp %190 : vector<16x32xf32>
    %cst_66 = arith.constant dense<0.000000e+00> : vector<16xf32>
    %192 = vector.multi_reduction <add>, %191, %cst_66 [1] : vector<16x32xf32> to vector<16xf32>
    %193 = vector.shape_cast %192 : vector<16xf32> to vector<16x1xf32>
    %194 = tpu.reciprocal %193 {approx = true} : vector<16x1xf32> -> vector<16x1xf32>
    %195 = vector.broadcast %194 : vector<16x1xf32> to vector<16x32xf32>
    %196 = arith.mulf %191, %195 : vector<16x32xf32>
    %197 = arith.truncf %196 : vector<16x32xf32> to vector<16x32xbf16>
    %198 = vector.extract_strided_slice %142 {offsets = [0, 16], sizes = [32, 8], strides = [1, 1]} : vector<32x32xbf16> to vector<32x8xbf16>
    %cst_67 = arith.constant dense<0.000000e+00> : vector<16x8xf32>
    %199 = tpu.matmul %197, %198, %cst_67 {dimension_numbers = #tpu.dot_dimension_numbers<[1], [0], [0], [1], [0, 0, 1, 1], [], []>} : vector<16x32xbf16>, vector<32x8xbf16>, vector<16x8xf32> -> vector<16x8xf32>
    %200 = vector.extract_strided_slice %140 {offsets = [0, 24], sizes = [16, 8], strides = [1, 1]} : vector<16x32xbf16> to vector<16x8xbf16>
    %201 = vector.extract_strided_slice %141 {offsets = [0, 24], sizes = [32, 8], strides = [1, 1]} : vector<32x32xbf16> to vector<32x8xbf16>
    %cst_68 = arith.constant dense<0.000000e+00> : vector<16x32xf32>
    %202 = tpu.matmul %200, %201, %cst_68 {dimension_numbers = #tpu.dot_dimension_numbers<[1], [1], [0], [0], [0, 0, 1, 0], [], []>} : vector<16x8xbf16>, vector<32x8xbf16>, vector<16x32xf32> -> vector<16x32xf32>
    %cst_69 = arith.constant 0.353553385 : f32
    %203 = vector.broadcast %cst_69 : f32 to vector<16x32xf32>
    %204 = arith.mulf %202, %203 : vector<16x32xf32>
    %205 = arith.addf %204, %4 : vector<16x32xf32>
    %cst_70 = arith.constant dense<0xFF800000> : vector<16xf32>
    %206 = vector.multi_reduction <maximumf>, %205, %cst_70 [1] : vector<16x32xf32> to vector<16xf32>
    %207 = vector.shape_cast %206 : vector<16xf32> to vector<16x1xf32>
    %208 = vector.broadcast %207 : vector<16x1xf32> to vector<16x32xf32>
    %209 = arith.subf %205, %208 : vector<16x32xf32>
    %210 = math.exp %209 : vector<16x32xf32>
    %cst_71 = arith.constant dense<0.000000e+00> : vector<16xf32>
    %211 = vector.multi_reduction <add>, %210, %cst_71 [1] : vector<16x32xf32> to vector<16xf32>
    %212 = vector.shape_cast %211 : vector<16xf32> to vector<16x1xf32>
    %213 = tpu.reciprocal %212 {approx = true} : vector<16x1xf32> -> vector<16x1xf32>
    %214 = vector.broadcast %213 : vector<16x1xf32> to vector<16x32xf32>
    %215 = arith.mulf %210, %214 : vector<16x32xf32>
    %216 = arith.truncf %215 : vector<16x32xf32> to vector<16x32xbf16>
    %217 = vector.extract_strided_slice %142 {offsets = [0, 24], sizes = [32, 8], strides = [1, 1]} : vector<32x32xbf16> to vector<32x8xbf16>
    %cst_72 = arith.constant dense<0.000000e+00> : vector<16x8xf32>
    %218 = tpu.matmul %216, %217, %cst_72 {dimension_numbers = #tpu.dot_dimension_numbers<[1], [0], [0], [1], [0, 0, 1, 1], [], []>} : vector<16x32xbf16>, vector<32x8xbf16>, vector<16x8xf32> -> vector<16x8xf32>
    %219 = tpu.concatenate %161, %180, %199, %218 in 1 : vector<16x8xf32>, vector<16x8xf32>, vector<16x8xf32>, vector<16x8xf32> -> vector<16x32xf32>
    %220 = arith.truncf %219 : vector<16x32xf32> to vector<16x32xbf16>
    %cst_73 = arith.constant dense<0.000000e+00> : vector<16x32xf32>
    %221 = tpu.matmul %220, %138, %cst_73 {dimension_numbers = #tpu.dot_dimension_numbers<[1], [0], [0], [1], [0, 0, 1, 1], [], []>} : vector<16x32xbf16>, vector<32x32xbf16>, vector<16x32xf32> -> vector<16x32xf32>
    %222 = vector.broadcast %139 : vector<1x32xf32> to vector<16x32xf32>
    %223 = arith.addf %221, %222 : vector<16x32xf32>
    %224 = arith.addf %124, %223 : vector<16x32xf32>
    %c0_74 = arith.constant 0 : index
    %c320 = arith.constant 320 : index
    %225 = vector.load %arg6[%c0_74, %c320] : memref<1x1216xf32, #tpu.memory_space<vmem>>, vector<1x32xf32>
    %c0_75 = arith.constant 0 : index
    %c352 = arith.constant 352 : index
    %226 = vector.load %arg6[%c0_75, %c352] : memref<1x1216xf32, #tpu.memory_space<vmem>>, vector<1x32xf32>
    %cst_76 = arith.constant dense<0.000000e+00> : vector<16xf32>
    %227 = vector.multi_reduction <add>, %224, %cst_76 [1] : vector<16x32xf32> to vector<16xf32>
    %228 = vector.shape_cast %227 : vector<16xf32> to vector<16x1xf32>
    %cst_77 = arith.constant 3.200000e+01 : f32
    %229 = vector.broadcast %cst_77 : f32 to vector<16x1xf32>
    %230 = arith.divf %228, %229 : vector<16x1xf32>
    %231 = vector.broadcast %230 : vector<16x1xf32> to vector<16x32xf32>
    %232 = arith.subf %224, %231 : vector<16x32xf32>
    %233 = arith.mulf %232, %232 : vector<16x32xf32>
    %cst_78 = arith.constant dense<0.000000e+00> : vector<16xf32>
    %234 = vector.multi_reduction <add>, %233, %cst_78 [1] : vector<16x32xf32> to vector<16xf32>
    %235 = vector.shape_cast %234 : vector<16xf32> to vector<16x1xf32>
    %cst_79 = arith.constant 3.200000e+01 : f32
    %236 = vector.broadcast %cst_79 : f32 to vector<16x1xf32>
    %237 = arith.divf %235, %236 : vector<16x1xf32>
    %238 = vector.broadcast %230 : vector<16x1xf32> to vector<16x32xf32>
    %239 = arith.subf %224, %238 : vector<16x32xf32>
    %cst_80 = arith.constant 9.99999974E-6 : f32
    %240 = vector.broadcast %cst_80 : f32 to vector<16x1xf32>
    %241 = arith.addf %237, %240 : vector<16x1xf32>
    %242 = math.rsqrt %241 : vector<16x1xf32>
    %243 = vector.broadcast %242 : vector<16x1xf32> to vector<16x32xf32>
    %244 = arith.mulf %239, %243 : vector<16x32xf32>
    %245 = vector.broadcast %225 : vector<1x32xf32> to vector<16x32xf32>
    %246 = arith.mulf %244, %245 : vector<16x32xf32>
    %247 = vector.broadcast %226 : vector<1x32xf32> to vector<16x32xf32>
    %248 = arith.addf %246, %247 : vector<16x32xf32>
    %249 = arith.truncf %248 : vector<16x32xf32> to vector<16x32xbf16>
    %c0_81 = arith.constant 0 : index
    %c256 = arith.constant 256 : index
    %250 = vector.load %arg4[%c0_81, %c256] : memref<32x768xbf16, #tpu.memory_space<vmem>>, vector<32x64xbf16>
    %cst_82 = arith.constant dense<0.000000e+00> : vector<16x64xf32>
    %251 = tpu.matmul %249, %250, %cst_82 {dimension_numbers = #tpu.dot_dimension_numbers<[1], [0], [0], [1], [0, 0, 1, 1], [], []>} : vector<16x32xbf16>, vector<32x64xbf16>, vector<16x64xf32> -> vector<16x64xf32>
    %c0_83 = arith.constant 0 : index
    %c384 = arith.constant 384 : index
    %252 = vector.load %arg6[%c0_83, %c384] : memref<1x1216xf32, #tpu.memory_space<vmem>>, vector<1x64xf32>
    %253 = vector.broadcast %252 : vector<1x64xf32> to vector<16x64xf32>
    %254 = arith.addf %251, %253 : vector<16x64xf32>
    %cst_84 = arith.constant 0.000000e+00 : f32
    %255 = vector.broadcast %cst_84 : f32 to vector<16x64xf32>
    %256 = arith.maximumf %254, %255 : vector<16x64xf32>
    %257 = arith.truncf %256 : vector<16x64xf32> to vector<16x64xbf16>
    %c0_85 = arith.constant 0 : index
    %c0_86 = arith.constant 0 : index
    %258 = vector.load %arg5[%c0_85, %c0_86] : memref<64x64xbf16, #tpu.memory_space<vmem>>, vector<64x32xbf16>
    %cst_87 = arith.constant dense<0.000000e+00> : vector<16x32xf32>
    %259 = tpu.matmul %257, %258, %cst_87 {dimension_numbers = #tpu.dot_dimension_numbers<[1], [0], [0], [1], [0, 0, 1, 1], [], []>} : vector<16x64xbf16>, vector<64x32xbf16>, vector<16x32xf32> -> vector<16x32xf32>
    %c0_88 = arith.constant 0 : index
    %c448 = arith.constant 448 : index
    %260 = vector.load %arg6[%c0_88, %c448] : memref<1x1216xf32, #tpu.memory_space<vmem>>, vector<1x32xf32>
    %261 = vector.broadcast %260 : vector<1x32xf32> to vector<16x32xf32>
    %262 = arith.addf %259, %261 : vector<16x32xf32>
    %263 = arith.addf %248, %262 : vector<16x32xf32>
    %c0_89 = arith.constant 0 : index
    %c480 = arith.constant 480 : index
    %264 = vector.load %arg6[%c0_89, %c480] : memref<1x1216xf32, #tpu.memory_space<vmem>>, vector<1x32xf32>
    %c0_90 = arith.constant 0 : index
    %c512 = arith.constant 512 : index
    %265 = vector.load %arg6[%c0_90, %c512] : memref<1x1216xf32, #tpu.memory_space<vmem>>, vector<1x32xf32>
    %cst_91 = arith.constant dense<0.000000e+00> : vector<16xf32>
    %266 = vector.multi_reduction <add>, %263, %cst_91 [1] : vector<16x32xf32> to vector<16xf32>
    %267 = vector.shape_cast %266 : vector<16xf32> to vector<16x1xf32>
    %cst_92 = arith.constant 3.200000e+01 : f32
    %268 = vector.broadcast %cst_92 : f32 to vector<16x1xf32>
    %269 = arith.divf %267, %268 : vector<16x1xf32>
    %270 = vector.broadcast %269 : vector<16x1xf32> to vector<16x32xf32>
    %271 = arith.subf %263, %270 : vector<16x32xf32>
    %272 = arith.mulf %271, %271 : vector<16x32xf32>
    %cst_93 = arith.constant dense<0.000000e+00> : vector<16xf32>
    %273 = vector.multi_reduction <add>, %272, %cst_93 [1] : vector<16x32xf32> to vector<16xf32>
    %274 = vector.shape_cast %273 : vector<16xf32> to vector<16x1xf32>
    %cst_94 = arith.constant 3.200000e+01 : f32
    %275 = vector.broadcast %cst_94 : f32 to vector<16x1xf32>
    %276 = arith.divf %274, %275 : vector<16x1xf32>
    %277 = vector.broadcast %269 : vector<16x1xf32> to vector<16x32xf32>
    %278 = arith.subf %263, %277 : vector<16x32xf32>
    %cst_95 = arith.constant 9.99999974E-6 : f32
    %279 = vector.broadcast %cst_95 : f32 to vector<16x1xf32>
    %280 = arith.addf %276, %279 : vector<16x1xf32>
    %281 = math.rsqrt %280 : vector<16x1xf32>
    %282 = vector.broadcast %281 : vector<16x1xf32> to vector<16x32xf32>
    %283 = arith.mulf %278, %282 : vector<16x32xf32>
    %284 = vector.broadcast %264 : vector<1x32xf32> to vector<16x32xf32>
    %285 = arith.mulf %283, %284 : vector<16x32xf32>
    %286 = vector.broadcast %265 : vector<1x32xf32> to vector<16x32xf32>
    %287 = arith.addf %285, %286 : vector<16x32xf32>
    %288 = arith.truncf %287 : vector<16x32xf32> to vector<16x32xbf16>
    %c0_96 = arith.constant 0 : index
    %c320_97 = arith.constant 320 : index
    %289 = vector.load %arg4[%c0_96, %c320_97] : memref<32x768xbf16, #tpu.memory_space<vmem>>, vector<32x96xbf16>
    %cst_98 = arith.constant dense<0.000000e+00> : vector<16x96xf32>
    %290 = tpu.matmul %288, %289, %cst_98 {dimension_numbers = #tpu.dot_dimension_numbers<[1], [0], [0], [1], [0, 0, 1, 1], [], []>} : vector<16x32xbf16>, vector<32x96xbf16>, vector<16x96xf32> -> vector<16x96xf32>
    %c0_99 = arith.constant 0 : index
    %c544 = arith.constant 544 : index
    %291 = vector.load %arg6[%c0_99, %c544] : memref<1x1216xf32, #tpu.memory_space<vmem>>, vector<1x96xf32>
    %292 = vector.broadcast %291 : vector<1x96xf32> to vector<16x96xf32>
    %293 = arith.addf %290, %292 : vector<16x96xf32>
    %294 = vector.extract_strided_slice %293 {offsets = [0, 0], sizes = [16, 32], strides = [1, 1]} : vector<16x96xf32> to vector<16x32xf32>
    %295 = vector.extract_strided_slice %293 {offsets = [0, 32], sizes = [16, 32], strides = [1, 1]} : vector<16x96xf32> to vector<16x32xf32>
    %296 = vector.extract_strided_slice %293 {offsets = [0, 64], sizes = [16, 32], strides = [1, 1]} : vector<16x96xf32> to vector<16x32xf32>
    %c0_100 = arith.constant 0 : index
    %c416 = arith.constant 416 : index
    %297 = vector.load %arg4[%c0_100, %c416] : memref<32x768xbf16, #tpu.memory_space<vmem>>, vector<32x32xbf16>
    %c0_101 = arith.constant 0 : index
    %c640 = arith.constant 640 : index
    %298 = vector.load %arg6[%c0_101, %c640] : memref<1x1216xf32, #tpu.memory_space<vmem>>, vector<1x32xf32>
    %299 = arith.truncf %294 : vector<16x32xf32> to vector<16x32xbf16>
    %300 = arith.truncf %295 : vector<16x32xf32> to vector<16x32xbf16>
    %301 = arith.truncf %296 : vector<16x32xf32> to vector<16x32xbf16>
    %302 = vector.extract_strided_slice %299 {offsets = [0, 0], sizes = [16, 8], strides = [1, 1]} : vector<16x32xbf16> to vector<16x8xbf16>
    %303 = vector.extract_strided_slice %300 {offsets = [0, 0], sizes = [16, 8], strides = [1, 1]} : vector<16x32xbf16> to vector<16x8xbf16>
    %cst_102 = arith.constant dense<0.000000e+00> : vector<16x16xf32>
    %304 = tpu.matmul %302, %303, %cst_102 {dimension_numbers = #tpu.dot_dimension_numbers<[1], [1], [0], [0], [0, 0, 1, 0], [], []>} : vector<16x8xbf16>, vector<16x8xbf16>, vector<16x16xf32> -> vector<16x16xf32>
    %cst_103 = arith.constant 0.353553385 : f32
    %305 = vector.broadcast %cst_103 : f32 to vector<16x16xf32>
    %306 = arith.mulf %304, %305 : vector<16x16xf32>
    %307 = arith.addf %306, %3 : vector<16x16xf32>
    %cst_104 = arith.constant dense<0xFF800000> : vector<16xf32>
    %308 = vector.multi_reduction <maximumf>, %307, %cst_104 [1] : vector<16x16xf32> to vector<16xf32>
    %309 = vector.shape_cast %308 : vector<16xf32> to vector<16x1xf32>
    %310 = vector.broadcast %309 : vector<16x1xf32> to vector<16x16xf32>
    %311 = arith.subf %307, %310 : vector<16x16xf32>
    %312 = math.exp %311 : vector<16x16xf32>
    %cst_105 = arith.constant dense<0.000000e+00> : vector<16xf32>
    %313 = vector.multi_reduction <add>, %312, %cst_105 [1] : vector<16x16xf32> to vector<16xf32>
    %314 = vector.shape_cast %313 : vector<16xf32> to vector<16x1xf32>
    %315 = tpu.reciprocal %314 {approx = true} : vector<16x1xf32> -> vector<16x1xf32>
    %316 = vector.broadcast %315 : vector<16x1xf32> to vector<16x16xf32>
    %317 = arith.mulf %312, %316 : vector<16x16xf32>
    %318 = arith.truncf %317 : vector<16x16xf32> to vector<16x16xbf16>
    %319 = vector.extract_strided_slice %301 {offsets = [0, 0], sizes = [16, 8], strides = [1, 1]} : vector<16x32xbf16> to vector<16x8xbf16>
    %cst_106 = arith.constant dense<0.000000e+00> : vector<16x8xf32>
    %320 = tpu.matmul %318, %319, %cst_106 {dimension_numbers = #tpu.dot_dimension_numbers<[1], [0], [0], [1], [0, 0, 1, 1], [], []>} : vector<16x16xbf16>, vector<16x8xbf16>, vector<16x8xf32> -> vector<16x8xf32>
    %321 = vector.extract_strided_slice %299 {offsets = [0, 8], sizes = [16, 8], strides = [1, 1]} : vector<16x32xbf16> to vector<16x8xbf16>
    %322 = vector.extract_strided_slice %300 {offsets = [0, 8], sizes = [16, 8], strides = [1, 1]} : vector<16x32xbf16> to vector<16x8xbf16>
    %cst_107 = arith.constant dense<0.000000e+00> : vector<16x16xf32>
    %323 = tpu.matmul %321, %322, %cst_107 {dimension_numbers = #tpu.dot_dimension_numbers<[1], [1], [0], [0], [0, 0, 1, 0], [], []>} : vector<16x8xbf16>, vector<16x8xbf16>, vector<16x16xf32> -> vector<16x16xf32>
    %cst_108 = arith.constant 0.353553385 : f32
    %324 = vector.broadcast %cst_108 : f32 to vector<16x16xf32>
    %325 = arith.mulf %323, %324 : vector<16x16xf32>
    %326 = arith.addf %325, %3 : vector<16x16xf32>
    %cst_109 = arith.constant dense<0xFF800000> : vector<16xf32>
    %327 = vector.multi_reduction <maximumf>, %326, %cst_109 [1] : vector<16x16xf32> to vector<16xf32>
    %328 = vector.shape_cast %327 : vector<16xf32> to vector<16x1xf32>
    %329 = vector.broadcast %328 : vector<16x1xf32> to vector<16x16xf32>
    %330 = arith.subf %326, %329 : vector<16x16xf32>
    %331 = math.exp %330 : vector<16x16xf32>
    %cst_110 = arith.constant dense<0.000000e+00> : vector<16xf32>
    %332 = vector.multi_reduction <add>, %331, %cst_110 [1] : vector<16x16xf32> to vector<16xf32>
    %333 = vector.shape_cast %332 : vector<16xf32> to vector<16x1xf32>
    %334 = tpu.reciprocal %333 {approx = true} : vector<16x1xf32> -> vector<16x1xf32>
    %335 = vector.broadcast %334 : vector<16x1xf32> to vector<16x16xf32>
    %336 = arith.mulf %331, %335 : vector<16x16xf32>
    %337 = arith.truncf %336 : vector<16x16xf32> to vector<16x16xbf16>
    %338 = vector.extract_strided_slice %301 {offsets = [0, 8], sizes = [16, 8], strides = [1, 1]} : vector<16x32xbf16> to vector<16x8xbf16>
    %cst_111 = arith.constant dense<0.000000e+00> : vector<16x8xf32>
    %339 = tpu.matmul %337, %338, %cst_111 {dimension_numbers = #tpu.dot_dimension_numbers<[1], [0], [0], [1], [0, 0, 1, 1], [], []>} : vector<16x16xbf16>, vector<16x8xbf16>, vector<16x8xf32> -> vector<16x8xf32>
    %340 = vector.extract_strided_slice %299 {offsets = [0, 16], sizes = [16, 8], strides = [1, 1]} : vector<16x32xbf16> to vector<16x8xbf16>
    %341 = vector.extract_strided_slice %300 {offsets = [0, 16], sizes = [16, 8], strides = [1, 1]} : vector<16x32xbf16> to vector<16x8xbf16>
    %cst_112 = arith.constant dense<0.000000e+00> : vector<16x16xf32>
    %342 = tpu.matmul %340, %341, %cst_112 {dimension_numbers = #tpu.dot_dimension_numbers<[1], [1], [0], [0], [0, 0, 1, 0], [], []>} : vector<16x8xbf16>, vector<16x8xbf16>, vector<16x16xf32> -> vector<16x16xf32>
    %cst_113 = arith.constant 0.353553385 : f32
    %343 = vector.broadcast %cst_113 : f32 to vector<16x16xf32>
    %344 = arith.mulf %342, %343 : vector<16x16xf32>
    %345 = arith.addf %344, %3 : vector<16x16xf32>
    %cst_114 = arith.constant dense<0xFF800000> : vector<16xf32>
    %346 = vector.multi_reduction <maximumf>, %345, %cst_114 [1] : vector<16x16xf32> to vector<16xf32>
    %347 = vector.shape_cast %346 : vector<16xf32> to vector<16x1xf32>
    %348 = vector.broadcast %347 : vector<16x1xf32> to vector<16x16xf32>
    %349 = arith.subf %345, %348 : vector<16x16xf32>
    %350 = math.exp %349 : vector<16x16xf32>
    %cst_115 = arith.constant dense<0.000000e+00> : vector<16xf32>
    %351 = vector.multi_reduction <add>, %350, %cst_115 [1] : vector<16x16xf32> to vector<16xf32>
    %352 = vector.shape_cast %351 : vector<16xf32> to vector<16x1xf32>
    %353 = tpu.reciprocal %352 {approx = true} : vector<16x1xf32> -> vector<16x1xf32>
    %354 = vector.broadcast %353 : vector<16x1xf32> to vector<16x16xf32>
    %355 = arith.mulf %350, %354 : vector<16x16xf32>
    %356 = arith.truncf %355 : vector<16x16xf32> to vector<16x16xbf16>
    %357 = vector.extract_strided_slice %301 {offsets = [0, 16], sizes = [16, 8], strides = [1, 1]} : vector<16x32xbf16> to vector<16x8xbf16>
    %cst_116 = arith.constant dense<0.000000e+00> : vector<16x8xf32>
    %358 = tpu.matmul %356, %357, %cst_116 {dimension_numbers = #tpu.dot_dimension_numbers<[1], [0], [0], [1], [0, 0, 1, 1], [], []>} : vector<16x16xbf16>, vector<16x8xbf16>, vector<16x8xf32> -> vector<16x8xf32>
    %359 = vector.extract_strided_slice %299 {offsets = [0, 24], sizes = [16, 8], strides = [1, 1]} : vector<16x32xbf16> to vector<16x8xbf16>
    %360 = vector.extract_strided_slice %300 {offsets = [0, 24], sizes = [16, 8], strides = [1, 1]} : vector<16x32xbf16> to vector<16x8xbf16>
    %cst_117 = arith.constant dense<0.000000e+00> : vector<16x16xf32>
    %361 = tpu.matmul %359, %360, %cst_117 {dimension_numbers = #tpu.dot_dimension_numbers<[1], [1], [0], [0], [0, 0, 1, 0], [], []>} : vector<16x8xbf16>, vector<16x8xbf16>, vector<16x16xf32> -> vector<16x16xf32>
    %cst_118 = arith.constant 0.353553385 : f32
    %362 = vector.broadcast %cst_118 : f32 to vector<16x16xf32>
    %363 = arith.mulf %361, %362 : vector<16x16xf32>
    %364 = arith.addf %363, %3 : vector<16x16xf32>
    %cst_119 = arith.constant dense<0xFF800000> : vector<16xf32>
    %365 = vector.multi_reduction <maximumf>, %364, %cst_119 [1] : vector<16x16xf32> to vector<16xf32>
    %366 = vector.shape_cast %365 : vector<16xf32> to vector<16x1xf32>
    %367 = vector.broadcast %366 : vector<16x1xf32> to vector<16x16xf32>
    %368 = arith.subf %364, %367 : vector<16x16xf32>
    %369 = math.exp %368 : vector<16x16xf32>
    %cst_120 = arith.constant dense<0.000000e+00> : vector<16xf32>
    %370 = vector.multi_reduction <add>, %369, %cst_120 [1] : vector<16x16xf32> to vector<16xf32>
    %371 = vector.shape_cast %370 : vector<16xf32> to vector<16x1xf32>
    %372 = tpu.reciprocal %371 {approx = true} : vector<16x1xf32> -> vector<16x1xf32>
    %373 = vector.broadcast %372 : vector<16x1xf32> to vector<16x16xf32>
    %374 = arith.mulf %369, %373 : vector<16x16xf32>
    %375 = arith.truncf %374 : vector<16x16xf32> to vector<16x16xbf16>
    %376 = vector.extract_strided_slice %301 {offsets = [0, 24], sizes = [16, 8], strides = [1, 1]} : vector<16x32xbf16> to vector<16x8xbf16>
    %cst_121 = arith.constant dense<0.000000e+00> : vector<16x8xf32>
    %377 = tpu.matmul %375, %376, %cst_121 {dimension_numbers = #tpu.dot_dimension_numbers<[1], [0], [0], [1], [0, 0, 1, 1], [], []>} : vector<16x16xbf16>, vector<16x8xbf16>, vector<16x8xf32> -> vector<16x8xf32>
    %378 = tpu.concatenate %320, %339, %358, %377 in 1 : vector<16x8xf32>, vector<16x8xf32>, vector<16x8xf32>, vector<16x8xf32> -> vector<16x32xf32>
    %379 = arith.truncf %378 : vector<16x32xf32> to vector<16x32xbf16>
    %cst_122 = arith.constant dense<0.000000e+00> : vector<16x32xf32>
    %380 = tpu.matmul %379, %297, %cst_122 {dimension_numbers = #tpu.dot_dimension_numbers<[1], [0], [0], [1], [0, 0, 1, 1], [], []>} : vector<16x32xbf16>, vector<32x32xbf16>, vector<16x32xf32> -> vector<16x32xf32>
    %381 = vector.broadcast %298 : vector<1x32xf32> to vector<16x32xf32>
    %382 = arith.addf %380, %381 : vector<16x32xf32>
    %383 = arith.addf %287, %382 : vector<16x32xf32>
    %c0_123 = arith.constant 0 : index
    %c672 = arith.constant 672 : index
    %384 = vector.load %arg6[%c0_123, %c672] : memref<1x1216xf32, #tpu.memory_space<vmem>>, vector<1x32xf32>
    %c0_124 = arith.constant 0 : index
    %c704 = arith.constant 704 : index
    %385 = vector.load %arg6[%c0_124, %c704] : memref<1x1216xf32, #tpu.memory_space<vmem>>, vector<1x32xf32>
    %cst_125 = arith.constant dense<0.000000e+00> : vector<16xf32>
    %386 = vector.multi_reduction <add>, %383, %cst_125 [1] : vector<16x32xf32> to vector<16xf32>
    %387 = vector.shape_cast %386 : vector<16xf32> to vector<16x1xf32>
    %cst_126 = arith.constant 3.200000e+01 : f32
    %388 = vector.broadcast %cst_126 : f32 to vector<16x1xf32>
    %389 = arith.divf %387, %388 : vector<16x1xf32>
    %390 = vector.broadcast %389 : vector<16x1xf32> to vector<16x32xf32>
    %391 = arith.subf %383, %390 : vector<16x32xf32>
    %392 = arith.mulf %391, %391 : vector<16x32xf32>
    %cst_127 = arith.constant dense<0.000000e+00> : vector<16xf32>
    %393 = vector.multi_reduction <add>, %392, %cst_127 [1] : vector<16x32xf32> to vector<16xf32>
    %394 = vector.shape_cast %393 : vector<16xf32> to vector<16x1xf32>
    %cst_128 = arith.constant 3.200000e+01 : f32
    %395 = vector.broadcast %cst_128 : f32 to vector<16x1xf32>
    %396 = arith.divf %394, %395 : vector<16x1xf32>
    %397 = vector.broadcast %389 : vector<16x1xf32> to vector<16x32xf32>
    %398 = arith.subf %383, %397 : vector<16x32xf32>
    %cst_129 = arith.constant 9.99999974E-6 : f32
    %399 = vector.broadcast %cst_129 : f32 to vector<16x1xf32>
    %400 = arith.addf %396, %399 : vector<16x1xf32>
    %401 = math.rsqrt %400 : vector<16x1xf32>
    %402 = vector.broadcast %401 : vector<16x1xf32> to vector<16x32xf32>
    %403 = arith.mulf %398, %402 : vector<16x32xf32>
    %404 = vector.broadcast %384 : vector<1x32xf32> to vector<16x32xf32>
    %405 = arith.mulf %403, %404 : vector<16x32xf32>
    %406 = vector.broadcast %385 : vector<1x32xf32> to vector<16x32xf32>
    %407 = arith.addf %405, %406 : vector<16x32xf32>
    %408 = arith.truncf %407 : vector<16x32xf32> to vector<16x32xbf16>
    %c0_130 = arith.constant 0 : index
    %c448_131 = arith.constant 448 : index
    %409 = vector.load %arg4[%c0_130, %c448_131] : memref<32x768xbf16, #tpu.memory_space<vmem>>, vector<32x32xbf16>
    %cst_132 = arith.constant dense<0.000000e+00> : vector<16x32xf32>
    %410 = tpu.matmul %408, %409, %cst_132 {dimension_numbers = #tpu.dot_dimension_numbers<[1], [0], [0], [1], [0, 0, 1, 1], [], []>} : vector<16x32xbf16>, vector<32x32xbf16>, vector<16x32xf32> -> vector<16x32xf32>
    %c0_133 = arith.constant 0 : index
    %c736 = arith.constant 736 : index
    %411 = vector.load %arg6[%c0_133, %c736] : memref<1x1216xf32, #tpu.memory_space<vmem>>, vector<1x32xf32>
    %412 = vector.broadcast %411 : vector<1x32xf32> to vector<16x32xf32>
    %413 = arith.addf %410, %412 : vector<16x32xf32>
    %c0_134 = arith.constant 0 : index
    %c480_135 = arith.constant 480 : index
    %414 = vector.load %arg4[%c0_134, %c480_135] : memref<32x768xbf16, #tpu.memory_space<vmem>>, vector<32x64xbf16>
    %cst_136 = arith.constant dense<0.000000e+00> : vector<32x64xf32>
    %415 = tpu.matmul %2, %414, %cst_136 {dimension_numbers = #tpu.dot_dimension_numbers<[1], [0], [0], [1], [0, 0, 1, 1], [], []>} : vector<32x32xbf16>, vector<32x64xbf16>, vector<32x64xf32> -> vector<32x64xf32>
    %c0_137 = arith.constant 0 : index
    %c768 = arith.constant 768 : index
    %416 = vector.load %arg6[%c0_137, %c768] : memref<1x1216xf32, #tpu.memory_space<vmem>>, vector<1x64xf32>
    %417 = vector.broadcast %416 : vector<1x64xf32> to vector<32x64xf32>
    %418 = arith.addf %415, %417 : vector<32x64xf32>
    %419 = vector.extract_strided_slice %418 {offsets = [0, 0], sizes = [32, 32], strides = [1, 1]} : vector<32x64xf32> to vector<32x32xf32>
    %420 = vector.extract_strided_slice %418 {offsets = [0, 32], sizes = [32, 32], strides = [1, 1]} : vector<32x64xf32> to vector<32x32xf32>
    %c0_138 = arith.constant 0 : index
    %c544_139 = arith.constant 544 : index
    %421 = vector.load %arg4[%c0_138, %c544_139] : memref<32x768xbf16, #tpu.memory_space<vmem>>, vector<32x32xbf16>
    %c0_140 = arith.constant 0 : index
    %c832 = arith.constant 832 : index
    %422 = vector.load %arg6[%c0_140, %c832] : memref<1x1216xf32, #tpu.memory_space<vmem>>, vector<1x32xf32>
    %423 = arith.truncf %413 : vector<16x32xf32> to vector<16x32xbf16>
    %424 = arith.truncf %419 : vector<32x32xf32> to vector<32x32xbf16>
    %425 = arith.truncf %420 : vector<32x32xf32> to vector<32x32xbf16>
    %426 = vector.extract_strided_slice %423 {offsets = [0, 0], sizes = [16, 8], strides = [1, 1]} : vector<16x32xbf16> to vector<16x8xbf16>
    %427 = vector.extract_strided_slice %424 {offsets = [0, 0], sizes = [32, 8], strides = [1, 1]} : vector<32x32xbf16> to vector<32x8xbf16>
    %cst_141 = arith.constant dense<0.000000e+00> : vector<16x32xf32>
    %428 = tpu.matmul %426, %427, %cst_141 {dimension_numbers = #tpu.dot_dimension_numbers<[1], [1], [0], [0], [0, 0, 1, 0], [], []>} : vector<16x8xbf16>, vector<32x8xbf16>, vector<16x32xf32> -> vector<16x32xf32>
    %cst_142 = arith.constant 0.353553385 : f32
    %429 = vector.broadcast %cst_142 : f32 to vector<16x32xf32>
    %430 = arith.mulf %428, %429 : vector<16x32xf32>
    %431 = arith.addf %430, %4 : vector<16x32xf32>
    %cst_143 = arith.constant dense<0xFF800000> : vector<16xf32>
    %432 = vector.multi_reduction <maximumf>, %431, %cst_143 [1] : vector<16x32xf32> to vector<16xf32>
    %433 = vector.shape_cast %432 : vector<16xf32> to vector<16x1xf32>
    %434 = vector.broadcast %433 : vector<16x1xf32> to vector<16x32xf32>
    %435 = arith.subf %431, %434 : vector<16x32xf32>
    %436 = math.exp %435 : vector<16x32xf32>
    %cst_144 = arith.constant dense<0.000000e+00> : vector<16xf32>
    %437 = vector.multi_reduction <add>, %436, %cst_144 [1] : vector<16x32xf32> to vector<16xf32>
    %438 = vector.shape_cast %437 : vector<16xf32> to vector<16x1xf32>
    %439 = tpu.reciprocal %438 {approx = true} : vector<16x1xf32> -> vector<16x1xf32>
    %440 = vector.broadcast %439 : vector<16x1xf32> to vector<16x32xf32>
    %441 = arith.mulf %436, %440 : vector<16x32xf32>
    %442 = arith.truncf %441 : vector<16x32xf32> to vector<16x32xbf16>
    %443 = vector.extract_strided_slice %425 {offsets = [0, 0], sizes = [32, 8], strides = [1, 1]} : vector<32x32xbf16> to vector<32x8xbf16>
    %cst_145 = arith.constant dense<0.000000e+00> : vector<16x8xf32>
    %444 = tpu.matmul %442, %443, %cst_145 {dimension_numbers = #tpu.dot_dimension_numbers<[1], [0], [0], [1], [0, 0, 1, 1], [], []>} : vector<16x32xbf16>, vector<32x8xbf16>, vector<16x8xf32> -> vector<16x8xf32>
    %445 = vector.extract_strided_slice %423 {offsets = [0, 8], sizes = [16, 8], strides = [1, 1]} : vector<16x32xbf16> to vector<16x8xbf16>
    %446 = vector.extract_strided_slice %424 {offsets = [0, 8], sizes = [32, 8], strides = [1, 1]} : vector<32x32xbf16> to vector<32x8xbf16>
    %cst_146 = arith.constant dense<0.000000e+00> : vector<16x32xf32>
    %447 = tpu.matmul %445, %446, %cst_146 {dimension_numbers = #tpu.dot_dimension_numbers<[1], [1], [0], [0], [0, 0, 1, 0], [], []>} : vector<16x8xbf16>, vector<32x8xbf16>, vector<16x32xf32> -> vector<16x32xf32>
    %cst_147 = arith.constant 0.353553385 : f32
    %448 = vector.broadcast %cst_147 : f32 to vector<16x32xf32>
    %449 = arith.mulf %447, %448 : vector<16x32xf32>
    %450 = arith.addf %449, %4 : vector<16x32xf32>
    %cst_148 = arith.constant dense<0xFF800000> : vector<16xf32>
    %451 = vector.multi_reduction <maximumf>, %450, %cst_148 [1] : vector<16x32xf32> to vector<16xf32>
    %452 = vector.shape_cast %451 : vector<16xf32> to vector<16x1xf32>
    %453 = vector.broadcast %452 : vector<16x1xf32> to vector<16x32xf32>
    %454 = arith.subf %450, %453 : vector<16x32xf32>
    %455 = math.exp %454 : vector<16x32xf32>
    %cst_149 = arith.constant dense<0.000000e+00> : vector<16xf32>
    %456 = vector.multi_reduction <add>, %455, %cst_149 [1] : vector<16x32xf32> to vector<16xf32>
    %457 = vector.shape_cast %456 : vector<16xf32> to vector<16x1xf32>
    %458 = tpu.reciprocal %457 {approx = true} : vector<16x1xf32> -> vector<16x1xf32>
    %459 = vector.broadcast %458 : vector<16x1xf32> to vector<16x32xf32>
    %460 = arith.mulf %455, %459 : vector<16x32xf32>
    %461 = arith.truncf %460 : vector<16x32xf32> to vector<16x32xbf16>
    %462 = vector.extract_strided_slice %425 {offsets = [0, 8], sizes = [32, 8], strides = [1, 1]} : vector<32x32xbf16> to vector<32x8xbf16>
    %cst_150 = arith.constant dense<0.000000e+00> : vector<16x8xf32>
    %463 = tpu.matmul %461, %462, %cst_150 {dimension_numbers = #tpu.dot_dimension_numbers<[1], [0], [0], [1], [0, 0, 1, 1], [], []>} : vector<16x32xbf16>, vector<32x8xbf16>, vector<16x8xf32> -> vector<16x8xf32>
    %464 = vector.extract_strided_slice %423 {offsets = [0, 16], sizes = [16, 8], strides = [1, 1]} : vector<16x32xbf16> to vector<16x8xbf16>
    %465 = vector.extract_strided_slice %424 {offsets = [0, 16], sizes = [32, 8], strides = [1, 1]} : vector<32x32xbf16> to vector<32x8xbf16>
    %cst_151 = arith.constant dense<0.000000e+00> : vector<16x32xf32>
    %466 = tpu.matmul %464, %465, %cst_151 {dimension_numbers = #tpu.dot_dimension_numbers<[1], [1], [0], [0], [0, 0, 1, 0], [], []>} : vector<16x8xbf16>, vector<32x8xbf16>, vector<16x32xf32> -> vector<16x32xf32>
    %cst_152 = arith.constant 0.353553385 : f32
    %467 = vector.broadcast %cst_152 : f32 to vector<16x32xf32>
    %468 = arith.mulf %466, %467 : vector<16x32xf32>
    %469 = arith.addf %468, %4 : vector<16x32xf32>
    %cst_153 = arith.constant dense<0xFF800000> : vector<16xf32>
    %470 = vector.multi_reduction <maximumf>, %469, %cst_153 [1] : vector<16x32xf32> to vector<16xf32>
    %471 = vector.shape_cast %470 : vector<16xf32> to vector<16x1xf32>
    %472 = vector.broadcast %471 : vector<16x1xf32> to vector<16x32xf32>
    %473 = arith.subf %469, %472 : vector<16x32xf32>
    %474 = math.exp %473 : vector<16x32xf32>
    %cst_154 = arith.constant dense<0.000000e+00> : vector<16xf32>
    %475 = vector.multi_reduction <add>, %474, %cst_154 [1] : vector<16x32xf32> to vector<16xf32>
    %476 = vector.shape_cast %475 : vector<16xf32> to vector<16x1xf32>
    %477 = tpu.reciprocal %476 {approx = true} : vector<16x1xf32> -> vector<16x1xf32>
    %478 = vector.broadcast %477 : vector<16x1xf32> to vector<16x32xf32>
    %479 = arith.mulf %474, %478 : vector<16x32xf32>
    %480 = arith.truncf %479 : vector<16x32xf32> to vector<16x32xbf16>
    %481 = vector.extract_strided_slice %425 {offsets = [0, 16], sizes = [32, 8], strides = [1, 1]} : vector<32x32xbf16> to vector<32x8xbf16>
    %cst_155 = arith.constant dense<0.000000e+00> : vector<16x8xf32>
    %482 = tpu.matmul %480, %481, %cst_155 {dimension_numbers = #tpu.dot_dimension_numbers<[1], [0], [0], [1], [0, 0, 1, 1], [], []>} : vector<16x32xbf16>, vector<32x8xbf16>, vector<16x8xf32> -> vector<16x8xf32>
    %483 = vector.extract_strided_slice %423 {offsets = [0, 24], sizes = [16, 8], strides = [1, 1]} : vector<16x32xbf16> to vector<16x8xbf16>
    %484 = vector.extract_strided_slice %424 {offsets = [0, 24], sizes = [32, 8], strides = [1, 1]} : vector<32x32xbf16> to vector<32x8xbf16>
    %cst_156 = arith.constant dense<0.000000e+00> : vector<16x32xf32>
    %485 = tpu.matmul %483, %484, %cst_156 {dimension_numbers = #tpu.dot_dimension_numbers<[1], [1], [0], [0], [0, 0, 1, 0], [], []>} : vector<16x8xbf16>, vector<32x8xbf16>, vector<16x32xf32> -> vector<16x32xf32>
    %cst_157 = arith.constant 0.353553385 : f32
    %486 = vector.broadcast %cst_157 : f32 to vector<16x32xf32>
    %487 = arith.mulf %485, %486 : vector<16x32xf32>
    %488 = arith.addf %487, %4 : vector<16x32xf32>
    %cst_158 = arith.constant dense<0xFF800000> : vector<16xf32>
    %489 = vector.multi_reduction <maximumf>, %488, %cst_158 [1] : vector<16x32xf32> to vector<16xf32>
    %490 = vector.shape_cast %489 : vector<16xf32> to vector<16x1xf32>
    %491 = vector.broadcast %490 : vector<16x1xf32> to vector<16x32xf32>
    %492 = arith.subf %488, %491 : vector<16x32xf32>
    %493 = math.exp %492 : vector<16x32xf32>
    %cst_159 = arith.constant dense<0.000000e+00> : vector<16xf32>
    %494 = vector.multi_reduction <add>, %493, %cst_159 [1] : vector<16x32xf32> to vector<16xf32>
    %495 = vector.shape_cast %494 : vector<16xf32> to vector<16x1xf32>
    %496 = tpu.reciprocal %495 {approx = true} : vector<16x1xf32> -> vector<16x1xf32>
    %497 = vector.broadcast %496 : vector<16x1xf32> to vector<16x32xf32>
    %498 = arith.mulf %493, %497 : vector<16x32xf32>
    %499 = arith.truncf %498 : vector<16x32xf32> to vector<16x32xbf16>
    %500 = vector.extract_strided_slice %425 {offsets = [0, 24], sizes = [32, 8], strides = [1, 1]} : vector<32x32xbf16> to vector<32x8xbf16>
    %cst_160 = arith.constant dense<0.000000e+00> : vector<16x8xf32>
    %501 = tpu.matmul %499, %500, %cst_160 {dimension_numbers = #tpu.dot_dimension_numbers<[1], [0], [0], [1], [0, 0, 1, 1], [], []>} : vector<16x32xbf16>, vector<32x8xbf16>, vector<16x8xf32> -> vector<16x8xf32>
    %502 = tpu.concatenate %444, %463, %482, %501 in 1 : vector<16x8xf32>, vector<16x8xf32>, vector<16x8xf32>, vector<16x8xf32> -> vector<16x32xf32>
    %503 = arith.truncf %502 : vector<16x32xf32> to vector<16x32xbf16>
    %cst_161 = arith.constant dense<0.000000e+00> : vector<16x32xf32>
    %504 = tpu.matmul %503, %421, %cst_161 {dimension_numbers = #tpu.dot_dimension_numbers<[1], [0], [0], [1], [0, 0, 1, 1], [], []>} : vector<16x32xbf16>, vector<32x32xbf16>, vector<16x32xf32> -> vector<16x32xf32>
    %505 = vector.broadcast %422 : vector<1x32xf32> to vector<16x32xf32>
    %506 = arith.addf %504, %505 : vector<16x32xf32>
    %507 = arith.addf %407, %506 : vector<16x32xf32>
    %c0_162 = arith.constant 0 : index
    %c864 = arith.constant 864 : index
    %508 = vector.load %arg6[%c0_162, %c864] : memref<1x1216xf32, #tpu.memory_space<vmem>>, vector<1x32xf32>
    %c0_163 = arith.constant 0 : index
    %c896 = arith.constant 896 : index
    %509 = vector.load %arg6[%c0_163, %c896] : memref<1x1216xf32, #tpu.memory_space<vmem>>, vector<1x32xf32>
    %cst_164 = arith.constant dense<0.000000e+00> : vector<16xf32>
    %510 = vector.multi_reduction <add>, %507, %cst_164 [1] : vector<16x32xf32> to vector<16xf32>
    %511 = vector.shape_cast %510 : vector<16xf32> to vector<16x1xf32>
    %cst_165 = arith.constant 3.200000e+01 : f32
    %512 = vector.broadcast %cst_165 : f32 to vector<16x1xf32>
    %513 = arith.divf %511, %512 : vector<16x1xf32>
    %514 = vector.broadcast %513 : vector<16x1xf32> to vector<16x32xf32>
    %515 = arith.subf %507, %514 : vector<16x32xf32>
    %516 = arith.mulf %515, %515 : vector<16x32xf32>
    %cst_166 = arith.constant dense<0.000000e+00> : vector<16xf32>
    %517 = vector.multi_reduction <add>, %516, %cst_166 [1] : vector<16x32xf32> to vector<16xf32>
    %518 = vector.shape_cast %517 : vector<16xf32> to vector<16x1xf32>
    %cst_167 = arith.constant 3.200000e+01 : f32
    %519 = vector.broadcast %cst_167 : f32 to vector<16x1xf32>
    %520 = arith.divf %518, %519 : vector<16x1xf32>
    %521 = vector.broadcast %513 : vector<16x1xf32> to vector<16x32xf32>
    %522 = arith.subf %507, %521 : vector<16x32xf32>
    %cst_168 = arith.constant 9.99999974E-6 : f32
    %523 = vector.broadcast %cst_168 : f32 to vector<16x1xf32>
    %524 = arith.addf %520, %523 : vector<16x1xf32>
    %525 = math.rsqrt %524 : vector<16x1xf32>
    %526 = vector.broadcast %525 : vector<16x1xf32> to vector<16x32xf32>
    %527 = arith.mulf %522, %526 : vector<16x32xf32>
    %528 = vector.broadcast %508 : vector<1x32xf32> to vector<16x32xf32>
    %529 = arith.mulf %527, %528 : vector<16x32xf32>
    %530 = vector.broadcast %509 : vector<1x32xf32> to vector<16x32xf32>
    %531 = arith.addf %529, %530 : vector<16x32xf32>
    %532 = arith.truncf %531 : vector<16x32xf32> to vector<16x32xbf16>
    %c0_169 = arith.constant 0 : index
    %c576 = arith.constant 576 : index
    %533 = vector.load %arg4[%c0_169, %c576] : memref<32x768xbf16, #tpu.memory_space<vmem>>, vector<32x64xbf16>
    %cst_170 = arith.constant dense<0.000000e+00> : vector<16x64xf32>
    %534 = tpu.matmul %532, %533, %cst_170 {dimension_numbers = #tpu.dot_dimension_numbers<[1], [0], [0], [1], [0, 0, 1, 1], [], []>} : vector<16x32xbf16>, vector<32x64xbf16>, vector<16x64xf32> -> vector<16x64xf32>
    %c0_171 = arith.constant 0 : index
    %c928 = arith.constant 928 : index
    %535 = vector.load %arg6[%c0_171, %c928] : memref<1x1216xf32, #tpu.memory_space<vmem>>, vector<1x64xf32>
    %536 = vector.broadcast %535 : vector<1x64xf32> to vector<16x64xf32>
    %537 = arith.addf %534, %536 : vector<16x64xf32>
    %cst_172 = arith.constant 0.000000e+00 : f32
    %538 = vector.broadcast %cst_172 : f32 to vector<16x64xf32>
    %539 = arith.maximumf %537, %538 : vector<16x64xf32>
    %540 = arith.truncf %539 : vector<16x64xf32> to vector<16x64xbf16>
    %c0_173 = arith.constant 0 : index
    %c32 = arith.constant 32 : index
    %541 = vector.load %arg5[%c0_173, %c32] : memref<64x64xbf16, #tpu.memory_space<vmem>>, vector<64x32xbf16>
    %cst_174 = arith.constant dense<0.000000e+00> : vector<16x32xf32>
    %542 = tpu.matmul %540, %541, %cst_174 {dimension_numbers = #tpu.dot_dimension_numbers<[1], [0], [0], [1], [0, 0, 1, 1], [], []>} : vector<16x64xbf16>, vector<64x32xbf16>, vector<16x32xf32> -> vector<16x32xf32>
    %c0_175 = arith.constant 0 : index
    %c992 = arith.constant 992 : index
    %543 = vector.load %arg6[%c0_175, %c992] : memref<1x1216xf32, #tpu.memory_space<vmem>>, vector<1x32xf32>
    %544 = vector.broadcast %543 : vector<1x32xf32> to vector<16x32xf32>
    %545 = arith.addf %542, %544 : vector<16x32xf32>
    %546 = arith.addf %531, %545 : vector<16x32xf32>
    %c0_176 = arith.constant 0 : index
    %c1024 = arith.constant 1024 : index
    %547 = vector.load %arg6[%c0_176, %c1024] : memref<1x1216xf32, #tpu.memory_space<vmem>>, vector<1x32xf32>
    %c0_177 = arith.constant 0 : index
    %c1056 = arith.constant 1056 : index
    %548 = vector.load %arg6[%c0_177, %c1056] : memref<1x1216xf32, #tpu.memory_space<vmem>>, vector<1x32xf32>
    %cst_178 = arith.constant dense<0.000000e+00> : vector<16xf32>
    %549 = vector.multi_reduction <add>, %546, %cst_178 [1] : vector<16x32xf32> to vector<16xf32>
    %550 = vector.shape_cast %549 : vector<16xf32> to vector<16x1xf32>
    %cst_179 = arith.constant 3.200000e+01 : f32
    %551 = vector.broadcast %cst_179 : f32 to vector<16x1xf32>
    %552 = arith.divf %550, %551 : vector<16x1xf32>
    %553 = vector.broadcast %552 : vector<16x1xf32> to vector<16x32xf32>
    %554 = arith.subf %546, %553 : vector<16x32xf32>
    %555 = arith.mulf %554, %554 : vector<16x32xf32>
    %cst_180 = arith.constant dense<0.000000e+00> : vector<16xf32>
    %556 = vector.multi_reduction <add>, %555, %cst_180 [1] : vector<16x32xf32> to vector<16xf32>
    %557 = vector.shape_cast %556 : vector<16xf32> to vector<16x1xf32>
    %cst_181 = arith.constant 3.200000e+01 : f32
    %558 = vector.broadcast %cst_181 : f32 to vector<16x1xf32>
    %559 = arith.divf %557, %558 : vector<16x1xf32>
    %560 = vector.broadcast %552 : vector<16x1xf32> to vector<16x32xf32>
    %561 = arith.subf %546, %560 : vector<16x32xf32>
    %cst_182 = arith.constant 9.99999974E-6 : f32
    %562 = vector.broadcast %cst_182 : f32 to vector<16x1xf32>
    %563 = arith.addf %559, %562 : vector<16x1xf32>
    %564 = math.rsqrt %563 : vector<16x1xf32>
    %565 = vector.broadcast %564 : vector<16x1xf32> to vector<16x32xf32>
    %566 = arith.mulf %561, %565 : vector<16x32xf32>
    %567 = vector.broadcast %547 : vector<1x32xf32> to vector<16x32xf32>
    %568 = arith.mulf %566, %567 : vector<16x32xf32>
    %569 = vector.broadcast %548 : vector<1x32xf32> to vector<16x32xf32>
    %570 = arith.addf %568, %569 : vector<16x32xf32>
    %571 = arith.truncf %570 : vector<16x32xf32> to vector<16x32xbf16>
    %c0_183 = arith.constant 0 : index
    %c640_184 = arith.constant 640 : index
    %572 = vector.load %arg4[%c0_183, %c640_184] : memref<32x768xbf16, #tpu.memory_space<vmem>>, vector<32x128xbf16>
    %cst_185 = arith.constant dense<0.000000e+00> : vector<16x128xf32>
    %573 = tpu.matmul %571, %572, %cst_185 {dimension_numbers = #tpu.dot_dimension_numbers<[1], [0], [0], [1], [0, 0, 1, 1], [], []>} : vector<16x32xbf16>, vector<32x128xbf16>, vector<16x128xf32> -> vector<16x128xf32>
    %c0_186 = arith.constant 0 : index
    %c1088 = arith.constant 1088 : index
    %574 = vector.load %arg6[%c0_186, %c1088] : memref<1x1216xf32, #tpu.memory_space<vmem>>, vector<1x128xf32>
    %575 = vector.broadcast %574 : vector<1x128xf32> to vector<16x128xf32>
    %576 = arith.addf %573, %575 : vector<16x128xf32>
    %cst_187 = arith.constant dense<0xFF800000> : vector<16xf32>
    %577 = vector.multi_reduction <maximumf>, %576, %cst_187 [1] : vector<16x128xf32> to vector<16xf32>
    %578 = vector.shape_cast %577 : vector<16xf32> to vector<16x1xf32>
    %579 = vector.broadcast %578 : vector<16x1xf32> to vector<16x128xf32>
    %580 = arith.subf %576, %579 : vector<16x128xf32>
    %581 = math.exp %580 : vector<16x128xf32>
    %cst_188 = arith.constant dense<0.000000e+00> : vector<16xf32>
    %582 = vector.multi_reduction <add>, %581, %cst_188 [1] : vector<16x128xf32> to vector<16xf32>
    %583 = vector.shape_cast %582 : vector<16xf32> to vector<16x1xf32>
    %584 = math.log %583 : vector<16x1xf32>
    %585 = vector.broadcast %584 : vector<16x1xf32> to vector<16x128xf32>
    %586 = arith.subf %580, %585 : vector<16x128xf32>
    %c0_189 = arith.constant 0 : index
    %c0_190 = arith.constant 0 : index
    %587 = vector.load %arg7[%c0_189, %c0_190] : memref<16x128xf32, #tpu.memory_space<vmem>>, vector<16x128xf32>
    tpu.vector_store %arg7[%c0_189, %c0_190], %586 {strides = array<i32>} : memref<16x128xf32, #tpu.memory_space<vmem>>, vector<16x128xf32>,
    %588 = tpu.concatenate %441, %460, %479, %498 in 0 : vector<16x32xf32>, vector<16x32xf32>, vector<16x32xf32>, vector<16x32xf32> -> vector<64x32xf32>
    %cst_191 = arith.constant 0.000000e+00 : f32
    %589 = vector.broadcast %cst_191 : f32 to vector<64x96xf32>
    %590 = tpu.concatenate %588, %589 in 1 : vector<64x32xf32>, vector<64x96xf32> -> vector<64x128xf32>
    %c0_192 = arith.constant 0 : index
    %c0_193 = arith.constant 0 : index
    %591 = vector.load %arg8[%c0_192, %c0_193] : memref<64x128xf32, #tpu.memory_space<vmem>>, vector<64x128xf32>
    tpu.vector_store %arg8[%c0_192, %c0_193], %590 {strides = array<i32>} : memref<64x128xf32, #tpu.memory_space<vmem>>, vector<64x128xf32>,
    return
  }
}

</mosaic_0001>

<bundles_post_ra>
// kernel: decoder_forward.1
= control target key start
LH: loop header
LB: loop body
LE: loop exit
PB: predicated region body
PF: predicated region fallthrough
CT: control target
= control target key end

     0   :  { %v4389_v0 = vmov 0.0   ;;  %vm4390_vm0 = vmmov 0   ;;  %vm65_vm1 = vcmask 261120   ;;  %s4392_s15 = smov 96   ;;  %s4393_s16 = smov 80   ;;  %vm114_vm2 = vcmask 64512   ;;  %s5359_s4 = inlined_call_operand.vmem [shape: bf16[32,768], index: 4, kind: input, shape index: {}]   ;;  %s5360_s0 = inlined_call_operand.vmem [shape: f32[16,32], index: 0, kind: input, shape index: {}]   ;;  %s5361_s6 = inlined_call_operand.vmem [shape: f32[1,1216], index: 6, kind: input, shape index: {}]   ;;  %s5362_s2 = inlined_call_operand.vmem [shape: f32[16,16], index: 2, kind: input, shape index: {}]   ;;  %s5363_s1 = inlined_call_operand.vmem [shape: f32[32,32], index: 1, kind: input, shape index: {}]   ;;  %s5364_s3 = inlined_call_operand.vmem [shape: f32[16,32], index: 3, kind: input, shape index: {}]   ;;  %s5365_s5 = inlined_call_operand.vmem [shape: bf16[64,64], index: 5, kind: input, shape index: {}]   ;;  %s5366_s8 = inlined_call_operand.vmem [shape: f32[64,128], index: 8, kind: output, shape index: {1}]   ;;  %s5367_s7 = inlined_call_operand.vmem [shape: f32[16,128], index: 7, kind: output, shape index: {0}]  }
   0x1   :  { %3764 = vmatprep.subr.bf16.mxu0 %v4389_v0  ;;  %v4455_v1 = vld [vmem:[%s5359_s4 + $0x30] ss:$24 sps:$4 sm:$0xff]   ;;  %3768 = vmatprep.mubr.msk.bf16.mxu0 %vm4390_vm0, %v4389_v0  ;;  %v4466_v2 = vld [vmem:[%s5359_s4] ss:$24 sps:$4 sm:$0xff]   ;;  %s4394_s17 = smov 88   ;;  %s4395_s18 = smov 72  }
   0x2   :  { %3772 = vmatprep.subr.bf16.mxu1 %v4389_v0  ;;  %3774 = vmatprep.mubr.msk.bf16.mxu1 %vm4390_vm0, %v4389_v0  ;;  %v4471_v3 = vld [vmem:[%s5360_s0] sm:$0xff]  ;;  %v4476_v4 = vld [vmem:[%s5360_s0 + $0x8] sm:$0xff]  ;;  %s4391_s0 = smov 120   ;;  %s4396_s19 = smov 112   ;;  %vm166_vm3 = vcmask 130048   ;;  %vm640_vm4 = vcmask 195584  }
   0x3   :  { %3765 = vmatpush3.bf16.msra.mxu0 %v4455_v1  ;;  %v41_v5 = vpack.c.bf16 %v4476_v4, %v4471_v3  ;;  %v4489_v7 = vld [vmem:[%s5361_s6] ss:$0 sm:$0xff]  ;;  %s4397_s20 = smov 104   ;;  %v38_v31 = vld [vmem:[%s5362_s2 + $0x8] sm:$0xff]  ;;  %s4398_s25 = smov 56   ;;  %vm1647_vm5 = vcmask 523264  }
   0x4   :  { %3766 = vmatprep.subr.bf16.mxu0 %v4389_v0  ;;  %v37_v26 = vld [vmem:[%s5362_s2] sm:$0xff]  ;;  %s4399_s26 = smov 64   ;;  %s4400_s27 = smov 48  }
   0x5   :  { %s4401_s28 = smov 40   ;;  %s4402_s29 = smov 32  }
   0x6   :  { %s4403_s30 = smov 8   ;;  %s4404_s9 = smov 16  }
   0x7   :  { %3767 = vmatpush3.bf16.msra.mxu0 %v4466_v2  ;;  %s4405_s10 = smov 24  }
   0x8   :  { %3778 = vmatprep.subr.bf16.mxu0 %v4389_v0 }
   0xa   :  { %3769 = vmatmul.mubr.msk.bf16.vlgmr.msra.gmra.mxu0 %vm65_vm1, %v41_v5 }
   0xb   :  { %3780 = vmatprep.mubr.msk.bf16.mxu0 %vm4390_vm0, %v4389_v0 }
  0xca   :  { %v103_v6 = vpop.f32.mrf.mxu0 }
  0xcb   :  { %v104_v10 = vadd.f32 %v4489_v7, %v103_v6 }
  0xcc   :  { %v3770_v8 = vpop.f32.mrf.mxu0 }
  0xce   :  { %v106_v9 = vpop.f32.mrf.mxu0 }
  0xcf   :  { %v107_v11 = vadd.f32 %v4489_v7, %v106_v9 }
  0xd0   :  { %v3771_v12 = vpop.f32.mrf.mxu0 }
  0xd1   :  { %v4493_v13 = vpack.c.bf16 %v107_v11, %v104_v10 }
  0xd3   :  { %237 = vrot.lane.b32.xlu1 %v4493_v13, %s4391_s0  ;;  %112 = vrot.lane.b32.xlu0 %v4493_v13, %s4392_s15 }
  0xd7   :  { %364 = vrot.lane.b32.xlu1 %v4493_v13, %s4393_s16  ;;  %239 = vrot.lane.b32.xlu0 %v4493_v13, %s4394_s17 }
  0xdb   :  { %489 = vrot.lane.b32.xlu1 %v4493_v13, %s4395_s18  ;;  %362 = vrot.lane.b32.xlu0 %v4493_v13, %s4396_s19 }
  0xdf   :  { %487 = vrot.lane.b32.xlu0 %v4493_v13, %s4397_s20 }
 0x145   :  { %v113_v14 = vpop.permute.xlu0 %112  ;;  %v238_v17 = vpop.permute.xlu1 %237 }
 0x146   :  { %v119_v15 = vsel %vm114_vm2, %v113_v14, 0 }
 0x147   :  { %3773 = vmatpush3.bf16.xpose.msra.mxu1 %v119_v15 }
 0x148   :  { %3784 = vmatprep.subr.bf16.mxu1 %v4389_v0 }
 0x149   :  { %v240_v16 = vpop.permute.xlu0 %239  ;;  %v365_v19 = vpop.permute.xlu1 %364 }
 0x14a   :  { %v245_v18 = vsel %vm114_vm2, %v240_v16, 0  ;;  %v370_v20 = vsel %vm114_vm2, %v365_v19, 0 }
 0x14d   :  { %v490_v21 = vpop.permute.xlu1 %489  ;;  %v363_v22 = vpop.permute.xlu0 %362 }
 0x14e   :  { %3775 = vmatmul.mubr.msk.bf16.vlgmr.msra.gmra.mxu1 %vm114_vm2, %v4493_v13  ;;  %v495_v23 = vsel %vm114_vm2, %v490_v21, 0 }
 0x14f   :  { %3785 = vmatpush3.bf16.xpose.msra.mxu1 %v245_v18  ;;  %3786 = vmatprep.mubr.msk.bf16.mxu1 %vm4390_vm0, %v4389_v0 }
 0x150   :  { %3796 = vmatprep.subr.bf16.mxu1 %v4389_v0 }
 0x151   :  { %v488_v24 = vpop.permute.xlu0 %487 }
 0x156   :  { %3787 = vmatmul.mubr.msk.bf16.vlgmr.msra.gmra.mxu1 %vm114_vm2, %v238_v17 }
 0x157   :  { %3797 = vmatpush3.bf16.xpose.msra.mxu1 %v370_v20  ;;  %3798 = vmatprep.mubr.msk.bf16.mxu1 %vm4390_vm0, %v4389_v0 }
 0x158   :  { %3808 = vmatprep.subr.bf16.mxu1 %v4389_v0 }
 0x15e   :  { %3799 = vmatmul.mubr.msk.bf16.vlgmr.msra.gmra.mxu1 %vm114_vm2, %v363_v22 }
 0x15f   :  { %3809 = vmatpush3.bf16.xpose.msra.mxu1 %v495_v23  ;;  %3810 = vmatprep.mubr.msk.bf16.mxu1 %vm4390_vm0, %v4389_v0 }
 0x160   :  { %3820 = vmatprep.subr.bf16.mxu1 %v4389_v0 }
 0x166   :  { %3811 = vmatmul.mubr.msk.bf16.vlgmr.msra.gmra.mxu1 %vm114_vm2, %v488_v24 }
 0x167   :  { %3824 = vmatprep.mubr.msk.bf16.mxu1 %vm4390_vm0, %v4389_v0 }
 0x20e   :  { %v155_v25 = vpop.f32.mrf.mxu1 }
 0x20f   :  { %v162_v27 = vmul.f32 0.35355338, %v155_v25 }
 0x210   :  { %v3776_v28 = vpop.f32.mrf.mxu1 }
 0x211   :  { %v164_v29 = vadd.f32 %v162_v27, %v37_v26 }
 0x212   :  { %v158_v30 = vpop.f32.mrf.mxu1 }
 0x213   :  { %v163_v32 = vmul.f32 0.35355338, %v158_v30  ;;  %v167_v33 = vsel %vm166_vm3, %v164_v29, -inf }
 0x214   :  { %168 = vmax.xlane.f32.xlu1 %v167_v33  ;;  %v3777_v34 = vpop.f32.mrf.mxu1 }
 0x215   :  { %v165_v35 = vadd.f32 %v163_v32, %v38_v31 }
 0x216   :  { %v281_v36 = vpop.f32.mrf.mxu1 }
 0x217   :  { %v288_v37 = vmul.f32 0.35355338, %v281_v36  ;;  %v170_v38 = vsel %vm166_vm3, %v165_v35, -inf }
 0x218   :  { %171 = vmax.xlane.f32.xlu0 %v170_v38  ;;  %v3788_v39 = vpop.f32.mrf.mxu1 }
 0x219   :  { %v290_v40 = vadd.f32 %v288_v37, %v37_v26 }
 0x21a   :  { %v284_v41 = vpop.f32.mrf.mxu1 }
 0x21b   :  { %v289_v42 = vmul.f32 0.35355338, %v284_v41  ;;  %v292_v43 = vsel %vm166_vm3, %v290_v40, -inf }
 0x21c   :  { %293 = vmax.xlane.f32.xlu0 %v292_v43  ;;  %v3789_v44 = vpop.f32.mrf.mxu1 }
 0x21d   :  { %v291_v45 = vadd.f32 %v289_v42, %v38_v31 }
 0x21e   :  { %v406_v46 = vpop.f32.mrf.mxu1 }
 0x21f   :  { %v413_v47 = vmul.f32 0.35355338, %v406_v46  ;;  %v295_v48 = vsel %vm166_vm3, %v291_v45, -inf }
 0x220   :  { %296 = vmax.xlane.f32.xlu1 %v295_v48  ;;  %v3800_v49 = vpop.f32.mrf.mxu1 }
 0x221   :  { %v415_v50 = vadd.f32 %v413_v47, %v37_v26 }
 0x222   :  { %v409_v51 = vpop.f32.mrf.mxu1 }
 0x223   :  { %v414_v52 = vmul.f32 0.35355338, %v409_v51  ;;  %v417_v53 = vsel %vm166_vm3, %v415_v50, -inf }
 0x224   :  { %418 = vmax.xlane.f32.xlu0 %v417_v53  ;;  %v3801_v54 = vpop.f32.mrf.mxu1 }
 0x225   :  { %v416_v55 = vadd.f32 %v414_v52, %v38_v31 }
 0x226   :  { %v531_v56 = vpop.f32.mrf.mxu1 }
 0x227   :  { %v538_v57 = vmul.f32 0.35355338, %v531_v56  ;;  %v420_v58 = vsel %vm166_vm3, %v416_v55, -inf }
 0x228   :  { %421 = vmax.xlane.f32.xlu1 %v420_v58  ;;  %v3812_v59 = vpop.f32.mrf.mxu1 }
 0x229   :  { %v540_v60 = vadd.f32 %v538_v57, %v37_v26 }
 0x22a   :  { %v534_v61 = vpop.f32.mrf.mxu1 }
 0x22b   :  { %v539_v62 = vmul.f32 0.35355338, %v534_v61  ;;  %v542_v63 = vsel %vm166_vm3, %v540_v60, -inf }
 0x22c   :  { %543 = vmax.xlane.f32.xlu0 %v542_v63  ;;  %v3813_v5 = vpop.f32.mrf.mxu1 }
 0x22d   :  { %v541_v6 = vadd.f32 %v539_v62, %v38_v31 }
 0x22f   :  { %v545_v8 = vsel %vm166_vm3, %v541_v6, -inf }
 0x230   :  { %546 = vmax.xlane.f32.xlu1 %v545_v8 }
 0x29d   :  { %v169_v9 = vpop.xlane.xlu1 %168 }
 0x29e   :  { %v173_v10 = vsub.f32 %v164_v29, %v169_v9 }
 0x2a0   :  { %v175_v11 = vmul.f32 1.442695, %v173_v10 }
 0x2a1   :  { %v172_v12 = vpop.xlane.xlu0 %171 }
 0x2a2   :  { %4221 = vpow2.f32 %v175_v11  ;;  %v174_v14 = vsub.f32 %v165_v35, %v172_v12 }
 0x2a4   :  { %v177_v15 = vmul.f32 1.442695, %v174_v14 }
 0x2a5   :  { %v294_v16 = vpop.xlane.xlu0 %293 }
 0x2a6   :  { %4223 = vpow2.f32 %v177_v15  ;;  %v298_v17 = vsub.f32 %v290_v40, %v294_v16 }
 0x2a8   :  { %v300_v18 = vmul.f32 1.442695, %v298_v17 }
 0x2a9   :  { %v297_v25 = vpop.xlane.xlu1 %296 }
 0x2aa   :  { %4225 = vpow2.f32 %v300_v18  ;;  %v299_v26 = vsub.f32 %v291_v45, %v297_v25 }
 0x2ac   :  { %v302_v30 = vmul.f32 1.442695, %v299_v26 }
 0x2ad   :  { %v419_v27 = vpop.xlane.xlu0 %418 }
 0x2ae   :  { %v423_v29 = vsub.f32 %v415_v50, %v419_v27  ;;  %4227 = vpow2.f32 %v302_v30 }
 0x2af   :  { %v4222_v19 = vpop.eup %4221 }
 0x2b0   :  { %v179_v20 = vsel %vm166_vm3, %v4222_v19, 0.0  ;;  %v425_v34 = vmul.f32 1.442695, %v423_v29 }
 0x2b1   :  { %180 = vadd.xlane.f32.xlu0 %v179_v20  ;;  %v422_v28 = vpop.xlane.xlu1 %421 }
 0x2b2   :  { %v424_v31 = vsub.f32 %v416_v55, %v422_v28  ;;  %4229 = vpow2.f32 %v425_v34 }
 0x2b3   :  { %v4224_v21 = vpop.eup %4223 }
 0x2b4   :  { %v182_v22 = vsel %vm166_vm3, %v4224_v21, 0.0  ;;  %v427_v36 = vmul.f32 1.442695, %v424_v31 }
 0x2b5   :  { %183 = vadd.xlane.f32.xlu1 %v182_v22  ;;  %v544_v32 = vpop.xlane.xlu0 %543 }
 0x2b6   :  { %v548_v35 = vsub.f32 %v540_v60, %v544_v32  ;;  %4231 = vpow2.f32 %v427_v36 }
 0x2b7   :  { %v4546_v23 = vpop.eup %4225 }
 0x2b8   :  { %v304_v24 = vsel %vm166_vm3, %v4546_v23, 0.0  ;;  %v550_v38 = vmul.f32 1.442695, %v548_v35 }
 0x2b9   :  { %305 = vadd.xlane.f32.xlu0 %v304_v24  ;;  %v547_v33 = vpop.xlane.xlu1 %546 }
 0x2ba   :  { %v549_v37 = vsub.f32 %v541_v6, %v547_v33  ;;  %4233 = vpow2.f32 %v550_v38 }
 0x2bb   :  { %v4228_v40 = vpop.eup %4227 }
 0x2bc   :  { %v552_v39 = vmul.f32 1.442695, %v549_v37  ;;  %v307_v42 = vsel %vm166_vm3, %v4228_v40, 0.0 }
 0x2be   :  { %4235 = vpow2.f32 %v552_v39 }
 0x2bf   :  { %v4230_v41 = vpop.eup %4229 }
 0x2c0   :  { %v429_v46 = vsel %vm166_vm3, %v4230_v41, 0.0 }
 0x2c3   :  { %v4232_v43 = vpop.eup %4231 }
 0x2c4   :  { %v432_v45 = vsel %vm166_vm3, %v4232_v43, 0.0 }
 0x2c6   :  { %315 = vrot.lane.b32.xlu1 %v4493_v13, %s4398_s25 }
 0x2c7   :  { %v4555_v44 = vpop.eup %4233 }
 0x2c8   :  { %v554_v49 = vsel %vm166_vm3, %v4555_v44, 0.0 }
 0x2cb   :  { %v4236_v47 = vpop.eup %4235 }
 0x2cc   :  { %v557_v48 = vsel %vm166_vm3, %v4236_v47, 0.0 }
 0x2cf   :  { %190 = vrot.lane.b32.xlu0 %v4493_v13, %s4399_s26 }
 0x2ea   :  { %308 = vadd.xlane.f32.xlu1 %v307_v42 }
 0x2ee   :  { %433 = vadd.xlane.f32.xlu1 %v432_v45  ;;  %430 = vadd.xlane.f32.xlu0 %v429_v46 }
 0x2f2   :  { %558 = vadd.xlane.f32.xlu1 %v557_v48  ;;  %555 = vadd.xlane.f32.xlu0 %v554_v49 }
 0x303   :  { %440 = vrot.lane.b32.xlu1 %v4493_v13, %s4400_s27 }
 0x307   :  { %646 = vrot.lane.b32.xlu1 %v4455_v1, %s4402_s29 }
 0x308   :  { %565 = vrot.lane.b32.xlu0 %v4493_v13, %s4401_s28 }
 0x33a   :  { %v181_v50 = vpop.xlane.xlu0 %180 }
 0x33b   :  { %4237 = vrcp.f32 %v181_v50 }
 0x33e   :  { %v184_v51 = vpop.xlane.xlu1 %183 }
 0x33f   :  { %4239 = vrcp.f32 %v184_v51 }
 0x342   :  { %v306_v52 = vpop.xlane.xlu0 %305  ;;  %v316_v59 = vpop.permute.xlu1 %315 }
 0x343   :  { %4241 = vrcp.f32 %v306_v52 }
 0x346   :  { %v191_v53 = vpop.permute.xlu0 %190 }
 0x347   :  { %3779 = vmatpush3.bf16.msra.mxu0 %v191_v53 }
 0x348   :  { %3790 = vmatprep.subr.bf16.mxu0 %v4389_v0  ;;  %v4238_v54 = vpop.eup %4237 }
 0x349   :  { %v187_v56 = vmul.f32 %v4238_v54, %v4222_v19 }
 0x34c   :  { %v4240_v55 = vpop.eup %4239 }
 0x34d   :  { %v188_v57 = vmul.f32 %v4240_v55, %v4224_v21 }
 0x34f   :  { %v189_v58 = vpack.c.bf16 %v188_v57, %v187_v56 }
 0x350   :  { %v4242_v5 = vpop.eup %4241 }
 0x351   :  { %3781 = vmatmul.mubr.msk.bf16.vlgmr.msra.gmra.mxu0 %vm166_vm3, %v189_v58  ;;  %v312_v8 = vmul.f32 %v4242_v5, %v4546_v23 }
 0x352   :  { %3791 = vmatpush3.bf16.msra.mxu0 %v316_v59  ;;  %3792 = vmatprep.mubr.msk.bf16.mxu0 %vm4390_vm0, %v4389_v0 }
 0x353   :  { %3802 = vmatprep.subr.bf16.mxu0 %v4389_v0 }
 0x373   :  { %v309_v13 = vpop.xlane.xlu1 %308 }
 0x374   :  { %4243 = vrcp.f32 %v309_v13 }
 0x377   :  { %v434_v60 = vpop.xlane.xlu1 %433  ;;  %v431_v61 = vpop.xlane.xlu0 %430 }
 0x378   :  { %4245 = vrcp.f32 %v434_v60 }
 0x379   :  { %4247 = vrcp.f32 %v431_v61 }
 0x37b   :  { %v559_v62 = vpop.xlane.xlu1 %558  ;;  %v556_v63 = vpop.xlane.xlu0 %555 }
 0x37c   :  { %4249 = vrcp.f32 %v559_v62 }
 0x37d   :  { %4251 = vrcp.f32 %v556_v63 }
 0x37f   :  { %v441_v14 = vpop.permute.xlu1 %440  ;;  %v566_v20 = vpop.permute.xlu0 %565 }
 0x381   :  { %v4244_v6 = vpop.eup %4243 }
 0x382   :  { %v313_v9 = vmul.f32 %v4244_v6, %v4228_v40 }
 0x383   :  { %v647_v28 = vpop.permute.xlu1 %646 }
 0x384   :  { %v314_v10 = vpack.c.bf16 %v313_v9, %v312_v8  ;;  %3821 = vmatpush3.bf16.msra.mxu1 %v647_v28 }
 0x385   :  { %v4246_v11 = vpop.eup %4245  ;;  %3822 = vmatprep.subr.bf16.mxu1 %v4389_v0 }
 0x386   :  { %v4248_v12 = vpop.eup %4247  ;;  %3793 = vmatmul.mubr.msk.bf16.vlgmr.msra.gmra.mxu0 %vm166_vm3, %v314_v10  ;;  %v438_v16 = vmul.f32 %v4246_v11, %v4232_v43  ;;  %v4608_v10 = vld [vmem:[%s5359_s4 + $0x4] ss:$24 sps:$4 sm:$0xff]  }
 0x387   :  { %3803 = vmatpush3.bf16.msra.mxu0 %v441_v14  ;;  %3804 = vmatprep.mubr.msk.bf16.mxu0 %vm4390_vm0, %v4389_v0  ;;  %v437_v15 = vmul.f32 %v4248_v12, %v4230_v41 }
 0x388   :  { %3814 = vmatprep.subr.bf16.mxu0 %v4389_v0 }
 0x389   :  { %v4250_v17 = vpop.eup %4249  ;;  %v439_v18 = vpack.c.bf16 %v438_v16, %v437_v15 }
 0x38a   :  { %v4252_v19 = vpop.eup %4251  ;;  %v563_v22 = vmul.f32 %v4250_v17, %v4236_v47 }
 0x38b   :  { %v562_v21 = vmul.f32 %v4252_v19, %v4555_v44 }
 0x38d   :  { %v564_v23 = vpack.c.bf16 %v563_v22, %v562_v21  ;;  %v3564_v21 = vld [vmem:[%s5361_s6 + $0x1] ss:$0 sm:$0xff] }
 0x38e   :  { %3805 = vmatmul.mubr.msk.bf16.vlgmr.msra.gmra.mxu0 %vm166_vm3, %v439_v18  ;;  %v31_v22 = vld [vmem:[%s5363_s1] sm:$0xff] }
 0x38f   :  { %3815 = vmatpush3.bf16.msra.mxu0 %v566_v20  ;;  %3816 = vmatprep.mubr.msk.bf16.mxu0 %vm4390_vm0, %v4389_v0 }
 0x390   :  { %3828 = vmatprep.subr.bf16.mxu0 %v4389_v0 }
 0x396   :  { %3817 = vmatmul.mubr.msk.bf16.vlgmr.msra.gmra.mxu0 %vm166_vm3, %v564_v23  ;;  %v32_v23 = vld [vmem:[%s5363_s1 + $0x8] sm:$0xff] }
 0x397   :  { %3832 = vmatprep.mubr.msk.bf16.mxu0 %vm4390_vm0, %v4389_v0 }
 0x411   :  { %v230_v24 = vpop.f32.mrf.mxu0 }
 0x413   :  { %v3782_v25 = vpop.f32.mrf.mxu0 }
 0x414   :  { %v806_v25 = vlaneseq }
 0x415   :  { %v233_v26 = vpop.f32.mrf.mxu0 }
 0x417   :  { %v3783_v27 = vpop.f32.mrf.mxu0 }
 0x418   :  { %v804_v27 = vld [vmem:[%s5361_s6 + $0x1] sm:$0x3] }
 0x446   :  { %v355_v29 = vpop.f32.mrf.mxu0 }
 0x448   :  { %v3794_v30 = vpop.f32.mrf.mxu0 }
 0x44a   :  { %v358_v31 = vpop.f32.mrf.mxu0 }
 0x44b   :  { %v4133_v32 = vpack.i.bf16 %v358_v31, %v355_v29 }
 0x44c   :  { %v3795_v33 = vpop.f32.mrf.mxu0 }
 0x44d   :  { %4134 = vrot.lane.b32.xlu0 %v4133_v32, %s4403_s30 }
 0x44e   :  { %v480_v34 = vpop.f32.mrf.mxu0 }
 0x450   :  { %v3806_v35 = vpop.f32.mrf.mxu0 }
 0x452   :  { %v483_v36 = vpop.f32.mrf.mxu0 }
 0x453   :  { %v4138_v1 = vpack.i.bf16 %v483_v36, %v480_v34 }
 0x454   :  { %v3807_v37 = vpop.f32.mrf.mxu0 }
 0x455   :  { %4139 = vrot.lane.b32.xlu1 %v4138_v1, %s4404_s9 }
 0x456   :  { %v605_v38 = vpop.f32.mrf.mxu0 }
 0x458   :  { %v3818_v39 = vpop.f32.mrf.mxu0 }
 0x459   :  { %644 = vrot.lane.b32.xlu1 %v4466_v2, %s4402_s29  ;;  %v34_v39 = vld [vmem:[%s5363_s1 + $0x18] sm:$0xff] }
 0x45a   :  { %v608_v40 = vpop.f32.mrf.mxu0 }
 0x45b   :  { %v4143_v41 = vpack.i.bf16 %v608_v40, %v605_v38  ;;  %v33_v38 = vld [vmem:[%s5363_s1 + $0x10] sm:$0xff] }
 0x45c   :  { %v3819_v42 = vpop.f32.mrf.mxu0 }
 0x45d   :  { %4144 = vrot.lane.b32.xlu0 %v4143_v41, %s4405_s10  ;;  %v4659_v41 = vpack.c.bf16 %v34_v39, %v33_v38 }
 0x461   :  { %650 = vrot.lane.b32.xlu0 %v4489_v7, %s4402_s29 }
 0x4bf   :  { %v4135_v44 = vpop.permute.xlu0 %4134 }
 0x4c0   :  { %v4137_v46 = vunpack.i.h.bf16 %v4135_v44  ;;  %v4136_v47 = vunpack.i.l.bf16 %v4135_v44 }
 0x4c2   :  { %v637_v2 = vsel %vm114_vm2, %v233_v26, %v4137_v46  ;;  %v636_v51 = vsel %vm114_vm2, %v230_v24, %v4136_v47  ;;  %v4632_v24 = vpack.c.bf16 %v32_v23, %v31_v22  ;;  %v4639_v26 = vshrl.u32 %v806_v25, 7 }
 0x4c4   :  { %v808_v28 = vsub.s32 0, %v4639_v26  ;;  %v812_v29 = vsub.s32 1, %v4639_v26 }
 0x4c6   :  { %v809_v30 = vrot.slane %v804_v27, %v808_v28  ;;  %v813_v31 = vrot.slane %v804_v27, %v812_v29 }
 0x4c7   :  { %v4140_v43 = vpop.permute.xlu1 %4139 }
 0x4c8   :  { %v4142_v48 = vunpack.i.h.bf16 %v4140_v43  ;;  %v4141_v49 = vunpack.i.l.bf16 %v4140_v43 }
 0x4ca   :  { %v639_v54 = vsel %vm166_vm3, %v637_v2, %v4142_v48  ;;  %v638_v7 = vsel %vm166_vm3, %v636_v51, %v4141_v49 }
 0x4cb   :  { %v645_v45 = vpop.permute.xlu1 %644 }
 0x4cc   :  { %3823 = vmatpush3.bf16.msra.mxu1 %v645_v45 }
 0x4cf   :  { %v4145_v50 = vpop.permute.xlu0 %4144 }
 0x4d0   :  { %v4147_v52 = vunpack.i.h.bf16 %v4145_v50  ;;  %v4146_v53 = vunpack.i.l.bf16 %v4145_v50 }
 0x4d2   :  { %v642_v55 = vsel %vm640_vm4, %v639_v54, %v4147_v52  ;;  %v641_v56 = vsel %vm640_vm4, %v638_v7, %v4146_v53 }
 0x4d3   :  { %v643_v57 = vpack.c.bf16 %v642_v55, %v641_v56  ;;  %v651_v58 = vpop.permute.xlu0 %650 }
 0x4d5   :  { %3825 = vmatmul.mubr.msk.bf16.vlgmr.msra.gmra.mxu1 %vm65_vm1, %v643_v57 }
 0x4d6   :  { %3840 = vmatprep.mubr.msk.bf16.mxu1 %vm65_vm1, %v4632_v24 }
 0x595   :  { %v690_v59 = vpop.f32.mrf.mxu1 }
 0x596   :  { %v691_v13 = vadd.f32 %v690_v59, %v651_v58 }
 0x597   :  { %v3826_v60 = vpop.f32.mrf.mxu1 }
 0x598   :  { %v697_v61 = vadd.f32 %v691_v13, %v4471_v3  ;;  %v4615_v3 = vld [vmem:[%s5359_s4 + $0x34] ss:$24 sps:$4 sm:$0xff]  }
 0x599   :  { %v693_v62 = vpop.f32.mrf.mxu1  ;;  %3829 = vmatpush3.bf16.msra.mxu0 %v4615_v3 }
 0x59a   :  { %v694_v63 = vadd.f32 %v693_v62, %v651_v58  ;;  %v700_v5 = vsel %vm65_vm1, %v697_v61, 0.0  ;;  %3830 = vmatprep.subr.bf16.mxu0 %v4389_v0 }
 0x59b   :  { %701 = vadd.xlane.f32.xlu1 %v700_v5  ;;  %v3827_v6 = vpop.f32.mrf.mxu1 }
 0x59c   :  { %v698_v8 = vadd.f32 %v694_v63, %v4476_v4 }
 0x59d   :  { %3831 = vmatpush3.bf16.msra.mxu0 %v4608_v10 }
 0x59e   :  { %v703_v9 = vsel %vm65_vm1, %v698_v8, 0.0  ;;  %3844 = vmatprep.subr.bf16.mxu0 %v4389_v0 }
 0x59f   :  { %704 = vadd.xlane.f32.xlu0 %v703_v9 }
 0x5ac   :  { %814 = vrot.lane.b32.xlu1 %v4608_v10, %s4392_s15 }
 0x624   :  { %v702_v4 = vpop.xlane.xlu1 %701 }
 0x625   :  { %v707_v11 = vmul.f32 0.03125, %v702_v4 }
 0x627   :  { %v709_v12 = vsub.f32 %v697_v61, %v707_v11 }
 0x628   :  { %v705_v14 = vpop.xlane.xlu0 %704  ;;  %v815_v32 = vpop.permute.xlu1 %814 }
 0x629   :  { %v708_v15 = vmul.f32 0.03125, %v705_v14  ;;  %v711_v16 = vmul.f32 %v709_v12, %v709_v12 }
 0x62b   :  { %v710_v17 = vsub.f32 %v698_v8, %v708_v15  ;;  %v713_v18 = vsel %vm65_vm1, %v711_v16, 0.0  ;;  %v4695_v16 = vld [vmem:[%s5364_s3] sm:$0xff] }
 0x62c   :  { %714 = vadd.xlane.f32.xlu0 %v713_v18 }
 0x62d   :  { %v712_v19 = vmul.f32 %v710_v17, %v710_v17 }
 0x62f   :  { %v716_v20 = vsel %vm65_vm1, %v712_v19, 0.0 }
 0x630   :  { %717 = vadd.xlane.f32.xlu1 %v716_v20 }
 0x641   :  { %735 = vrot.lane.b32.xlu1 %v3564_v21, %s4392_s15 }
 0x642   :  { %816 = vrot.lane.b32.xlu0 %v4615_v3, %s4392_s15 }
 0x645   :  { %822 = vrot.lane.b32.xlu1 %v813_v31, %s4402_s29 }
 0x646   :  { %820 = vrot.lane.b32.xlu0 %v809_v30, %s4402_s29 }
 0x64a   :  { %757 = vrot.lane.b32.xlu0 %v3564_v21, %s4399_s26 }
 0x6b5   :  { %v715_v33 = vpop.xlane.xlu0 %714 }
 0x6b6   :  { %v719_v34 = vmul.f32 0.03125, %v715_v33 }
 0x6b8   :  { %v721_v35 = vadd.f32 1e-05, %v719_v34 }
 0x6b9   :  { %v718_v36 = vpop.xlane.xlu1 %717  ;;  %v817_v1 = vpop.permute.xlu0 %816 }
 0x6ba   :  { %4253 = vrsqrt.f32 %v721_v35  ;;  %v720_v37 = vmul.f32 0.03125, %v718_v36  ;;  %3836 = vmatprep.subr.bf16.mxu1 %v817_v1 }
 0x6bb   :  { %3837 = vmatpush3.bf16.msra.mxu1 %v817_v1 }
 0x6bc   :  { %v722_v40 = vadd.f32 1e-05, %v720_v37  ;;  %3838 = vmatprep.subr.bf16.mxu1 %v815_v32 }
 0x6bd   :  { %v736_v47 = vpop.permute.xlu1 %735  ;;  %v821_v52 = vpop.permute.xlu0 %820 }
 0x6be   :  { %4255 = vrsqrt.f32 %v722_v40 }
 0x6bf   :  { %3839 = vmatpush3.bf16.msra.mxu1 %v815_v32 }
 0x6c0   :  { %3852 = vmatprep.subr.bf16.mxu1 %v4389_v0 }
 0x6c1   :  { %v823_v51 = vpop.permute.xlu1 %822  ;;  %v758_v6 = vpop.permute.xlu0 %757 }
 0x6c2   :  { %3841 = vmatmul.mubr.msk.bf16.vlgmr.msra.gmra.mxu1 %vm65_vm1, %v4659_v41  ;;  %v824_v54 = vsel %vm65_vm1, %v821_v52, %v823_v51 }
 0x6c3   :  { %3856 = vmatprep.mubr.msk.bf16.mxu1 %vm4390_vm0, %v4389_v0 }
 0x6c7   :  { %v4254_v42 = vpop.eup %4253 }
 0x6c8   :  { %v725_v43 = vmul.f32 %v4254_v42, %v709_v12 }
 0x6ca   :  { %v733_v46 = vmul.f32 %v3564_v21, %v725_v43 }
 0x6cb   :  { %v4256_v44 = vpop.eup %4255 }
 0x6cc   :  { %v726_v45 = vmul.f32 %v4256_v44, %v710_v17  ;;  %v4666_v49 = vadd.f32 %v736_v47, %v733_v46 }
 0x6ce   :  { %v734_v48 = vmul.f32 %v3564_v21, %v726_v45  ;;  %v4701_v21 = vld [vmem:[%s5364_s3 + $0x8] sm:$0xff] }
 0x6d0   :  { %v4668_v50 = vadd.f32 %v736_v47, %v734_v48 }
 0x6d2   :  { %v740_v2 = vpack.c.bf16 %v4668_v50, %v4666_v49 }
 0x6d4   :  { %3833 = vmatmul.mubr.msk.bf16.vlgmr.msra.gmra.mxu0 %vm65_vm1, %v740_v2 }
 0x6d5   :  { %3848 = vmatprep.mubr.msk.bf16.mxu0 %vm4390_vm0, %v4389_v0 }
 0x782   :  { %v3842_v53 = vpop.f32.mrf.mxu1 }
 0x783   :  { %v875_v56 = vadd.f32 %v3842_v53, %v824_v54 }
 0x784   :  { %v866_v7 = vpop.f32.mrf.mxu1 }
 0x785   :  { %v867_v61 = vadd.f32 %v866_v7, %v824_v54 }
 0x786   :  { %v3843_v55 = vpop.f32.mrf.mxu1 }
 0x787   :  { %v878_v57 = vadd.f32 %v3843_v55, %v824_v54 }
 0x788   :  { %v869_v58 = vpop.f32.mrf.mxu1 }
 0x789   :  { %v4676_v59 = vpack.c.bf16 %v878_v57, %v875_v56  ;;  %v870_v13 = vadd.f32 %v869_v58, %v824_v54 }
 0x78b   :  { %v892_v60 = vsel %vm114_vm2, %v4676_v59, 0  ;;  %v4681_v62 = vpack.c.bf16 %v870_v13, %v867_v61 }
 0x78c   :  { %3845 = vmatpush3.bf16.xpose.msra.mxu0 %v892_v60 }
 0x78d   :  { %3846 = vmatprep.subr.bf16.mxu0 %v4389_v0  ;;  %v889_v63 = vsel %vm114_vm2, %v4681_v62, 0 }
 0x794   :  { %v797_v5 = vpop.f32.mrf.mxu0  ;;  %3847 = vmatpush3.bf16.xpose.msra.mxu0 %v889_v63 }
 0x795   :  { %3868 = vmatprep.subr.bf16.mxu0 %v4389_v0  ;;  %v798_v4 = vadd.f32 %v797_v5, %v758_v6 }
 0x796   :  { %v3834_v8 = vpop.f32.mrf.mxu0 }
 0x798   :  { %v800_v9 = vpop.f32.mrf.mxu0 }
 0x799   :  { %v801_v11 = vadd.f32 %v800_v9, %v758_v6 }
 0x79a   :  { %v3835_v12 = vpop.f32.mrf.mxu0 }
 0x79b   :  { %v4686_v14 = vpack.c.bf16 %v801_v11, %v798_v4 }
 0x79d   :  { %3849 = vmatmul.mubr.msk.bf16.vlgmr.msra.gmra.mxu0 %vm114_vm2, %v4686_v14 }
 0x79e   :  { %3872 = vmatprep.mubr.msk.bf16.mxu0 %vm4390_vm0, %v4389_v0 }
 0x85d   :  { %v928_v15 = vpop.f32.mrf.mxu0 }
 0x85e   :  { %v935_v17 = vmul.f32 0.35355338, %v928_v15 }
 0x85f   :  { %v3850_v18 = vpop.f32.mrf.mxu0 }
 0x860   :  { %v937_v19 = vadd.f32 %v935_v17, %v4695_v16 }
 0x861   :  { %v931_v20 = vpop.f32.mrf.mxu0 }
 0x862   :  { %v936_v22 = vmul.f32 0.35355338, %v931_v20  ;;  %v939_v23 = vsel %vm65_vm1, %v937_v19, -inf }
 0x863   :  { %940 = vmax.xlane.f32.xlu1 %v939_v23  ;;  %v3851_v25 = vpop.f32.mrf.mxu0 }
 0x864   :  { %v938_v27 = vadd.f32 %v936_v22, %v4701_v21 }
 0x866   :  { %v942_v30 = vsel %vm65_vm1, %v938_v27, -inf }
 0x867   :  { %943 = vmax.xlane.f32.xlu0 %v942_v30 }
 0x874   :  { %964 = vrot.lane.b32.xlu1 %v4681_v62, %s4392_s15 }
 0x8ec   :  { %v941_v31 = vpop.xlane.xlu1 %940 }
 0x8ed   :  { %v945_v32 = vsub.f32 %v937_v19, %v941_v31 }
 0x8ef   :  { %v947_v33 = vmul.f32 1.442695, %v945_v32 }
 0x8f0   :  { %v944_v34 = vpop.xlane.xlu0 %943  ;;  %v965_v40 = vpop.permute.xlu1 %964 }
 0x8f1   :  { %4257 = vpow2.f32 %v947_v33  ;;  %v946_v35 = vsub.f32 %v938_v27, %v944_v34 }
 0x8f3   :  { %v949_v36 = vmul.f32 1.442695, %v946_v35 }
 0x8f5   :  { %4259 = vpow2.f32 %v949_v36 }
 0x8fe   :  { %v4258_v1 = vpop.eup %4257 }
 0x8ff   :  { %v951_v37 = vsel %vm65_vm1, %v4258_v1, 0.0 }
 0x900   :  { %952 = vadd.xlane.f32.xlu0 %v951_v37 }
 0x902   :  { %v4260_v38 = vpop.eup %4259 }
 0x903   :  { %v954_v39 = vsel %vm65_vm1, %v4260_v38, 0.0 }
 0x904   :  { %955 = vadd.xlane.f32.xlu1 %v954_v39 }
 0x915   :  { %1019 = vrot.lane.b32.xlu1 %v4676_v59, %s4391_s0 }
 0x916   :  { %966 = vrot.lane.b32.xlu0 %v4676_v59, %s4392_s15 }
 0x919   :  { %1015 = vrot.lane.b32.xlu1 %v4686_v14, %s4391_s0 }
 0x91a   :  { %1017 = vrot.lane.b32.xlu0 %v4681_v62, %s4391_s0 }
 0x989   :  { %v953_v42 = vpop.xlane.xlu0 %952 }
 0x98a   :  { %4261 = vrcp.f32 %v953_v42 }
 0x98d   :  { %v956_v43 = vpop.xlane.xlu1 %955  ;;  %v967_v44 = vpop.permute.xlu0 %966 }
 0x98e   :  { %4263 = vrcp.f32 %v956_v43  ;;  %3853 = vmatpush3.bf16.msra.mxu1 %v967_v44 }
 0x98f   :  { %3854 = vmatprep.subr.bf16.mxu1 %v4389_v0 }
 0x991   :  { %v1020_v2 = vpop.permute.xlu1 %1019  ;;  %v1018_v53 = vpop.permute.xlu0 %1017 }
 0x992   :  { %3855 = vmatpush3.bf16.msra.mxu1 %v965_v40  ;;  %v1028_v52 = vsel %vm114_vm2, %v1020_v2, 0  ;;  %v1025_v54 = vsel %vm114_vm2, %v1018_v53, 0 }
 0x993   :  { %3860 = vmatprep.subr.bf16.mxu1 %v4389_v0 }
 0x995   :  { %v1016_v7 = vpop.permute.xlu1 %1015 }
 0x997   :  { %v4262_v45 = vpop.eup %4261 }
 0x998   :  { %v959_v47 = vmul.f32 %v4262_v45, %v4258_v1 }
 0x99b   :  { %v4264_v46 = vpop.eup %4263 }
 0x99c   :  { %v960_v48 = vmul.f32 %v4264_v46, %v4260_v38 }
 0x99e   :  { %v961_v51 = vpack.c.bf16 %v960_v48, %v959_v47 }
 0x9a0   :  { %3857 = vmatmul.mubr.msk.bf16.vlgmr.msra.gmra.mxu1 %vm65_vm1, %v961_v51 }
 0x9a1   :  { %3861 = vmatpush3.bf16.xpose.msra.mxu1 %v1028_v52  ;;  %3864 = vmatprep.mubr.msk.bf16.mxu1 %vm4390_vm0, %v4389_v0 }
 0x9a2   :  { %3862 = vmatprep.subr.bf16.mxu1 %v4389_v0 }
 0x9a9   :  { %3863 = vmatpush3.bf16.xpose.msra.mxu1 %v1025_v54 }
 0x9aa   :  { %3884 = vmatprep.subr.bf16.mxu1 %v4389_v0 }
 0x9b0   :  { %3865 = vmatmul.mubr.msk.bf16.vlgmr.msra.gmra.mxu1 %vm114_vm2, %v1016_v7 }
 0x9b1   :  { %3888 = vmatprep.mubr.msk.bf16.mxu1 %vm4390_vm0, %v4389_v0 }
 0xa60   :  { %v4730_v55 = vpop.f32.mrf.mxu1 }
 0xa62   :  { %v3858_v56 = vpop.f32.mrf.mxu1 }
 0xa64   :  { %v4732_v57 = vpop.f32.mrf.mxu1 }
 0xa66   :  { %v3859_v58 = vpop.f32.mrf.mxu1 }
 0xa70   :  { %v1064_v13 = vpop.f32.mrf.mxu1 }
 0xa71   :  { %v1071_v60 = vmul.f32 0.35355338, %v1064_v13 }
 0xa72   :  { %v3866_v61 = vpop.f32.mrf.mxu1 }
 0xa73   :  { %v1073_v63 = vadd.f32 %v1071_v60, %v4695_v16 }
 0xa74   :  { %v1067_v5 = vpop.f32.mrf.mxu1 }
 0xa75   :  { %v1072_v6 = vmul.f32 0.35355338, %v1067_v5  ;;  %v1075_v8 = vsel %vm65_vm1, %v1073_v63, -inf }
 0xa76   :  { %1076 = vmax.xlane.f32.xlu0 %v1075_v8  ;;  %v3867_v9 = vpop.f32.mrf.mxu1 }
 0xa77   :  { %v1074_v4 = vadd.f32 %v1072_v6, %v4701_v21 }
 0xa79   :  { %v1078_v11 = vsel %vm65_vm1, %v1074_v4, -inf }
 0xa7a   :  { %1079 = vmax.xlane.f32.xlu1 %v1078_v11 }
 0xa8b   :  { %1100 = vrot.lane.b32.xlu1 %v4676_v59, %s4394_s17 }
 0xa8f   :  { %1152 = vrot.lane.b32.xlu1 %v4676_v59, %s4396_s19 }
 0xa93   :  { %1150 = vrot.lane.b32.xlu1 %v4681_v62, %s4396_s19 }
 0xaff   :  { %v1077_v12 = vpop.xlane.xlu0 %1076 }
 0xb00   :  { %v1081_v15 = vsub.f32 %v1073_v63, %v1077_v12 }
 0xb02   :  { %v1083_v17 = vmul.f32 1.442695, %v1081_v15 }
 0xb03   :  { %v1080_v18 = vpop.xlane.xlu1 %1079 }
 0xb04   :  { %4265 = vpow2.f32 %v1083_v17  ;;  %v1082_v19 = vsub.f32 %v1074_v4, %v1080_v18 }
 0xb06   :  { %v1085_v20 = vmul.f32 1.442695, %v1082_v19 }
 0xb07   :  { %v1101_v22 = vpop.permute.xlu1 %1100 }
 0xb08   :  { %4267 = vpow2.f32 %v1085_v20  ;;  %3869 = vmatpush3.bf16.msra.mxu0 %v1101_v22 }
 0xb09   :  { %3870 = vmatprep.subr.bf16.mxu0 %v4389_v0 }
 0xb0b   :  { %v1153_v37 = vpop.permute.xlu1 %1152 }
 0xb0c   :  { %v1161_v39 = vsel %vm114_vm2, %v1153_v37, 0 }
 0xb0f   :  { %v1151_v40 = vpop.permute.xlu1 %1150 }
 0xb10   :  { %v1158_v42 = vsel %vm114_vm2, %v1151_v40, 0 }
 0xb11   :  { %v4266_v23 = vpop.eup %4265 }
 0xb12   :  { %v1087_v25 = vsel %vm65_vm1, %v4266_v23, 0.0 }
 0xb13   :  { %1088 = vadd.xlane.f32.xlu0 %v1087_v25 }
 0xb15   :  { %v4268_v27 = vpop.eup %4267 }
 0xb16   :  { %v1090_v30 = vsel %vm65_vm1, %v4268_v27, 0.0 }
 0xb17   :  { %1091 = vadd.xlane.f32.xlu0 %v1090_v30 }
 0xb2d   :  { %1098 = vrot.lane.b32.xlu0 %v4681_v62, %s4394_s17 }
 0xb31   :  { %1148 = vrot.lane.b32.xlu0 %v4686_v14, %s4396_s19 }
 0xb9c   :  { %v1089_v31 = vpop.xlane.xlu0 %1088 }
 0xb9d   :  { %4269 = vrcp.f32 %v1089_v31 }
 0xba0   :  { %v1092_v32 = vpop.xlane.xlu0 %1091 }
 0xba1   :  { %4271 = vrcp.f32 %v1092_v32 }
 0xba4   :  { %v1099_v33 = vpop.permute.xlu0 %1098 }
 0xba5   :  { %3871 = vmatpush3.bf16.msra.mxu0 %v1099_v33 }
 0xba6   :  { %3876 = vmatprep.subr.bf16.mxu0 %v4389_v0 }
 0xba8   :  { %v1149_v43 = vpop.permute.xlu0 %1148 }
 0xbaa   :  { %v4270_v34 = vpop.eup %4269 }
 0xbab   :  { %v1095_v36 = vmul.f32 %v4270_v34, %v4266_v23 }
 0xbae   :  { %v4272_v35 = vpop.eup %4271 }
 0xbaf   :  { %v1096_v1 = vmul.f32 %v4272_v35, %v4268_v27 }
 0xbb1   :  { %v1097_v38 = vpack.c.bf16 %v1096_v1, %v1095_v36 }
 0xbb3   :  { %3873 = vmatmul.mubr.msk.bf16.vlgmr.msra.gmra.mxu0 %vm65_vm1, %v1097_v38 }
 0xbb4   :  { %3877 = vmatpush3.bf16.xpose.msra.mxu0 %v1161_v39  ;;  %3880 = vmatprep.mubr.msk.bf16.mxu0 %vm4390_vm0, %v4389_v0 }
 0xbb5   :  { %3878 = vmatprep.subr.bf16.mxu0 %v4389_v0 }
 0xbbc   :  { %3879 = vmatpush3.bf16.xpose.msra.mxu0 %v1158_v42 }
 0xbbd   :  { %3900 = vmatprep.subr.bf16.mxu0 %v4389_v0 }
 0xbc3   :  { %3881 = vmatmul.mubr.msk.bf16.vlgmr.msra.gmra.mxu0 %vm114_vm2, %v1149_v43 }
 0xbc4   :  { %3904 = vmatprep.mubr.msk.bf16.mxu0 %vm4390_vm0, %v4389_v0 }
 0xc73   :  { %v4762_v44 = vpop.f32.mrf.mxu0 }
 0xc75   :  { %v3874_v45 = vpop.f32.mrf.mxu0 }
 0xc77   :  { %v4764_v46 = vpop.f32.mrf.mxu0 }
 0xc78   :  { %v4148_v47 = vpack.i.bf16 %v4764_v46, %v4762_v44 }
 0xc79   :  { %v3875_v48 = vpop.f32.mrf.mxu0 }
 0xc83   :  { %v1197_v2 = vpop.f32.mrf.mxu0 }
 0xc84   :  { %v1204_v51 = vmul.f32 0.35355338, %v1197_v2 }
 0xc85   :  { %v3882_v52 = vpop.f32.mrf.mxu0 }
 0xc86   :  { %v1206_v53 = vadd.f32 %v1204_v51, %v4695_v16 }
 0xc87   :  { %v1200_v54 = vpop.f32.mrf.mxu0 }
 0xc88   :  { %v1205_v7 = vmul.f32 0.35355338, %v1200_v54  ;;  %v1208_v56 = vsel %vm65_vm1, %v1206_v53, -inf }
 0xc89   :  { %1209 = vmax.xlane.f32.xlu1 %v1208_v56  ;;  %v3883_v58 = vpop.f32.mrf.mxu0 }
 0xc8a   :  { %v1207_v13 = vadd.f32 %v1205_v7, %v4701_v21 }
 0xc8c   :  { %v1211_v60 = vsel %vm65_vm1, %v1207_v13, -inf }
 0xc8d   :  { %1212 = vmax.xlane.f32.xlu0 %v1211_v60 }
 0xc9a   :  { %1231 = vrot.lane.b32.xlu1 %v4681_v62, %s4393_s16 }
 0xd12   :  { %v1210_v61 = vpop.xlane.xlu1 %1209 }
 0xd13   :  { %v1214_v63 = vsub.f32 %v1206_v53, %v1210_v61 }
 0xd15   :  { %v1216_v5 = vmul.f32 1.442695, %v1214_v63 }
 0xd16   :  { %v1213_v6 = vpop.xlane.xlu0 %1212  ;;  %v1232_v17 = vpop.permute.xlu1 %1231 }
 0xd17   :  { %4273 = vpow2.f32 %v1216_v5  ;;  %v1215_v8 = vsub.f32 %v1207_v13, %v1213_v6 }
 0xd19   :  { %v1218_v9 = vmul.f32 1.442695, %v1215_v8 }
 0xd1b   :  { %4275 = vpow2.f32 %v1218_v9 }
 0xd24   :  { %v4274_v4 = vpop.eup %4273 }
 0xd25   :  { %v1220_v11 = vsel %vm65_vm1, %v4274_v4, 0.0 }
 0xd26   :  { %1221 = vadd.xlane.f32.xlu0 %v1220_v11 }
 0xd28   :  { %v4276_v12 = vpop.eup %4275 }
 0xd29   :  { %v1223_v15 = vsel %vm65_vm1, %v4276_v12, 0.0 }
 0xd2a   :  { %1224 = vadd.xlane.f32.xlu1 %v1223_v15 }
 0xd3b   :  { %1285 = vrot.lane.b32.xlu1 %v4676_v59, %s4397_s20 }
 0xd3c   :  { %1233 = vrot.lane.b32.xlu0 %v4676_v59, %s4393_s16 }
 0xd3f   :  { %1281 = vrot.lane.b32.xlu1 %v4686_v14, %s4397_s20 }
 0xd40   :  { %1283 = vrot.lane.b32.xlu0 %v4681_v62, %s4397_s20 }
 0xdaf   :  { %v1222_v18 = vpop.xlane.xlu0 %1221 }
 0xdb0   :  { %4277 = vrcp.f32 %v1222_v18 }
 0xdb3   :  { %v1225_v19 = vpop.xlane.xlu1 %1224  ;;  %v1234_v20 = vpop.permute.xlu0 %1233 }
 0xdb4   :  { %4279 = vrcp.f32 %v1225_v19  ;;  %3885 = vmatpush3.bf16.msra.mxu1 %v1234_v20  ;;  %v3578_v19 = vld [vmem:[%s5361_s6 + $0x2] ss:$0 sm:$0xff] }
 0xdb5   :  { %3886 = vmatprep.subr.bf16.mxu1 %v4389_v0 }
 0xdb7   :  { %v1286_v14 = vpop.permute.xlu1 %1285  ;;  %v1284_v32 = vpop.permute.xlu0 %1283 }
 0xdb8   :  { %3887 = vmatpush3.bf16.msra.mxu1 %v1232_v17  ;;  %v1294_v31 = vsel %vm114_vm2, %v1286_v14, 0  ;;  %v1291_v33 = vsel %vm114_vm2, %v1284_v32, 0 }
 0xdb9   :  { %3892 = vmatprep.subr.bf16.mxu1 %v4389_v0 }
 0xdbb   :  { %v1282_v34 = vpop.permute.xlu1 %1281 }
 0xdbd   :  { %v4278_v22 = vpop.eup %4277 }
 0xdbe   :  { %v1228_v25 = vmul.f32 %v4278_v22, %v4274_v4 }
 0xdc1   :  { %v4280_v23 = vpop.eup %4279 }
 0xdc2   :  { %v1229_v27 = vmul.f32 %v4280_v23, %v4276_v12 }
 0xdc4   :  { %v1230_v30 = vpack.c.bf16 %v1229_v27, %v1228_v25 }
 0xdc6   :  { %3889 = vmatmul.mubr.msk.bf16.vlgmr.msra.gmra.mxu1 %vm65_vm1, %v1230_v30 }
 0xdc7   :  { %3893 = vmatpush3.bf16.xpose.msra.mxu1 %v1294_v31  ;;  %3896 = vmatprep.mubr.msk.bf16.mxu1 %vm4390_vm0, %v4389_v0 }
 0xdc8   :  { %3894 = vmatprep.subr.bf16.mxu1 %v4389_v0 }
 0xdcf   :  { %3895 = vmatpush3.bf16.xpose.msra.mxu1 %v1291_v33 }
 0xdd0   :  { %3916 = vmatprep.subr.bf16.mxu1 %v4389_v0 }
 0xdd6   :  { %3897 = vmatmul.mubr.msk.bf16.vlgmr.msra.gmra.mxu1 %vm114_vm2, %v1282_v34 }
 0xdd7   :  { %3920 = vmatprep.mubr.msk.bf16.mxu1 %vm4390_vm0, %v4389_v0 }
 0xe86   :  { %v1274_v35 = vpop.f32.mrf.mxu1 }
 0xe88   :  { %v3890_v36 = vpop.f32.mrf.mxu1 }
 0xe8a   :  { %v1277_v1 = vpop.f32.mrf.mxu1 }
 0xe8b   :  { %v4153_v37 = vpack.i.bf16 %v1277_v1, %v1274_v35 }
 0xe8c   :  { %v3891_v38 = vpop.f32.mrf.mxu1 }
 0xe96   :  { %v1330_v39 = vpop.f32.mrf.mxu1 }
 0xe97   :  { %v1337_v40 = vmul.f32 0.35355338, %v1330_v39 }
 0xe98   :  { %v3898_v42 = vpop.f32.mrf.mxu1 }
 0xe99   :  { %v1339_v43 = vadd.f32 %v1337_v40, %v4695_v16 }
 0xe9a   :  { %v1333_v45 = vpop.f32.mrf.mxu1 }
 0xe9b   :  { %v1338_v48 = vmul.f32 0.35355338, %v1333_v45  ;;  %v1341_v2 = vsel %vm65_vm1, %v1339_v43, -inf }
 0xe9c   :  { %1342 = vmax.xlane.f32.xlu0 %v1341_v2  ;;  %v3899_v51 = vpop.f32.mrf.mxu1 }
 0xe9d   :  { %v1340_v52 = vadd.f32 %v1338_v48, %v4701_v21 }
 0xe9f   :  { %v1344_v53 = vsel %vm65_vm1, %v1340_v52, -inf }
 0xea0   :  { %1345 = vmax.xlane.f32.xlu1 %v1344_v53 }
 0xeb1   :  { %1366 = vrot.lane.b32.xlu1 %v4676_v59, %s4395_s18 }
 0xeb5   :  { %1452 = vrot.lane.b32.xlu1 %v4615_v3, %s4402_s29 }
 0xeb9   :  { %4149 = vrot.lane.b32.xlu1 %v4148_v47, %s4403_s30 }
 0xf25   :  { %v1343_v16 = vpop.xlane.xlu0 %1342 }
 0xf26   :  { %v1347_v54 = vsub.f32 %v1339_v43, %v1343_v16 }
 0xf28   :  { %v1349_v7 = vmul.f32 1.442695, %v1347_v54 }
 0xf29   :  { %v1346_v56 = vpop.xlane.xlu1 %1345 }
 0xf2a   :  { %4281 = vpow2.f32 %v1349_v7  ;;  %v1348_v21 = vsub.f32 %v1340_v52, %v1346_v56 }
 0xf2c   :  { %v1351_v58 = vmul.f32 1.442695, %v1348_v21 }
 0xf2d   :  { %v1367_v13 = vpop.permute.xlu1 %1366 }
 0xf2e   :  { %4283 = vpow2.f32 %v1351_v58  ;;  %3901 = vmatpush3.bf16.msra.mxu0 %v1367_v13 }
 0xf2f   :  { %3902 = vmatprep.subr.bf16.mxu0 %v4389_v0 }
 0xf31   :  { %v1453_v4 = vpop.permute.xlu1 %1452 }
 0xf35   :  { %v4150_v20 = vpop.permute.xlu1 %4149 }
 0xf36   :  { %v4152_v22 = vunpack.i.h.bf16 %v4150_v20  ;;  %v4151_v23 = vunpack.i.l.bf16 %v4150_v20  ;;  %v4201_v20 = vld [vmem:[%s5365_s5 + $0x8] sm:$0xff]  }
 0xf37   :  { %v4282_v59 = vpop.eup %4281 }
 0xf38   :  { %v1353_v3 = vsel %vm65_vm1, %v4282_v59, 0.0  ;;  %v1439_v30 = vsel %vm114_vm2, %v4732_v57, %v4152_v22  ;;  %v1438_v31 = vsel %vm114_vm2, %v4730_v55, %v4151_v23  ;;  %v4202_v22 = vld [vmem:[%s5365_s5] sm:$0xff]  }
 0xf39   :  { %1354 = vadd.xlane.f32.xlu0 %v1353_v3  ;;  %v3580_v3 = vld [vmem:[%s5361_s6 + $0x3] ss:$0 sm:$0xff] }
 0xf3b   :  { %v4284_v60 = vpop.eup %4283 }
 0xf3c   :  { %v1356_v44 = vsel %vm65_vm1, %v4284_v60, 0.0 }
 0xf3d   :  { %1357 = vadd.xlane.f32.xlu0 %v1356_v44 }
 0xf53   :  { %1364 = vrot.lane.b32.xlu0 %v4681_v62, %s4395_s18 }
 0xf57   :  { %4154 = vrot.lane.b32.xlu0 %v4153_v37, %s4404_s9 }
 0xf5b   :  { %1450 = vrot.lane.b32.xlu0 %v4608_v10, %s4402_s29 }
 0xfc2   :  { %v1355_v46 = vpop.xlane.xlu0 %1354 }
 0xfc3   :  { %4285 = vrcp.f32 %v1355_v46 }
 0xfc6   :  { %v1358_v47 = vpop.xlane.xlu0 %1357 }
 0xfc7   :  { %4287 = vrcp.f32 %v1358_v47 }
 0xfca   :  { %v1365_v61 = vpop.permute.xlu0 %1364 }
 0xfcb   :  { %3903 = vmatpush3.bf16.msra.mxu0 %v1365_v61 }
 0xfcc   :  { %3908 = vmatprep.subr.bf16.mxu0 %v4389_v0 }
 0xfce   :  { %v4155_v10 = vpop.permute.xlu0 %4154 }
 0xfcf   :  { %v4157_v25 = vunpack.i.h.bf16 %v4155_v10  ;;  %v4156_v27 = vunpack.i.l.bf16 %v4155_v10 }
 0xfd0   :  { %v4286_v63 = vpop.eup %4285 }
 0xfd1   :  { %v1361_v6 = vmul.f32 %v4286_v63, %v4282_v59  ;;  %v1440_v34 = vsel %vm166_vm3, %v1438_v31, %v4156_v27  ;;  %v1441_v35 = vsel %vm166_vm3, %v1439_v30, %v4157_v25  ;;  %v4198_v59 = vld [vmem:[%s5359_s4 + $0x8] ss:$24 sps:$4 sm:$0xff]  }
 0xfd2   :  { %v1451_v62 = vpop.permute.xlu0 %1450 }
 0xfd4   :  { %v4288_v5 = vpop.eup %4287 }
 0xfd5   :  { %v1362_v8 = vmul.f32 %v4288_v5, %v4284_v60  ;;  %v4199_v60 = vld [vmem:[%s5365_s5 + $0x18] sm:$0xff]  }
 0xfd7   :  { %v1363_v9 = vpack.c.bf16 %v1362_v8, %v1361_v6 }
 0xfd9   :  { %3905 = vmatmul.mubr.msk.bf16.vlgmr.msra.gmra.mxu0 %vm65_vm1, %v1363_v9 }
 0xfda   :  { %3909 = vmatpush3.bf16.msra.mxu0 %v1453_v4  ;;  %3912 = vmatprep.mubr.msk.bf16.mxu0 %vm4390_vm0, %v4389_v0 }
 0xfdb   :  { %3910 = vmatprep.subr.bf16.mxu0 %v4389_v0 }
 0xfde   :  { %3911 = vmatpush3.bf16.msra.mxu0 %v1451_v62 }
 0xfdf   :  { %3924 = vmatprep.subr.bf16.mxu0 %v4389_v0 }
0x1099   :  { %v1407_v11 = vpop.f32.mrf.mxu0 }
0x109b   :  { %v3906_v12 = vpop.f32.mrf.mxu0 }
0x109d   :  { %v1410_v15 = vpop.f32.mrf.mxu0 }
0x109e   :  { %v4158_v17 = vpack.i.bf16 %v1410_v15, %v1407_v11 }
0x109f   :  { %v3907_v18 = vpop.f32.mrf.mxu0 }
0x10a0   :  { %4159 = vrot.lane.b32.xlu1 %v4158_v17, %s4405_s10 }
0x10a4   :  { %1456 = vrot.lane.b32.xlu1 %v3578_v19, %s4392_s15 }
0x1112   :  { %v4160_v14 = vpop.permute.xlu1 %4159 }
0x1113   :  { %v4162_v32 = vunpack.i.h.bf16 %v4160_v14  ;;  %v4161_v33 = vunpack.i.l.bf16 %v4160_v14 }
0x1115   :  { %v1443_v36 = vsel %vm640_vm4, %v1441_v35, %v4162_v32  ;;  %v1442_v1 = vsel %vm640_vm4, %v1440_v34, %v4161_v33 }
0x1116   :  { %v1444_v37 = vpack.c.bf16 %v1443_v36, %v1442_v1  ;;  %v1457_v57 = vpop.permute.xlu1 %1456 }
0x1118   :  { %3913 = vmatmul.mubr.msk.bf16.vlgmr.msra.gmra.mxu0 %vm65_vm1, %v1444_v37 }
0x1119   :  { %3932 = vmatprep.mubr.msk.bf16.mxu0 %vm4390_vm0, %v4389_v0  ;;  %3925 = vmatpush3.bf16.msra.mxu0 %v4199_v60 }
0x111a   :  { %3926 = vmatprep.subr.bf16.mxu0 %v4389_v0 }
0x11d8   :  { %v1496_v38 = vpop.f32.mrf.mxu0 }
0x11d9   :  { %v1497_v39 = vadd.f32 %v1496_v38, %v1457_v57 }
0x11da   :  { %v3914_v55 = vpop.f32.mrf.mxu0 }
0x11db   :  { %v1503_v40 = vadd.f32 %v1497_v39, %v4666_v49 }
0x11dc   :  { %v1499_v42 = vpop.f32.mrf.mxu0 }
0x11dd   :  { %v1500_v43 = vadd.f32 %v1499_v42, %v1457_v57  ;;  %v1505_v45 = vsel %vm65_vm1, %v1503_v40, 0.0 }
0x11de   :  { %1506 = vadd.xlane.f32.xlu0 %v1505_v45  ;;  %v3915_v48 = vpop.f32.mrf.mxu0  ;;  %v4203_v45 = vld [vmem:[%s5359_s4 + $0x3c] ss:$24 sps:$4 sm:$0xff]  }
0x11df   :  { %v1504_v2 = vadd.f32 %v1500_v43, %v4668_v50  ;;  %v4197_v50 = vld [vmem:[%s5359_s4 + $0x38] ss:$24 sps:$4 sm:$0xff]  }
0x11e0   :  { %3917 = vmatpush3.bf16.msra.mxu1 %v4197_v50  ;;  %v3589_v50 = vld [vmem:[%s5361_s6 + $0x4] ss:$0 sm:$0xff] }
0x11e1   :  { %v1508_v51 = vsel %vm65_vm1, %v1504_v2, 0.0  ;;  %3918 = vmatprep.subr.bf16.mxu1 %v4389_v0 }
0x11e2   :  { %1509 = vadd.xlane.f32.xlu1 %v1508_v51 }
0x11e4   :  { %3919 = vmatpush3.bf16.msra.mxu1 %v4198_v59 }
0x11e5   :  { %3936 = vmatprep.subr.bf16.mxu1 %v4389_v0 }
0x11f3   :  { %1531 = vrot.lane.b32.xlu1 %v3578_v19, %s4399_s26 }
0x11f7   :  { %1644 = vrot.lane.b32.xlu1 %v3580_v3, %s4399_s26 }
0x1267   :  { %v1507_v52 = vpop.xlane.xlu0 %1506 }
0x1268   :  { %v1511_v53 = vmul.f32 0.03125, %v1507_v52 }
0x126a   :  { %v1513_v16 = vsub.f32 %v1503_v40, %v1511_v53 }
0x126b   :  { %v1510_v54 = vpop.xlane.xlu1 %1509 }
0x126c   :  { %v1512_v7 = vmul.f32 0.03125, %v1510_v54  ;;  %v1515_v56 = vmul.f32 %v1513_v16, %v1513_v16 }
0x126e   :  { %v1514_v49 = vsub.f32 %v1504_v2, %v1512_v7  ;;  %v1517_v21 = vsel %vm65_vm1, %v1515_v56, 0.0 }
0x126f   :  { %1518 = vadd.xlane.f32.xlu0 %v1517_v21  ;;  %v1532_v9 = vpop.permute.xlu1 %1531  ;;  %v4208_v21 = vld [vmem:[%s5359_s4 + $0xc] ss:$24 sps:$4 sm:$0xff]  }
0x1270   :  { %v1516_v58 = vmul.f32 %v1514_v49, %v1514_v49 }
0x1272   :  { %v1520_v13 = vsel %vm65_vm1, %v1516_v58, 0.0  ;;  %v4205_v58 = vld [vmem:[%s5359_s4 + $0x38] ss:$24 sps:$4 sm:$0xff]  }
0x1273   :  { %1521 = vadd.xlane.f32.xlu0 %v1520_v13  ;;  %v1645_v35 = vpop.permute.xlu1 %1644  ;;  %v4206_v13 = vld [vmem:[%s5359_s4 + $0x8] ss:$24 sps:$4 sm:$0xff]  }
0x1289   :  { %1536 = vrot.lane.b32.xlu0 %v3578_v19, %s4402_s29  ;;  %v4200_v19 = vld [vmem:[%s5365_s5 + $0x10] sm:$0xff]  }
0x128a   :  { %3927 = vmatpush3.bf16.msra.mxu0 %v4200_v19 }
0x128b   :  { %3928 = vmatprep.subr.bf16.mxu0 %v4389_v0 }
0x128e   :  { %3929 = vmatpush3.bf16.msra.mxu0 %v4201_v20 }
0x128f   :  { %3930 = vmatprep.subr.bf16.mxu0 %v4389_v0 }
0x1292   :  { %3931 = vmatpush3.bf16.msra.mxu0 %v4202_v22 }
0x1293   :  { %3950 = vmatprep.subr.bf16.mxu0 %v4389_v0 }
0x12f8   :  { %v1519_v44 = vpop.xlane.xlu0 %1518 }
0x12f9   :  { %v1523_v46 = vmul.f32 0.03125, %v1519_v44 }
0x12fb   :  { %v1525_v47 = vadd.f32 1e-05, %v1523_v46 }
0x12fc   :  { %v1522_v61 = vpop.xlane.xlu0 %1521 }
0x12fd   :  { %4289 = vrsqrt.f32 %v1525_v47  ;;  %v1524_v63 = vmul.f32 0.03125, %v1522_v61 }
0x12ff   :  { %v1526_v5 = vadd.f32 1e-05, %v1524_v63 }
0x1300   :  { %v1537_v11 = vpop.permute.xlu0 %1536 }
0x1301   :  { %4291 = vrsqrt.f32 %v1526_v5 }
0x130a   :  { %v4290_v6 = vpop.eup %4289 }
0x130b   :  { %v1529_v8 = vmul.f32 %v4290_v6, %v1513_v16 }
0x130d   :  { %v1534_v62 = vmul.f32 %v1532_v9, %v1529_v8 }
0x130e   :  { %v4292_v4 = vpop.eup %4291 }
0x130f   :  { %v1530_v10 = vmul.f32 %v4292_v4, %v1514_v49  ;;  %v1539_v15 = vadd.f32 %v1537_v11, %v1534_v62 }
0x1311   :  { %v1535_v12 = vmul.f32 %v1532_v9, %v1530_v10 }
0x1313   :  { %v1540_v17 = vadd.f32 %v1537_v11, %v1535_v12 }
0x1315   :  { %v1541_v18 = vpack.c.bf16 %v1540_v17, %v1539_v15 }
0x1317   :  { %3921 = vmatmul.mubr.msk.bf16.vlgmr.msra.gmra.mxu1 %vm65_vm1, %v1541_v18 }
0x1318   :  { %3940 = vmatprep.mubr.msk.bf16.mxu1 %vm4390_vm0, %v4389_v0 }
0x13d7   :  { %v1602_v23 = vpop.f32.mrf.mxu1 }
0x13d8   :  { %v1603_v27 = vadd.f32 %v3580_v3, %v1602_v23 }
0x13d9   :  { %v3922_v25 = vpop.f32.mrf.mxu1 }
0x13da   :  { %v1609_v32 = vmax.f32 %v1603_v27, 0.0 }
0x13db   :  { %v1605_v14 = vpop.f32.mrf.mxu1 }
0x13dc   :  { %v1606_v30 = vadd.f32 %v3580_v3, %v1605_v14 }
0x13dd   :  { %v3923_v31 = vpop.f32.mrf.mxu1 }
0x13de   :  { %v1610_v33 = vmax.f32 %v1606_v30, 0.0 }
0x13e0   :  { %v1611_v34 = vpack.c.bf16 %v1610_v33, %v1609_v32 }
0x13e2   :  { %3933 = vmatmul.mubr.msk.bf16.vlgmr.msra.gmra.mxu0 %vm1647_vm5, %v1611_v34 }
0x13e3   :  { %3952 = vmatprep.mubr.msk.bf16.mxu0 %vm4390_vm0, %v4389_v0 }
0x14a2   :  { %v1685_v36 = vpop.f32.mrf.mxu0 }
0x14a3   :  { %v1686_v1 = vadd.f32 %v1685_v36, %v1645_v35 }
0x14a4   :  { %v3934_v37 = vpop.f32.mrf.mxu0 }
0x14a5   :  { %v1692_v57 = vadd.f32 %v1686_v1, %v1539_v15 }
0x14a6   :  { %v1688_v38 = vpop.f32.mrf.mxu0 }
0x14a7   :  { %v1689_v39 = vadd.f32 %v1688_v38, %v1645_v35  ;;  %v1695_v55 = vsel %vm65_vm1, %v1692_v57, 0.0 }
0x14a8   :  { %1696 = vadd.xlane.f32.xlu1 %v1695_v55  ;;  %v3935_v40 = vpop.f32.mrf.mxu0 }
0x14a9   :  { %v1693_v42 = vadd.f32 %v1689_v39, %v1540_v17 }
0x14ab   :  { %v1698_v43 = vsel %vm65_vm1, %v1693_v42, 0.0 }
0x14ac   :  { %1699 = vadd.xlane.f32.xlu0 %v1698_v43 }
0x14b9   :  { %1761 = vrot.lane.b32.xlu1 %v4203_v45, %s4399_s26 }
0x14bd   :  { %1721 = vrot.lane.b32.xlu1 %v3580_v3, %s4402_s29 }
0x1531   :  { %v1697_v48 = vpop.xlane.xlu1 %1696 }
0x1532   :  { %v1701_v2 = vmul.f32 0.03125, %v1697_v48  ;;  %v4381_v48 = vld [vmem:[%s5362_s2] sm:$0xff] }
0x1534   :  { %v1703_v51 = vsub.f32 %v1692_v57, %v1701_v2 }
0x1535   :  { %v1700_v52 = vpop.xlane.xlu0 %1699  ;;  %v1762_v59 = vpop.permute.xlu1 %1761 }
0x1536   :  { %v1702_v53 = vmul.f32 0.03125, %v1700_v52  ;;  %v1705_v16 = vmul.f32 %v1703_v51, %v1703_v51 }
0x1538   :  { %v1704_v54 = vsub.f32 %v1693_v42, %v1702_v53  ;;  %v1707_v7 = vsel %vm65_vm1, %v1705_v16, 0.0 }
0x1539   :  { %1708 = vadd.xlane.f32.xlu0 %v1707_v7  ;;  %v1722_v3 = vpop.permute.xlu1 %1721 }
0x153a   :  { %v1706_v56 = vmul.f32 %v1704_v54, %v1704_v54 }
0x153c   :  { %v1710_v49 = vsel %vm65_vm1, %v1706_v56, 0.0 }
0x153d   :  { %1711 = vadd.xlane.f32.xlu1 %v1710_v49 }
0x154e   :  { %1757 = vrot.lane.b32.xlu1 %v4208_v21, %s4399_s26 }
0x154f   :  { %1759 = vrot.lane.b32.xlu0 %v4205_v58, %s4399_s26 }
0x1553   :  { %1755 = vrot.lane.b32.xlu0 %v4206_v13, %s4399_s26 }
0x1557   :  { %1768 = vrot.lane.b32.xlu0 %v3589_v50, %s4392_s15 }
0x15c2   :  { %v1709_v60 = vpop.xlane.xlu0 %1708 }
0x15c3   :  { %v1713_v44 = vmul.f32 0.03125, %v1709_v60 }
0x15c5   :  { %v1715_v46 = vadd.f32 1e-05, %v1713_v44 }
0x15c6   :  { %v1712_v47 = vpop.xlane.xlu1 %1711  ;;  %v1760_v61 = vpop.permute.xlu0 %1759 }
0x15c7   :  { %4293 = vrsqrt.f32 %v1715_v46  ;;  %v1714_v63 = vmul.f32 0.03125, %v1712_v47  ;;  %v1765_v5 = vsel %vm1647_vm5, %v1760_v61, %v1762_v59 }
0x15c8   :  { %3937 = vmatpush3.bf16.msra.mxu1 %v1765_v5 }
0x15c9   :  { %v1716_v6 = vadd.f32 1e-05, %v1714_v63  ;;  %3938 = vmatprep.subr.bf16.mxu1 %v4389_v0 }
0x15ca   :  { %v1758_v8 = vpop.permute.xlu1 %1757  ;;  %v1756_v9 = vpop.permute.xlu0 %1755 }
0x15cb   :  { %4295 = vrsqrt.f32 %v1716_v6  ;;  %v1764_v4 = vsel %vm1647_vm5, %v1756_v9, %v1758_v8 }
0x15cc   :  { %3939 = vmatpush3.bf16.msra.mxu1 %v1764_v4 }
0x15cd   :  { %3944 = vmatprep.subr.bf16.mxu1 %v4389_v0 }
0x15ce   :  { %v1769_v23 = vpop.permute.xlu0 %1768 }
0x15d4   :  { %v4294_v10 = vpop.eup %4293 }
0x15d5   :  { %v1719_v62 = vmul.f32 %v4294_v10, %v1703_v51 }
0x15d7   :  { %v1724_v15 = vmul.f32 %v1722_v3, %v1719_v62 }
0x15d8   :  { %v4296_v11 = vpop.eup %4295 }
0x15d9   :  { %v1720_v12 = vmul.f32 %v4296_v11, %v1704_v54  ;;  %v4909_v18 = vadd.f32 %v3589_v50, %v1724_v15  ;;  %v4382_v54 = vld [vmem:[%s5362_s2 + $0x8] sm:$0xff] }
0x15db   :  { %v1725_v17 = vmul.f32 %v1722_v3, %v1720_v12 }
0x15dd   :  { %v4911_v19 = vadd.f32 %v3589_v50, %v1725_v17 }
0x15df   :  { %v1734_v20 = vpack.c.bf16 %v4911_v19, %v4909_v18 }
0x15e1   :  { %3941 = vmatmul.mubr.msk.bf16.vlgmr.msra.gmra.mxu1 %vm65_vm1, %v1734_v20 }
0x15e2   :  { %3946 = vmatprep.mubr.msk.bf16.mxu1 %vm4390_vm0, %v4389_v0 }
0x16a1   :  { %v1808_v22 = vpop.f32.mrf.mxu1 }
0x16a2   :  { %v1809_v14 = vadd.f32 %v1808_v22, %v1769_v23 }
0x16a3   :  { %v3942_v25 = vpop.f32.mrf.mxu1 }
0x16a5   :  { %v1811_v27 = vpop.f32.mrf.mxu1 }
0x16a6   :  { %v1812_v30 = vadd.f32 %v1811_v27, %v1769_v23 }
0x16a7   :  { %v3943_v31 = vpop.f32.mrf.mxu1 }
0x16a8   :  { %v4918_v32 = vpack.c.bf16 %v1812_v30, %v1809_v14 }
0x16aa   :  { %1947 = vrot.lane.b32.xlu0 %v4918_v32, %s4394_s17  ;;  %1822 = vrot.lane.b32.xlu1 %v4918_v32, %s4392_s15 }
0x16ae   :  { %2072 = vrot.lane.b32.xlu0 %v4918_v32, %s4393_s16  ;;  %1945 = vrot.lane.b32.xlu1 %v4918_v32, %s4391_s0 }
0x16b2   :  { %2197 = vrot.lane.b32.xlu0 %v4918_v32, %s4395_s18  ;;  %2070 = vrot.lane.b32.xlu1 %v4918_v32, %s4396_s19 }
0x16b6   :  { %2195 = vrot.lane.b32.xlu1 %v4918_v32, %s4397_s20 }
0x171c   :  { %v1823_v33 = vpop.permute.xlu1 %1822  ;;  %v1948_v35 = vpop.permute.xlu0 %1947 }
0x171d   :  { %v1828_v34 = vsel %vm114_vm2, %v1823_v33, 0  ;;  %v1953_v36 = vsel %vm114_vm2, %v1948_v35, 0 }
0x171e   :  { %3945 = vmatpush3.bf16.xpose.msra.mxu1 %v1828_v34 }
0x171f   :  { %3956 = vmatprep.subr.bf16.mxu1 %v4389_v0 }
0x1720   :  { %v2073_v1 = vpop.permute.xlu0 %2072  ;;  %v1946_v37 = vpop.permute.xlu1 %1945 }
0x1721   :  { %v2078_v57 = vsel %vm114_vm2, %v2073_v1, 0 }
0x1724   :  { %v2198_v38 = vpop.permute.xlu0 %2197  ;;  %v2071_v39 = vpop.permute.xlu1 %2070 }
0x1725   :  { %3947 = vmatmul.mubr.msk.bf16.vlgmr.msra.gmra.mxu1 %vm114_vm2, %v4918_v32  ;;  %v2203_v55 = vsel %vm114_vm2, %v2198_v38, 0 }
0x1726   :  { %3957 = vmatpush3.bf16.xpose.msra.mxu1 %v1953_v36  ;;  %3958 = vmatprep.mubr.msk.bf16.mxu1 %vm4390_vm0, %v4389_v0 }
0x1727   :  { %3968 = vmatprep.subr.bf16.mxu1 %v4389_v0 }
0x1728   :  { %v2196_v40 = vpop.permute.xlu1 %2195 }
0x172d   :  { %3959 = vmatmul.mubr.msk.bf16.vlgmr.msra.gmra.mxu1 %vm114_vm2, %v1946_v37 }
0x172e   :  { %3969 = vmatpush3.bf16.xpose.msra.mxu1 %v2078_v57  ;;  %3970 = vmatprep.mubr.msk.bf16.mxu1 %vm4390_vm0, %v4389_v0 }
0x172f   :  { %3980 = vmatprep.subr.bf16.mxu1 %v4389_v0 }
0x1735   :  { %3971 = vmatmul.mubr.msk.bf16.vlgmr.msra.gmra.mxu1 %vm114_vm2, %v2071_v39 }
0x1736   :  { %3981 = vmatpush3.bf16.xpose.msra.mxu1 %v2203_v55  ;;  %3982 = vmatprep.mubr.msk.bf16.mxu1 %vm4390_vm0, %v4389_v0 }
0x1737   :  { %3992 = vmatprep.subr.bf16.mxu1 %v4389_v0 }
0x173d   :  { %3983 = vmatmul.mubr.msk.bf16.vlgmr.msra.gmra.mxu1 %vm114_vm2, %v2196_v40 }
0x173e   :  { %3996 = vmatprep.mubr.msk.bf16.mxu1 %vm4390_vm0, %v4389_v0 }
0x17e5   :  { %v1864_v42 = vpop.f32.mrf.mxu1 }
0x17e6   :  { %v1871_v43 = vmul.f32 0.35355338, %v1864_v42 }
0x17e7   :  { %v3948_v45 = vpop.f32.mrf.mxu1 }
0x17e8   :  { %v1873_v2 = vadd.f32 %v4381_v48, %v1871_v43 }
0x17e9   :  { %v1867_v51 = vpop.f32.mrf.mxu1 }
0x17ea   :  { %v1872_v52 = vmul.f32 0.35355338, %v1867_v51  ;;  %v1875_v53 = vsel %vm166_vm3, %v1873_v2, -inf }
0x17eb   :  { %1876 = vmax.xlane.f32.xlu0 %v1875_v53  ;;  %v3949_v16 = vpop.f32.mrf.mxu1 }
0x17ec   :  { %v1874_v7 = vadd.f32 %v4382_v54, %v1872_v52 }
0x17ed   :  { %v1989_v56 = vpop.f32.mrf.mxu1 }
0x17ee   :  { %v1996_v49 = vmul.f32 0.35355338, %v1989_v56  ;;  %v1878_v21 = vsel %vm166_vm3, %v1874_v7, -inf }
0x17ef   :  { %1879 = vmax.xlane.f32.xlu1 %v1878_v21  ;;  %v3960_v58 = vpop.f32.mrf.mxu1 }
0x17f0   :  { %v1998_v13 = vadd.f32 %v4381_v48, %v1996_v49 }
0x17f1   :  { %v1992_v50 = vpop.f32.mrf.mxu1 }
0x17f2   :  { %v1997_v59 = vmul.f32 0.35355338, %v1992_v50  ;;  %v2000_v3 = vsel %vm166_vm3, %v1998_v13, -inf }
0x17f3   :  { %2001 = vmax.xlane.f32.xlu0 %v2000_v3  ;;  %v3961_v60 = vpop.f32.mrf.mxu1 }
0x17f4   :  { %v1999_v44 = vadd.f32 %v4382_v54, %v1997_v59 }
0x17f5   :  { %v2114_v46 = vpop.f32.mrf.mxu1 }
0x17f6   :  { %v2121_v47 = vmul.f32 0.35355338, %v2114_v46  ;;  %v2003_v61 = vsel %vm166_vm3, %v1999_v44, -inf }
0x17f7   :  { %2004 = vmax.xlane.f32.xlu0 %v2003_v61  ;;  %v3972_v63 = vpop.f32.mrf.mxu1 }
0x17f8   :  { %v2123_v5 = vadd.f32 %v4381_v48, %v2121_v47 }
0x17f9   :  { %v2117_v6 = vpop.f32.mrf.mxu1 }
0x17fa   :  { %v2122_v8 = vmul.f32 0.35355338, %v2117_v6  ;;  %v2125_v9 = vsel %vm166_vm3, %v2123_v5, -inf }
0x17fb   :  { %2126 = vmax.xlane.f32.xlu1 %v2125_v9  ;;  %v3973_v4 = vpop.f32.mrf.mxu1 }
0x17fc   :  { %v2124_v10 = vadd.f32 %v4382_v54, %v2122_v8 }
0x17fd   :  { %v2239_v62 = vpop.f32.mrf.mxu1 }
0x17fe   :  { %v2246_v11 = vmul.f32 0.35355338, %v2239_v62  ;;  %v2128_v12 = vsel %vm166_vm3, %v2124_v10, -inf }
0x17ff   :  { %2129 = vmax.xlane.f32.xlu0 %v2128_v12  ;;  %v3984_v15 = vpop.f32.mrf.mxu1 }
0x1800   :  { %v2248_v17 = vadd.f32 %v4381_v48, %v2246_v11 }
0x1801   :  { %v2242_v20 = vpop.f32.mrf.mxu1 }
0x1802   :  { %v2247_v22 = vmul.f32 0.35355338, %v2242_v20  ;;  %v2250_v23 = vsel %vm166_vm3, %v2248_v17, -inf }
0x1803   :  { %2251 = vmax.xlane.f32.xlu1 %v2250_v23  ;;  %v3985_v25 = vpop.f32.mrf.mxu1 }
0x1804   :  { %v2249_v27 = vadd.f32 %v4382_v54, %v2247_v22 }
0x1806   :  { %v2253_v14 = vsel %vm166_vm3, %v2249_v27, -inf }
0x1807   :  { %2254 = vmax.xlane.f32.xlu0 %v2253_v14 }
0x1814   :  { %1898 = vrot.lane.b32.xlu1 %v4918_v32, %s4399_s26 }
0x1874   :  { %v1877_v30 = vpop.xlane.xlu0 %1876 }
0x1875   :  { %v1881_v31 = vsub.f32 %v1873_v2, %v1877_v30 }
0x1877   :  { %v1883_v33 = vmul.f32 1.442695, %v1881_v31 }
0x1878   :  { %v1880_v34 = vpop.xlane.xlu1 %1879 }
0x1879   :  { %4297 = vpow2.f32 %v1883_v33  ;;  %v1882_v35 = vsub.f32 %v1874_v7, %v1880_v34 }
0x187b   :  { %v1885_v36 = vmul.f32 1.442695, %v1882_v35 }
0x187c   :  { %v2002_v1 = vpop.xlane.xlu0 %2001 }
0x187d   :  { %4299 = vpow2.f32 %v1885_v36  ;;  %v2006_v37 = vsub.f32 %v1998_v13, %v2002_v1 }
0x187f   :  { %v2008_v57 = vmul.f32 1.442695, %v2006_v37 }
0x1880   :  { %v2005_v38 = vpop.xlane.xlu0 %2004 }
0x1881   :  { %4301 = vpow2.f32 %v2008_v57  ;;  %v2007_v39 = vsub.f32 %v1999_v44, %v2005_v38 }
0x1883   :  { %v2010_v55 = vmul.f32 1.442695, %v2007_v39 }
0x1884   :  { %v2127_v40 = vpop.xlane.xlu1 %2126 }
0x1885   :  { %4303 = vpow2.f32 %v2010_v55  ;;  %v2131_v42 = vsub.f32 %v2123_v5, %v2127_v40 }
0x1886   :  { %v4298_v43 = vpop.eup %4297 }
0x1887   :  { %v2133_v45 = vmul.f32 1.442695, %v2131_v42  ;;  %v1887_v48 = vsel %vm166_vm3, %v4298_v43, 0.0 }
0x1888   :  { %v2130_v2 = vpop.xlane.xlu0 %2129  ;;  %1888 = vadd.xlane.f32.xlu1 %v1887_v48  ;;  %v5004_v48 = vld [vmem:[%s5359_s4 + $0x3c] ss:$24 sps:$4 sm:$0xff]  }
0x1889   :  { %4305 = vpow2.f32 %v2133_v45  ;;  %v2132_v51 = vsub.f32 %v2124_v10, %v2130_v2 }
0x188a   :  { %v4300_v52 = vpop.eup %4299 }
0x188b   :  { %v2135_v53 = vmul.f32 1.442695, %v2132_v51  ;;  %v1890_v16 = vsel %vm166_vm3, %v4300_v52, 0.0 }
0x188c   :  { %1891 = vadd.xlane.f32.xlu0 %v1890_v16  ;;  %v2252_v54 = vpop.xlane.xlu1 %2251 }
0x188d   :  { %4307 = vpow2.f32 %v2135_v53  ;;  %v2256_v7 = vsub.f32 %v2248_v17, %v2252_v54 }
0x188e   :  { %v4302_v56 = vpop.eup %4301 }
0x188f   :  { %v2258_v49 = vmul.f32 1.442695, %v2256_v7  ;;  %v2012_v21 = vsel %vm166_vm3, %v4302_v56, 0.0 }
0x1890   :  { %2013 = vadd.xlane.f32.xlu1 %v2012_v21  ;;  %v2255_v58 = vpop.xlane.xlu0 %2254  ;;  %v1899_v13 = vpop.permute.xlu1 %1898 }
0x1891   :  { %4309 = vpow2.f32 %v2258_v49  ;;  %v2257_v50 = vsub.f32 %v2249_v27, %v2255_v58  ;;  %3951 = vmatpush3.bf16.msra.mxu0 %v1899_v13 }
0x1892   :  { %v4304_v59 = vpop.eup %4303  ;;  %3962 = vmatprep.subr.bf16.mxu0 %v4389_v0 }
0x1893   :  { %v2260_v3 = vmul.f32 1.442695, %v2257_v50  ;;  %v2015_v60 = vsel %vm166_vm3, %v4304_v59, 0.0 }
0x1894   :  { %2016 = vadd.xlane.f32.xlu0 %v2015_v60  ;;  %v5014_v60 = vld [vmem:[%s5359_s4 + $0xc] ss:$24 sps:$4 sm:$0xff]  }
0x1895   :  { %4311 = vpow2.f32 %v2260_v3 }
0x1896   :  { %v4306_v44 = vpop.eup %4305 }
0x1897   :  { %v2137_v46 = vsel %vm166_vm3, %v4306_v44, 0.0 }
0x1898   :  { %2138 = vadd.xlane.f32.xlu1 %v2137_v46 }
0x189a   :  { %v4308_v47 = vpop.eup %4307 }
0x189b   :  { %v2140_v61 = vsel %vm166_vm3, %v4308_v47, 0.0 }
0x189c   :  { %2141 = vadd.xlane.f32.xlu0 %v2140_v61 }
0x189e   :  { %v4310_v63 = vpop.eup %4309 }
0x189f   :  { %v2262_v5 = vsel %vm166_vm3, %v4310_v63, 0.0 }
0x18a0   :  { %2263 = vadd.xlane.f32.xlu1 %v2262_v5 }
0x18a2   :  { %v4312_v6 = vpop.eup %4311 }
0x18a3   :  { %v2265_v8 = vsel %vm166_vm3, %v4312_v6, 0.0 }
0x18a4   :  { %2266 = vadd.xlane.f32.xlu0 %v2265_v8 }
0x18b1   :  { %2148 = vrot.lane.b32.xlu1 %v4918_v32, %s4400_s27 }
0x18b5   :  { %2273 = vrot.lane.b32.xlu1 %v4918_v32, %s4401_s28 }
0x18ba   :  { %2023 = vrot.lane.b32.xlu0 %v4918_v32, %s4398_s25 }
0x18be   :  { %2369 = vrot.lane.b32.xlu0 %v5004_v48, %s4392_s15 }
0x1911   :  { %v1889_v9 = vpop.xlane.xlu1 %1888 }
0x1912   :  { %4313 = vrcp.f32 %v1889_v9 }
0x1915   :  { %v1892_v4 = vpop.xlane.xlu0 %1891 }
0x1916   :  { %4315 = vrcp.f32 %v1892_v4 }
0x1919   :  { %v2014_v62 = vpop.xlane.xlu1 %2013 }
0x191d   :  { %v2017_v10 = vpop.xlane.xlu0 %2016 }
0x191e   :  { %4317 = vrcp.f32 %v2017_v10 }
0x191f   :  { %v4314_v11 = vpop.eup %4313  ;;  %4319 = vrcp.f32 %v2014_v62 }
0x1920   :  { %v1895_v15 = vmul.f32 %v4314_v11, %v4298_v43 }
0x1921   :  { %v2139_v22 = vpop.xlane.xlu1 %2138 }
0x1923   :  { %v4316_v12 = vpop.eup %4315 }
0x1924   :  { %v1896_v17 = vmul.f32 %v4316_v12, %v4300_v52 }
0x1925   :  { %v2142_v20 = vpop.xlane.xlu0 %2141 }
0x1926   :  { %v1897_v23 = vpack.c.bf16 %v1896_v17, %v1895_v15  ;;  %4321 = vrcp.f32 %v2142_v20 }
0x1927   :  { %4323 = vrcp.f32 %v2139_v22 }
0x1928   :  { %3953 = vmatmul.mubr.msk.bf16.vlgmr.msra.gmra.mxu0 %vm166_vm3, %v1897_v23 }
0x1929   :  { %3964 = vmatprep.mubr.msk.bf16.mxu0 %vm4390_vm0, %v4389_v0  ;;  %v2264_v14 = vpop.xlane.xlu1 %2263 }
0x192b   :  { %v4318_v32 = vpop.eup %4317 }
0x192c   :  { %v4320_v27 = vpop.eup %4319  ;;  %v2021_v30 = vmul.f32 %v4318_v32, %v4304_v59 }
0x192d   :  { %v2267_v25 = vpop.xlane.xlu0 %2266  ;;  %v2020_v33 = vmul.f32 %v4320_v27, %v4302_v56  ;;  %v2149_v36 = vpop.permute.xlu1 %2148 }
0x192e   :  { %4325 = vrcp.f32 %v2267_v25 }
0x192f   :  { %4327 = vrcp.f32 %v2264_v14  ;;  %v2022_v34 = vpack.c.bf16 %v2021_v30, %v2020_v33  ;;  %v3603_v14 = vld [vmem:[%s5361_s6 + $0x5] ss:$0 sm:$0xff] }
0x1931   :  { %v2024_v31 = vpop.permute.xlu0 %2023  ;;  %v2274_v55 = vpop.permute.xlu1 %2273 }
0x1932   :  { %3963 = vmatpush3.bf16.msra.mxu0 %v2024_v31 }
0x1933   :  { %3974 = vmatprep.subr.bf16.mxu0 %v4389_v0  ;;  %v4322_v35 = vpop.eup %4321 }
0x1934   :  { %v4324_v1 = vpop.eup %4323  ;;  %v2146_v37 = vmul.f32 %v4322_v35, %v4308_v47 }
0x1935   :  { %3965 = vmatmul.mubr.msk.bf16.vlgmr.msra.gmra.mxu0 %vm166_vm3, %v2022_v34  ;;  %v2145_v57 = vmul.f32 %v4324_v1, %v4306_v44  ;;  %v2370_v16 = vpop.permute.xlu0 %2369 }
0x1936   :  { %3975 = vmatpush3.bf16.msra.mxu0 %v2149_v36  ;;  %3976 = vmatprep.mubr.msk.bf16.mxu0 %vm4390_vm0, %v4389_v0 }
0x1937   :  { %3986 = vmatprep.subr.bf16.mxu0 %v4389_v0  ;;  %v2147_v38 = vpack.c.bf16 %v2146_v37, %v2145_v57  ;;  %3993 = vmatpush3.bf16.msra.mxu1 %v2370_v16 }
0x1938   :  { %3994 = vmatprep.subr.bf16.mxu1 %v4389_v0 }
0x193b   :  { %v4326_v39 = vpop.eup %4325 }
0x193c   :  { %v4328_v40 = vpop.eup %4327  ;;  %v2271_v42 = vmul.f32 %v4326_v39, %v4312_v6  ;;  %v4215_v39 = vld [vmem:[%s5359_s4 + $0x3c] ss:$24 sps:$4 sm:$0xff]  }
0x193d   :  { %3977 = vmatmul.mubr.msk.bf16.vlgmr.msra.gmra.mxu0 %vm166_vm3, %v2147_v38  ;;  %v2270_v43 = vmul.f32 %v4328_v40, %v4310_v63 }
0x193e   :  { %3987 = vmatpush3.bf16.msra.mxu0 %v2274_v55  ;;  %3988 = vmatprep.mubr.msk.bf16.mxu0 %vm4390_vm0, %v4389_v0 }
0x193f   :  { %4000 = vmatprep.subr.bf16.mxu0 %v4389_v0  ;;  %v2272_v45 = vpack.c.bf16 %v2271_v42, %v2270_v43 }
0x1945   :  { %3989 = vmatmul.mubr.msk.bf16.vlgmr.msra.gmra.mxu0 %vm166_vm3, %v2272_v45 }
0x1946   :  { %4004 = vmatprep.mubr.msk.bf16.mxu0 %vm4390_vm0, %v4389_v0 }
0x19e8   :  { %v1938_v2 = vpop.f32.mrf.mxu0 }
0x19ea   :  { %v3954_v51 = vpop.f32.mrf.mxu0 }
0x19ec   :  { %v1941_v52 = vpop.f32.mrf.mxu0 }
0x19ee   :  { %v3955_v53 = vpop.f32.mrf.mxu0 }
0x19f5   :  { %v2063_v54 = vpop.f32.mrf.mxu0 }
0x19f7   :  { %v3966_v7 = vpop.f32.mrf.mxu0 }
0x19f9   :  { %v2066_v56 = vpop.f32.mrf.mxu0 }
0x19fa   :  { %v4163_v49 = vpack.i.bf16 %v2066_v56, %v2063_v54 }
0x19fb   :  { %v3967_v21 = vpop.f32.mrf.mxu0 }
0x19fc   :  { %4164 = vrot.lane.b32.xlu1 %v4163_v49, %s4403_s30 }
0x19fd   :  { %v2188_v58 = vpop.f32.mrf.mxu0 }
0x19ff   :  { %v3978_v13 = vpop.f32.mrf.mxu0 }
0x1a01   :  { %v2191_v50 = vpop.f32.mrf.mxu0 }
0x1a02   :  { %v4168_v59 = vpack.i.bf16 %v2191_v50, %v2188_v58 }
0x1a03   :  { %v3979_v3 = vpop.f32.mrf.mxu0 }
0x1a04   :  { %4169 = vrot.lane.b32.xlu0 %v4168_v59, %s4404_s9 }
0x1a05   :  { %v2313_v44 = vpop.f32.mrf.mxu0 }
0x1a07   :  { %v3990_v46 = vpop.f32.mrf.mxu0 }
0x1a08   :  { %2367 = vrot.lane.b32.xlu0 %v5014_v60, %s4392_s15 }
0x1a09   :  { %v2316_v47 = vpop.f32.mrf.mxu0 }
0x1a0a   :  { %v4173_v61 = vpack.i.bf16 %v2316_v47, %v2313_v44 }
0x1a0b   :  { %v3991_v63 = vpop.f32.mrf.mxu0 }
0x1a0c   :  { %4174 = vrot.lane.b32.xlu1 %v4173_v61, %s4405_s10 }
0x1a6e   :  { %v4165_v6 = vpop.permute.xlu1 %4164 }
0x1a6f   :  { %v4167_v9 = vunpack.i.h.bf16 %v4165_v6  ;;  %v4166_v4 = vunpack.i.l.bf16 %v4165_v6 }
0x1a71   :  { %v2345_v12 = vsel %vm114_vm2, %v1941_v52, %v4167_v9  ;;  %v2344_v15 = vsel %vm114_vm2, %v1938_v2, %v4166_v4 }
0x1a76   :  { %v4170_v5 = vpop.permute.xlu0 %4169 }
0x1a77   :  { %v4172_v10 = vunpack.i.h.bf16 %v4170_v5  ;;  %v4171_v62 = vunpack.i.l.bf16 %v4170_v5 }
0x1a79   :  { %v2347_v22 = vsel %vm166_vm3, %v2345_v12, %v4172_v10  ;;  %v2346_v23 = vsel %vm166_vm3, %v2344_v15, %v4171_v62  ;;  %v5081_v12 = vld [vmem:[%s5361_s6 + $0x6] ss:$0 sm:$0xff] }
0x1a7a   :  { %v2368_v8 = vpop.permute.xlu0 %2367 }
0x1a7b   :  { %3995 = vmatpush3.bf16.msra.mxu1 %v2368_v8 }
0x1a7e   :  { %v4175_v11 = vpop.permute.xlu1 %4174 }
0x1a7f   :  { %v4177_v17 = vunpack.i.h.bf16 %v4175_v11  ;;  %v4176_v20 = vunpack.i.l.bf16 %v4175_v11 }
0x1a81   :  { %v2349_v32 = vsel %vm640_vm4, %v2347_v22, %v4177_v17  ;;  %v2348_v25 = vsel %vm640_vm4, %v2346_v23, %v4176_v20 }
0x1a82   :  { %v2350_v27 = vpack.c.bf16 %v2349_v32, %v2348_v25 }
0x1a84   :  { %3997 = vmatmul.mubr.msk.bf16.vlgmr.msra.gmra.mxu1 %vm65_vm1, %v2350_v27 }
0x1a85   :  { %4012 = vmatprep.mubr.msk.bf16.mxu1 %vm65_vm1, %v4632_v24  ;;  %v4211_v24 = vld [vmem:[%s5359_s4 + $0x40] ss:$24 sps:$4 sm:$0xff]  }
0x1b44   :  { %v2410_v30 = vpop.f32.mrf.mxu1 }
0x1b45   :  { %v2411_v31 = vadd.f32 %v3603_v14, %v2410_v30 }
0x1b46   :  { %v3998_v33 = vpop.f32.mrf.mxu1 }
0x1b47   :  { %v2417_v34 = vadd.f32 %v2411_v31, %v4909_v18  ;;  %v4213_v18 = vld [vmem:[%s5359_s4 + $0xc] ss:$24 sps:$4 sm:$0xff]  }
0x1b48   :  { %v2413_v35 = vpop.f32.mrf.mxu1 }
0x1b49   :  { %v2414_v36 = vadd.f32 %v3603_v14, %v2413_v35  ;;  %v2419_v1 = vsel %vm65_vm1, %v2417_v34, 0.0 }
0x1b4a   :  { %2420 = vadd.xlane.f32.xlu1 %v2419_v1  ;;  %v3999_v37 = vpop.f32.mrf.mxu1 }
0x1b4b   :  { %v2418_v57 = vadd.f32 %v2414_v36, %v4911_v19  ;;  %v4216_v19 = vld [vmem:[%s5359_s4 + $0x10] ss:$24 sps:$4 sm:$0xff]  }
0x1b4d   :  { %v2422_v38 = vsel %vm65_vm1, %v2418_v57, 0.0 }
0x1b4e   :  { %2423 = vadd.xlane.f32.xlu0 %v2422_v38 }
0x1b5b   :  { %2542 = vrot.lane.b32.xlu1 %v4211_v24, %s4402_s29 }
0x1b5f   :  { %2536 = vrot.lane.b32.xlu1 %v4213_v18, %s4402_s29 }
0x1b63   :  { %2458 = vrot.lane.b32.xlu1 %v5004_v48, %s4399_s26 }
0x1b64   :  { %2540 = vrot.lane.b32.xlu0 %v4215_v39, %s4402_s29 }
0x1b68   :  { %2538 = vrot.lane.b32.xlu0 %v4216_v19, %s4402_s29  ;;  %v5106_v19 = vld [vmem:[%s5364_s3] sm:$0xff] }
0x1bd3   :  { %v2421_v55 = vpop.xlane.xlu1 %2420 }
0x1bd4   :  { %v2425_v40 = vmul.f32 0.03125, %v2421_v55 }
0x1bd6   :  { %v2427_v42 = vsub.f32 %v2417_v34, %v2425_v40 }
0x1bd7   :  { %v2424_v43 = vpop.xlane.xlu0 %2423  ;;  %v2543_v45 = vpop.permute.xlu1 %2542 }
0x1bd8   :  { %v2426_v2 = vmul.f32 0.03125, %v2424_v43  ;;  %v2429_v51 = vmul.f32 %v2427_v42, %v2427_v42 }
0x1bda   :  { %v2428_v52 = vsub.f32 %v2418_v57, %v2426_v2  ;;  %v2431_v53 = vsel %vm65_vm1, %v2429_v51, 0.0  ;;  %v5113_v2 = vld [vmem:[%s5364_s3 + $0x8] sm:$0xff] }
0x1bdb   :  { %2432 = vadd.xlane.f32.xlu0 %v2431_v53  ;;  %v2541_v48 = vpop.permute.xlu0 %2540  ;;  %v2537_v16 = vpop.permute.xlu1 %2536 }
0x1bdc   :  { %v2430_v54 = vmul.f32 %v2428_v52, %v2428_v52  ;;  %v2546_v7 = vsel %vm65_vm1, %v2541_v48, %v2543_v45 }
0x1bdd   :  { %4008 = vmatprep.subr.bf16.mxu1 %v2546_v7 }
0x1bde   :  { %v2434_v56 = vsel %vm65_vm1, %v2430_v54, 0.0  ;;  %4009 = vmatpush3.bf16.msra.mxu1 %v2546_v7 }
0x1bdf   :  { %2435 = vadd.xlane.f32.xlu1 %v2434_v56  ;;  %v2539_v49 = vpop.permute.xlu0 %2538  ;;  %v2459_v21 = vpop.permute.xlu1 %2458 }
0x1be0   :  { %v2545_v58 = vsel %vm65_vm1, %v2537_v16, %v2539_v49  ;;  %4001 = vmatpush3.bf16.msra.mxu0 %v2459_v21 }
0x1be1   :  { %4010 = vmatprep.subr.bf16.mxu1 %v2545_v58  ;;  %4002 = vmatprep.subr.bf16.mxu0 %v4389_v0 }
0x1be2   :  { %4011 = vmatpush3.bf16.msra.mxu1 %v2545_v58 }
0x1be3   :  { %4024 = vmatprep.subr.bf16.mxu1 %v4389_v0 }
0x1be5   :  { %4013 = vmatmul.mubr.msk.bf16.vlgmr.msra.gmra.mxu1 %vm65_vm1, %v4659_v41 }
0x1be6   :  { %4028 = vmatprep.mubr.msk.bf16.mxu1 %vm4390_vm0, %v4389_v0 }
0x1bf0   :  { %2450 = vrot.lane.b32.xlu1 %v3603_v14, %s4399_s26 }
0x1bf1   :  { %2445 = vrot.lane.b32.xlu0 %v3603_v14, %s4392_s15 }
0x1bf4   :  { %2462 = vrot.lane.b32.xlu1 %v3603_v14, %s4402_s29 }
0x1bf5   :  { %2456 = vrot.lane.b32.xlu0 %v5014_v60, %s4399_s26 }
0x1c64   :  { %v2433_v13 = vpop.xlane.xlu0 %2432 }
0x1c65   :  { %v2437_v50 = vmul.f32 0.03125, %v2433_v13 }
0x1c67   :  { %v2439_v59 = vadd.f32 1e-05, %v2437_v50 }
0x1c68   :  { %v2436_v3 = vpop.xlane.xlu1 %2435  ;;  %v2446_v44 = vpop.permute.xlu0 %2445 }
0x1c69   :  { %4329 = vrsqrt.f32 %v2439_v59  ;;  %v2438_v46 = vmul.f32 0.03125, %v2436_v3 }
0x1c6b   :  { %v2440_v41 = vadd.f32 1e-05, %v2438_v46 }
0x1c6c   :  { %v2457_v47 = vpop.permute.xlu0 %2456  ;;  %v2451_v9 = vpop.permute.xlu1 %2450 }
0x1c6d   :  { %4331 = vrsqrt.f32 %v2440_v41  ;;  %4003 = vmatpush3.bf16.msra.mxu0 %v2457_v47 }
0x1c6e   :  { %4016 = vmatprep.subr.bf16.mxu0 %v4389_v0 }
0x1c70   :  { %v2463_v34 = vpop.permute.xlu1 %2462 }
0x1c76   :  { %v4330_v61 = vpop.eup %4329 }
0x1c77   :  { %v2443_v63 = vmul.f32 %v4330_v61, %v2427_v42 }
0x1c79   :  { %v2448_v8 = vmul.f32 %v2446_v44, %v2443_v63 }
0x1c7a   :  { %v4332_v5 = vpop.eup %4331 }
0x1c7b   :  { %v2444_v6 = vmul.f32 %v4332_v5, %v2428_v52  ;;  %v5069_v4 = vadd.f32 %v2451_v9, %v2448_v8 }
0x1c7d   :  { %v2449_v60 = vmul.f32 %v2446_v44, %v2444_v6 }
0x1c7f   :  { %v5071_v10 = vadd.f32 %v2451_v9, %v2449_v60 }
0x1c81   :  { %v2455_v62 = vpack.c.bf16 %v5071_v10, %v5069_v4 }
0x1c83   :  { %4005 = vmatmul.mubr.msk.bf16.vlgmr.msra.gmra.mxu0 %vm65_vm1, %v2455_v62 }
0x1c84   :  { %4020 = vmatprep.mubr.msk.bf16.mxu0 %vm4390_vm0, %v4389_v0 }
0x1ca5   :  { %v4014_v11 = vpop.f32.mrf.mxu1 }
0x1ca6   :  { %v2592_v17 = vadd.f32 %v4014_v11, %v5081_v12 }
0x1ca7   :  { %v2583_v15 = vpop.f32.mrf.mxu1 }
0x1ca8   :  { %v2584_v32 = vadd.f32 %v5081_v12, %v2583_v15 }
0x1ca9   :  { %v4015_v20 = vpop.f32.mrf.mxu1 }
0x1caa   :  { %v2595_v22 = vadd.f32 %v4015_v20, %v5081_v12 }
0x1cab   :  { %v2586_v23 = vpop.f32.mrf.mxu1 }
0x1cac   :  { %v5086_v25 = vpack.c.bf16 %v2595_v22, %v2592_v17  ;;  %v2587_v27 = vadd.f32 %v5081_v12, %v2586_v23 }
0x1cae   :  { %v2612_v14 = vsel %vm114_vm2, %v5086_v25, 0  ;;  %v5091_v30 = vpack.c.bf16 %v2587_v27, %v2584_v32 }
0x1caf   :  { %4017 = vmatpush3.bf16.xpose.msra.mxu0 %v2612_v14 }
0x1cb0   :  { %4018 = vmatprep.subr.bf16.mxu0 %v4389_v0  ;;  %v2609_v31 = vsel %vm114_vm2, %v5091_v30, 0 }
0x1cb7   :  { %4019 = vmatpush3.bf16.xpose.msra.mxu0 %v2609_v31 }
0x1cb8   :  { %4040 = vmatprep.subr.bf16.mxu0 %v4389_v0 }
0x1d43   :  { %v2502_v33 = vpop.f32.mrf.mxu0 }
0x1d44   :  { %v2503_v1 = vadd.f32 %v2502_v33, %v2463_v34 }
0x1d45   :  { %v4006_v35 = vpop.f32.mrf.mxu0 }
0x1d47   :  { %v2505_v36 = vpop.f32.mrf.mxu0 }
0x1d48   :  { %v2506_v37 = vadd.f32 %v2505_v36, %v2463_v34 }
0x1d49   :  { %v4007_v57 = vpop.f32.mrf.mxu0 }
0x1d4a   :  { %v5097_v38 = vpack.c.bf16 %v2506_v37, %v2503_v1 }
0x1d4c   :  { %4021 = vmatmul.mubr.msk.bf16.vlgmr.msra.gmra.mxu0 %vm114_vm2, %v5097_v38 }
0x1d4d   :  { %4044 = vmatprep.mubr.msk.bf16.mxu0 %vm4390_vm0, %v4389_v0 }
0x1e0c   :  { %v2648_v24 = vpop.f32.mrf.mxu0 }
0x1e0d   :  { %v2655_v18 = vmul.f32 0.35355338, %v2648_v24 }
0x1e0e   :  { %v4022_v39 = vpop.f32.mrf.mxu0 }
0x1e0f   :  { %v2657_v55 = vadd.f32 %v5106_v19, %v2655_v18 }
0x1e10   :  { %v2651_v40 = vpop.f32.mrf.mxu0 }
0x1e11   :  { %v2656_v42 = vmul.f32 0.35355338, %v2651_v40  ;;  %v2659_v43 = vsel %vm65_vm1, %v2657_v55, -inf }
0x1e12   :  { %2660 = vmax.xlane.f32.xlu0 %v2659_v43  ;;  %v4023_v45 = vpop.f32.mrf.mxu0 }
0x1e13   :  { %v2658_v51 = vadd.f32 %v5113_v2, %v2656_v42 }
0x1e15   :  { %v2662_v52 = vsel %vm65_vm1, %v2658_v51, -inf }
0x1e16   :  { %2663 = vmax.xlane.f32.xlu1 %v2662_v52 }
0x1e27   :  { %2686 = vrot.lane.b32.xlu1 %v5086_v25, %s4392_s15 }
0x1e2b   :  { %2739 = vrot.lane.b32.xlu1 %v5086_v25, %s4391_s0 }
0x1e2f   :  { %2737 = vrot.lane.b32.xlu1 %v5091_v30, %s4391_s0 }
0x1e9b   :  { %v2661_v53 = vpop.xlane.xlu0 %2660 }
0x1e9c   :  { %v2665_v48 = vsub.f32 %v2657_v55, %v2661_v53 }
0x1e9e   :  { %v2667_v16 = vmul.f32 1.442695, %v2665_v48 }
0x1e9f   :  { %v2664_v54 = vpop.xlane.xlu1 %2663 }
0x1ea0   :  { %4333 = vpow2.f32 %v2667_v16  ;;  %v2666_v7 = vsub.f32 %v2658_v51, %v2664_v54 }
0x1ea2   :  { %v2669_v56 = vmul.f32 1.442695, %v2666_v7 }
0x1ea3   :  { %v2687_v49 = vpop.permute.xlu1 %2686 }
0x1ea4   :  { %4335 = vpow2.f32 %v2669_v56  ;;  %4025 = vmatpush3.bf16.msra.mxu1 %v2687_v49 }
0x1ea5   :  { %4026 = vmatprep.subr.bf16.mxu1 %v4389_v0 }
0x1ea7   :  { %v2740_v5 = vpop.permute.xlu1 %2739 }
0x1ea8   :  { %v2748_v9 = vsel %vm114_vm2, %v2740_v5, 0 }
0x1eab   :  { %v2738_v60 = vpop.permute.xlu1 %2737 }
0x1eac   :  { %v2745_v62 = vsel %vm114_vm2, %v2738_v60, 0 }
0x1ead   :  { %v4334_v21 = vpop.eup %4333 }
0x1eae   :  { %v2671_v58 = vsel %vm65_vm1, %v4334_v21, 0.0 }
0x1eaf   :  { %2672 = vadd.xlane.f32.xlu0 %v2671_v58 }
0x1eb1   :  { %v4336_v13 = vpop.eup %4335 }
0x1eb2   :  { %v2674_v50 = vsel %vm65_vm1, %v4336_v13, 0.0 }
0x1eb3   :  { %2675 = vadd.xlane.f32.xlu0 %v2674_v50 }
0x1ec9   :  { %2684 = vrot.lane.b32.xlu0 %v5091_v30, %s4392_s15 }
0x1ecd   :  { %2735 = vrot.lane.b32.xlu0 %v5097_v38, %s4391_s0 }
0x1f38   :  { %v2673_v59 = vpop.xlane.xlu0 %2672 }
0x1f39   :  { %4337 = vrcp.f32 %v2673_v59 }
0x1f3c   :  { %v2676_v3 = vpop.xlane.xlu0 %2675 }
0x1f3d   :  { %4339 = vrcp.f32 %v2676_v3 }
0x1f40   :  { %v2685_v44 = vpop.permute.xlu0 %2684 }
0x1f41   :  { %4027 = vmatpush3.bf16.msra.mxu1 %v2685_v44 }
0x1f42   :  { %4032 = vmatprep.subr.bf16.mxu1 %v4389_v0 }
0x1f44   :  { %v2736_v11 = vpop.permute.xlu0 %2735 }
0x1f46   :  { %v4338_v46 = vpop.eup %4337 }
0x1f47   :  { %v2679_v41 = vmul.f32 %v4338_v46, %v4334_v21 }
0x1f49   :  { %v3527_v47 = vsel %vm65_vm1, %v2679_v41, 0.0 }
0x1f4a   :  { %v4340_v61 = vpop.eup %4339  ;;  %3535 = vst [vmem:[%s5366_s8] sm:$0xff] %v3527_v47 }
0x1f4b   :  { %v2680_v63 = vmul.f32 %v4340_v61, %v4336_v13 }
0x1f4d   :  { %v2681_v6 = vpack.c.bf16 %v2680_v63, %v2679_v41  ;;  %v3528_v8 = vsel %vm65_vm1, %v2680_v63, 0.0 }
0x1f4e   :  { %3536 = vst [vmem:[%s5366_s8 + $0x8] sm:$0xff] %v3528_v8 }
0x1f4f   :  { %4029 = vmatmul.mubr.msk.bf16.vlgmr.msra.gmra.mxu1 %vm65_vm1, %v2681_v6 }
0x1f50   :  { %4033 = vmatpush3.bf16.xpose.msra.mxu1 %v2748_v9  ;;  %4036 = vmatprep.mubr.msk.bf16.mxu1 %vm4390_vm0, %v4389_v0 }
0x1f51   :  { %4034 = vmatprep.subr.bf16.mxu1 %v4389_v0 }
0x1f58   :  { %4035 = vmatpush3.bf16.xpose.msra.mxu1 %v2745_v62 }
0x1f59   :  { %4056 = vmatprep.subr.bf16.mxu1 %v4389_v0 }
0x1f5f   :  { %4037 = vmatmul.mubr.msk.bf16.vlgmr.msra.gmra.mxu1 %vm114_vm2, %v2736_v11 }
0x1f60   :  { %4060 = vmatprep.mubr.msk.bf16.mxu1 %vm4390_vm0, %v4389_v0 }
0x200f   :  { %v5149_v15 = vpop.f32.mrf.mxu1 }
0x2011   :  { %v4030_v17 = vpop.f32.mrf.mxu1 }
0x2013   :  { %v5151_v20 = vpop.f32.mrf.mxu1 }
0x2015   :  { %v4031_v22 = vpop.f32.mrf.mxu1 }
0x201f   :  { %v2784_v23 = vpop.f32.mrf.mxu1 }
0x2020   :  { %v2791_v32 = vmul.f32 0.35355338, %v2784_v23 }
0x2021   :  { %v4038_v27 = vpop.f32.mrf.mxu1 }
0x2022   :  { %v2793_v14 = vadd.f32 %v5106_v19, %v2791_v32 }
0x2023   :  { %v2787_v31 = vpop.f32.mrf.mxu1 }
0x2024   :  { %v2792_v33 = vmul.f32 0.35355338, %v2787_v31  ;;  %v2795_v34 = vsel %vm65_vm1, %v2793_v14, -inf }
0x2025   :  { %2796 = vmax.xlane.f32.xlu1 %v2795_v34  ;;  %v4039_v35 = vpop.f32.mrf.mxu1 }
0x2026   :  { %v2794_v36 = vadd.f32 %v5113_v2, %v2792_v33 }
0x2028   :  { %v2798_v1 = vsel %vm65_vm1, %v2794_v36, -inf }
0x2029   :  { %2799 = vmax.xlane.f32.xlu0 %v2798_v1 }
0x2036   :  { %2818 = vrot.lane.b32.xlu1 %v5091_v30, %s4394_s17 }
0x20ae   :  { %v2797_v37 = vpop.xlane.xlu1 %2796 }
0x20af   :  { %v2801_v57 = vsub.f32 %v2793_v14, %v2797_v37 }
0x20b1   :  { %v2803_v24 = vmul.f32 1.442695, %v2801_v57 }
0x20b2   :  { %v2800_v18 = vpop.xlane.xlu0 %2799  ;;  %v2819_v51 = vpop.permute.xlu1 %2818 }
0x20b3   :  { %4341 = vpow2.f32 %v2803_v24  ;;  %v2802_v39 = vsub.f32 %v2794_v36, %v2800_v18 }
0x20b5   :  { %v2805_v55 = vmul.f32 1.442695, %v2802_v39 }
0x20b7   :  { %4343 = vpow2.f32 %v2805_v55 }
0x20c0   :  { %v4342_v40 = vpop.eup %4341 }
0x20c1   :  { %v2807_v42 = vsel %vm65_vm1, %v4342_v40, 0.0 }
0x20c2   :  { %2808 = vadd.xlane.f32.xlu0 %v2807_v42 }
0x20c4   :  { %v4344_v43 = vpop.eup %4343 }
0x20c5   :  { %v2810_v45 = vsel %vm65_vm1, %v4344_v43, 0.0 }
0x20c6   :  { %2811 = vadd.xlane.f32.xlu1 %v2810_v45 }
0x20d7   :  { %2872 = vrot.lane.b32.xlu1 %v5086_v25, %s4396_s19 }
0x20d8   :  { %2820 = vrot.lane.b32.xlu0 %v5086_v25, %s4394_s17 }
0x20db   :  { %2868 = vrot.lane.b32.xlu1 %v5097_v38, %s4396_s19 }
0x20dc   :  { %2870 = vrot.lane.b32.xlu0 %v5091_v30, %s4396_s19 }
0x214b   :  { %v2809_v52 = vpop.xlane.xlu0 %2808 }
0x214c   :  { %4345 = vrcp.f32 %v2809_v52 }
0x214f   :  { %v2812_v53 = vpop.xlane.xlu1 %2811  ;;  %v2821_v48 = vpop.permute.xlu0 %2820 }
0x2150   :  { %4347 = vrcp.f32 %v2812_v53  ;;  %4041 = vmatpush3.bf16.msra.mxu0 %v2821_v48 }
0x2151   :  { %4042 = vmatprep.subr.bf16.mxu0 %v4389_v0 }
0x2153   :  { %v2873_v21 = vpop.permute.xlu1 %2872  ;;  %v2871_v59 = vpop.permute.xlu0 %2870 }
0x2154   :  { %4043 = vmatpush3.bf16.msra.mxu0 %v2819_v51  ;;  %v2881_v50 = vsel %vm114_vm2, %v2873_v21, 0  ;;  %v2878_v3 = vsel %vm114_vm2, %v2871_v59, 0 }
0x2155   :  { %4048 = vmatprep.subr.bf16.mxu0 %v4389_v0 }
0x2157   :  { %v2869_v44 = vpop.permute.xlu1 %2868 }
0x2159   :  { %v4346_v16 = vpop.eup %4345 }
0x215a   :  { %v2815_v54 = vmul.f32 %v4346_v16, %v4342_v40 }
0x215c   :  { %v3529_v7 = vsel %vm65_vm1, %v2815_v54, 0.0 }
0x215d   :  { %v4348_v56 = vpop.eup %4347  ;;  %3537 = vst [vmem:[%s5366_s8 + $0x10] sm:$0xff] %v3529_v7 }
0x215e   :  { %v2816_v49 = vmul.f32 %v4348_v56, %v4344_v43 }
0x2160   :  { %v2817_v58 = vpack.c.bf16 %v2816_v49, %v2815_v54  ;;  %v3530_v13 = vsel %vm65_vm1, %v2816_v49, 0.0 }
0x2161   :  { %3538 = vst [vmem:[%s5366_s8 + $0x18] sm:$0xff] %v3530_v13 }
0x2162   :  { %4045 = vmatmul.mubr.msk.bf16.vlgmr.msra.gmra.mxu0 %vm65_vm1, %v2817_v58 }
0x2163   :  { %4049 = vmatpush3.bf16.xpose.msra.mxu0 %v2881_v50  ;;  %4052 = vmatprep.mubr.msk.bf16.mxu0 %vm4390_vm0, %v4389_v0 }
0x2164   :  { %4050 = vmatprep.subr.bf16.mxu0 %v4389_v0 }
0x216b   :  { %4051 = vmatpush3.bf16.xpose.msra.mxu0 %v2878_v3 }
0x216c   :  { %4072 = vmatprep.subr.bf16.mxu0 %v4389_v0 }
0x2172   :  { %4053 = vmatmul.mubr.msk.bf16.vlgmr.msra.gmra.mxu0 %vm114_vm2, %v2869_v44 }
0x2173   :  { %4076 = vmatprep.mubr.msk.bf16.mxu0 %vm4390_vm0, %v4389_v0 }
0x2222   :  { %v5189_v46 = vpop.f32.mrf.mxu0 }
0x2224   :  { %v4046_v41 = vpop.f32.mrf.mxu0 }
0x2226   :  { %v5191_v47 = vpop.f32.mrf.mxu0 }
0x2227   :  { %v4178_v61 = vpack.i.bf16 %v5191_v47, %v5189_v46 }
0x2228   :  { %v4047_v63 = vpop.f32.mrf.mxu0 }
0x2232   :  { %v2917_v5 = vpop.f32.mrf.mxu0 }
0x2233   :  { %v2924_v6 = vmul.f32 0.35355338, %v2917_v5 }
0x2234   :  { %v4054_v8 = vpop.f32.mrf.mxu0 }
0x2235   :  { %v2926_v9 = vadd.f32 %v5106_v19, %v2924_v6 }
0x2236   :  { %v2920_v60 = vpop.f32.mrf.mxu0 }
0x2237   :  { %v2925_v62 = vmul.f32 0.35355338, %v2920_v60  ;;  %v2928_v11 = vsel %vm65_vm1, %v2926_v9, -inf }
0x2238   :  { %2929 = vmax.xlane.f32.xlu0 %v2928_v11  ;;  %v4055_v17 = vpop.f32.mrf.mxu0 }
0x2239   :  { %v2927_v22 = vadd.f32 %v5113_v2, %v2925_v62 }
0x223b   :  { %v2931_v23 = vsel %vm65_vm1, %v2927_v22, -inf }
0x223c   :  { %2932 = vmax.xlane.f32.xlu1 %v2931_v23 }
0x224d   :  { %2953 = vrot.lane.b32.xlu1 %v5086_v25, %s4393_s16 }
0x2251   :  { %3005 = vrot.lane.b32.xlu1 %v5086_v25, %s4397_s20 }
0x2255   :  { %3003 = vrot.lane.b32.xlu1 %v5091_v30, %s4397_s20 }
0x22c1   :  { %v2930_v32 = vpop.xlane.xlu0 %2929 }
0x22c2   :  { %v2934_v27 = vsub.f32 %v2926_v9, %v2930_v32 }
0x22c4   :  { %v2936_v14 = vmul.f32 1.442695, %v2934_v27 }
0x22c5   :  { %v2933_v31 = vpop.xlane.xlu1 %2932 }
0x22c6   :  { %4349 = vpow2.f32 %v2936_v14  ;;  %v2935_v33 = vsub.f32 %v2927_v22, %v2933_v31 }
0x22c8   :  { %v2938_v34 = vmul.f32 1.442695, %v2935_v33 }
0x22c9   :  { %v2954_v35 = vpop.permute.xlu1 %2953 }
0x22ca   :  { %4351 = vpow2.f32 %v2938_v34  ;;  %4057 = vmatpush3.bf16.msra.mxu1 %v2954_v35 }
0x22cb   :  { %4058 = vmatprep.subr.bf16.mxu1 %v4389_v0 }
0x22cd   :  { %v3006_v51 = vpop.permute.xlu1 %3005 }
0x22ce   :  { %v3014_v53 = vsel %vm114_vm2, %v3006_v51, 0 }
0x22d1   :  { %v3004_v48 = vpop.permute.xlu1 %3003 }
0x22d2   :  { %v3011_v16 = vsel %vm114_vm2, %v3004_v48, 0 }
0x22d3   :  { %v4350_v36 = vpop.eup %4349 }
0x22d4   :  { %v2940_v1 = vsel %vm65_vm1, %v4350_v36, 0.0 }
0x22d5   :  { %2941 = vadd.xlane.f32.xlu0 %v2940_v1 }
0x22d7   :  { %v4352_v37 = vpop.eup %4351 }
0x22d8   :  { %v2943_v57 = vsel %vm65_vm1, %v4352_v37, 0.0 }
0x22d9   :  { %2944 = vadd.xlane.f32.xlu0 %v2943_v57 }
0x22ef   :  { %2951 = vrot.lane.b32.xlu0 %v5091_v30, %s4393_s16 }
0x22f3   :  { %3001 = vrot.lane.b32.xlu0 %v5097_v38, %s4397_s20 }
0x235e   :  { %v2942_v24 = vpop.xlane.xlu0 %2941 }
0x235f   :  { %4353 = vrcp.f32 %v2942_v24 }
0x2362   :  { %v2945_v18 = vpop.xlane.xlu0 %2944 }
0x2363   :  { %4355 = vrcp.f32 %v2945_v18 }
0x2366   :  { %v2952_v39 = vpop.permute.xlu0 %2951 }
0x2367   :  { %4059 = vmatpush3.bf16.msra.mxu1 %v2952_v39 }
0x2368   :  { %4064 = vmatprep.subr.bf16.mxu1 %v4389_v0 }
0x236a   :  { %v3002_v54 = vpop.permute.xlu0 %3001 }
0x236c   :  { %v4354_v55 = vpop.eup %4353 }
0x236d   :  { %v2948_v40 = vmul.f32 %v4354_v55, %v4350_v36 }
0x236f   :  { %v3531_v42 = vsel %vm65_vm1, %v2948_v40, 0.0 }
0x2370   :  { %v4356_v43 = vpop.eup %4355  ;;  %3539 = vst [vmem:[%s5366_s8 + $0x20] sm:$0xff] %v3531_v42 }
0x2371   :  { %v2949_v45 = vmul.f32 %v4356_v43, %v4352_v37  ;;  %v4218_v37 = vld [vmem:[%s5359_s4 + $0x10] ss:$24 sps:$4 sm:$0xff]  }
0x2373   :  { %v2950_v38 = vpack.c.bf16 %v2949_v45, %v2948_v40  ;;  %v3532_v52 = vsel %vm65_vm1, %v2949_v45, 0.0 }
0x2374   :  { %3540 = vst [vmem:[%s5366_s8 + $0x28] sm:$0xff] %v3532_v52 }
0x2375   :  { %4061 = vmatmul.mubr.msk.bf16.vlgmr.msra.gmra.mxu1 %vm65_vm1, %v2950_v38 }
0x2376   :  { %4065 = vmatpush3.bf16.xpose.msra.mxu1 %v3014_v53  ;;  %4068 = vmatprep.mubr.msk.bf16.mxu1 %vm4390_vm0, %v4389_v0 }
0x2377   :  { %4066 = vmatprep.subr.bf16.mxu1 %v4389_v0 }
0x237e   :  { %4067 = vmatpush3.bf16.xpose.msra.mxu1 %v3011_v16 }
0x237f   :  { %4088 = vmatprep.subr.bf16.mxu1 %v4389_v0 }
0x2385   :  { %4069 = vmatmul.mubr.msk.bf16.vlgmr.msra.gmra.mxu1 %vm114_vm2, %v3002_v54 }
0x2386   :  { %4092 = vmatprep.mubr.msk.bf16.mxu1 %vm4390_vm0, %v4389_v0 }
0x2435   :  { %v2994_v7 = vpop.f32.mrf.mxu1 }
0x2437   :  { %v4062_v56 = vpop.f32.mrf.mxu1 }
0x2439   :  { %v2997_v49 = vpop.f32.mrf.mxu1 }
0x243a   :  { %v4183_v21 = vpack.i.bf16 %v2997_v49, %v2994_v7 }
0x243b   :  { %v4063_v58 = vpop.f32.mrf.mxu1 }
0x2445   :  { %v3050_v13 = vpop.f32.mrf.mxu1 }
0x2446   :  { %v3057_v50 = vmul.f32 0.35355338, %v3050_v13 }
0x2447   :  { %v4070_v59 = vpop.f32.mrf.mxu1 }
0x2448   :  { %v3059_v3 = vadd.f32 %v5106_v19, %v3057_v50 }
0x2449   :  { %v3053_v44 = vpop.f32.mrf.mxu1 }
0x244a   :  { %v3058_v41 = vmul.f32 0.35355338, %v3053_v44  ;;  %v3061_v63 = vsel %vm65_vm1, %v3059_v3, -inf }
0x244b   :  { %3062 = vmax.xlane.f32.xlu1 %v3061_v63  ;;  %v4071_v5 = vpop.f32.mrf.mxu1 }
0x244c   :  { %v3060_v6 = vadd.f32 %v5113_v2, %v3058_v41  ;;  %v5242_v2 = vld [vmem:[%s5359_s4 + $0x40] ss:$24 sps:$4 sm:$0xff]  }
0x244e   :  { %v3064_v8 = vsel %vm65_vm1, %v3060_v6, -inf }
0x244f   :  { %3065 = vmax.xlane.f32.xlu0 %v3064_v8 }
0x24d4   :  { %v3063_v9 = vpop.xlane.xlu1 %3062 }
0x24d5   :  { %v3067_v60 = vsub.f32 %v3059_v3, %v3063_v9 }
0x24d7   :  { %v3069_v62 = vmul.f32 1.442695, %v3067_v60 }
0x24d8   :  { %v3066_v11 = vpop.xlane.xlu0 %3065 }
0x24d9   :  { %4357 = vpow2.f32 %v3069_v62  ;;  %v3068_v17 = vsub.f32 %v3060_v6, %v3066_v11 }
0x24db   :  { %v3071_v22 = vmul.f32 1.442695, %v3068_v17 }
0x24dd   :  { %4359 = vpow2.f32 %v3071_v22 }
0x24e6   :  { %v4358_v19 = vpop.eup %4357 }
0x24e7   :  { %v3073_v23 = vsel %vm65_vm1, %v4358_v19, 0.0 }
0x24e8   :  { %3074 = vadd.xlane.f32.xlu0 %v3073_v23 }
0x24ea   :  { %v4360_v32 = vpop.eup %4359 }
0x24eb   :  { %v3076_v27 = vsel %vm65_vm1, %v4360_v32, 0.0 }
0x24ec   :  { %3077 = vadd.xlane.f32.xlu1 %v3076_v27  ;;  %v4387_v27 = vld [vmem:[%s5365_s5 + $0x8] sm:$0xff]  }
0x24fd   :  { %3084 = vrot.lane.b32.xlu1 %v5091_v30, %s4395_s18 }
0x24fe   :  { %3086 = vrot.lane.b32.xlu0 %v5086_v25, %s4395_s18 }
0x2501   :  { %3177 = vrot.lane.b32.xlu1 %v5242_v2, %s4392_s15 }
0x2502   :  { %4179 = vrot.lane.b32.xlu0 %v4178_v61, %s4403_s30 }
0x2505   :  { %4184 = vrot.lane.b32.xlu1 %v4183_v21, %s4404_s9 }
0x2509   :  { %3175 = vrot.lane.b32.xlu1 %v4218_v37, %s4392_s15 }
0x2571   :  { %v3075_v14 = vpop.xlane.xlu0 %3074 }
0x2572   :  { %4361 = vrcp.f32 %v3075_v14  ;;  %v4388_v14 = vld [vmem:[%s5365_s5] sm:$0xff]  }
0x2575   :  { %v3078_v30 = vpop.xlane.xlu1 %3077  ;;  %v3087_v31 = vpop.permute.xlu0 %3086 }
0x2576   :  { %4363 = vrcp.f32 %v3078_v30  ;;  %4073 = vmatpush3.bf16.msra.mxu0 %v3087_v31 }
0x2577   :  { %4074 = vmatprep.subr.bf16.mxu0 %v4389_v0 }
0x2579   :  { %v3085_v33 = vpop.permute.xlu1 %3084  ;;  %v4180_v43 = vpop.permute.xlu0 %4179 }
0x257a   :  { %4075 = vmatpush3.bf16.msra.mxu0 %v3085_v33  ;;  %v4182_v45 = vunpack.i.h.bf16 %v4180_v43  ;;  %v4181_v51 = vunpack.i.l.bf16 %v4180_v43 }
0x257b   :  { %4080 = vmatprep.subr.bf16.mxu0 %v4389_v0 }
0x257c   :  { %v3159_v48 = vsel %vm114_vm2, %v5151_v20, %v4182_v45  ;;  %v3158_v16 = vsel %vm114_vm2, %v5149_v15, %v4181_v51 }
0x257d   :  { %v3178_v1 = vpop.permute.xlu1 %3177 }
0x257f   :  { %v4362_v25 = vpop.eup %4361 }
0x2580   :  { %v3081_v34 = vmul.f32 %v4362_v25, %v4358_v19 }
0x2581   :  { %v4185_v57 = vpop.permute.xlu1 %4184 }
0x2582   :  { %v3533_v35 = vsel %vm65_vm1, %v3081_v34, 0.0  ;;  %v4187_v38 = vunpack.i.h.bf16 %v4185_v57  ;;  %v4186_v52 = vunpack.i.l.bf16 %v4185_v57 }
0x2583   :  { %v4364_v46 = vpop.eup %4363  ;;  %3541 = vst [vmem:[%s5366_s8 + $0x30] sm:$0xff] %v3533_v35 }
0x2584   :  { %v3082_v47 = vmul.f32 %v4364_v46, %v4360_v32  ;;  %v3160_v56 = vsel %vm166_vm3, %v3158_v16, %v4186_v52  ;;  %v3161_v49 = vsel %vm166_vm3, %v3159_v48, %v4187_v38 }
0x2585   :  { %v3176_v24 = vpop.permute.xlu1 %3175 }
0x2586   :  { %v3083_v61 = vpack.c.bf16 %v3082_v47, %v3081_v34  ;;  %v3534_v36 = vsel %vm65_vm1, %v3082_v47, 0.0 }
0x2587   :  { %3542 = vst [vmem:[%s5366_s8 + $0x38] sm:$0xff] %v3534_v36 }
0x2588   :  { %4077 = vmatmul.mubr.msk.bf16.vlgmr.msra.gmra.mxu0 %vm65_vm1, %v3083_v61 }
0x2589   :  { %4081 = vmatpush3.bf16.msra.mxu0 %v3178_v1  ;;  %4084 = vmatprep.mubr.msk.bf16.mxu0 %vm4390_vm0, %v4389_v0 }
0x258a   :  { %4082 = vmatprep.subr.bf16.mxu0 %v4389_v0 }
0x258d   :  { %4083 = vmatpush3.bf16.msra.mxu0 %v3176_v24 }
0x258e   :  { %4096 = vmatprep.subr.bf16.mxu0 %v4389_v0 }
0x2648   :  { %v3127_v18 = vpop.f32.mrf.mxu0 }
0x264a   :  { %v4078_v39 = vpop.f32.mrf.mxu0 }
0x264c   :  { %v3130_v55 = vpop.f32.mrf.mxu0 }
0x264d   :  { %v4188_v40 = vpack.i.bf16 %v3130_v55, %v3127_v18 }
0x264e   :  { %v4079_v42 = vpop.f32.mrf.mxu0 }
0x264f   :  { %4189 = vrot.lane.b32.xlu0 %v4188_v40, %s4405_s10 }
0x2653   :  { %3181 = vrot.lane.b32.xlu0 %v5081_v12, %s4399_s26 }
0x26c1   :  { %v4190_v53 = vpop.permute.xlu0 %4189 }
0x26c2   :  { %v4192_v54 = vunpack.i.h.bf16 %v4190_v53  ;;  %v4191_v7 = vunpack.i.l.bf16 %v4190_v53 }
0x26c4   :  { %v3163_v21 = vsel %vm640_vm4, %v3161_v49, %v4192_v54  ;;  %v3162_v58 = vsel %vm640_vm4, %v3160_v56, %v4191_v7 }
0x26c5   :  { %v3164_v13 = vpack.c.bf16 %v3163_v21, %v3162_v58  ;;  %v3182_v20 = vpop.permute.xlu0 %3181 }
0x26c7   :  { %4085 = vmatmul.mubr.msk.bf16.vlgmr.msra.gmra.mxu0 %vm65_vm1, %v3164_v13 }
0x26c8   :  { %4104 = vmatprep.mubr.msk.bf16.mxu0 %vm4390_vm0, %v4389_v0 }
0x2787   :  { %v3221_v50 = vpop.f32.mrf.mxu0 }
0x2788   :  { %v3222_v59 = vadd.f32 %v3221_v50, %v3182_v20 }
0x2789   :  { %v4086_v15 = vpop.f32.mrf.mxu0 }
0x278a   :  { %v3228_v3 = vadd.f32 %v3222_v59, %v5069_v4 }
0x278b   :  { %v3224_v44 = vpop.f32.mrf.mxu0 }
0x278c   :  { %v3225_v41 = vadd.f32 %v3224_v44, %v3182_v20  ;;  %v3231_v63 = vsel %vm65_vm1, %v3228_v3, 0.0 }
0x278d   :  { %3232 = vadd.xlane.f32.xlu1 %v3231_v63  ;;  %v4087_v5 = vpop.f32.mrf.mxu0 }
0x278e   :  { %v3229_v6 = vadd.f32 %v3225_v41, %v5071_v10  ;;  %v4385_v10 = vld [vmem:[%s5365_s5 + $0x10] sm:$0xff]  }
0x2790   :  { %v3234_v8 = vsel %vm65_vm1, %v3229_v6, 0.0 }
0x2791   :  { %3235 = vadd.xlane.f32.xlu0 %v3234_v8 }
0x279e   :  { %3257 = vrot.lane.b32.xlu1 %v5081_v12, %s4402_s29  ;;  %v4386_v12 = vld [vmem:[%s5365_s5 + $0x18] sm:$0xff]  }
0x2816   :  { %v3233_v9 = vpop.xlane.xlu1 %3232 }
0x2817   :  { %v3237_v60 = vmul.f32 0.03125, %v3233_v9 }
0x2819   :  { %v3239_v62 = vsub.f32 %v3228_v3, %v3237_v60 }
0x281a   :  { %v3236_v11 = vpop.xlane.xlu0 %3235  ;;  %v3258_v30 = vpop.permute.xlu1 %3257 }
0x281b   :  { %v3238_v17 = vmul.f32 0.03125, %v3236_v11  ;;  %v3241_v4 = vmul.f32 %v3239_v62, %v3239_v62 }
0x281d   :  { %v3240_v22 = vsub.f32 %v3229_v6, %v3238_v17  ;;  %v3243_v19 = vsel %vm65_vm1, %v3241_v4, 0.0  ;;  %v3629_v6 = vld [vmem:[%s5361_s6 + $0x8] ss:$0 sm:$0xff] }
0x281e   :  { %3244 = vadd.xlane.f32.xlu0 %v3243_v19 }
0x281f   :  { %v3242_v23 = vmul.f32 %v3240_v22, %v3240_v22 }
0x2821   :  { %v3246_v32 = vsel %vm65_vm1, %v3242_v23, 0.0 }
0x2822   :  { %3247 = vadd.xlane.f32.xlu1 %v3246_v32  ;;  %v4219_v32 = vld [vmem:[%s5359_s4 + $0x44] ss:$24 sps:$4 sm:$0xff]  }
0x2833   :  { %3271 = vrot.lane.b32.xlu1 %v4218_v37, %s4399_s26 }
0x2834   :  { %3273 = vrot.lane.b32.xlu0 %v5242_v2, %s4399_s26  ;;  %v3626_v2 = vld [vmem:[%s5361_s6 + $0x7] ss:$0 sm:$0xff] }
0x2837   :  { %3331 = vrot.lane.b32.xlu1 %v4385_v10, %s4392_s15  ;;  %v4220_v10 = vld [vmem:[%s5359_s4 + $0x14] ss:$24 sps:$4 sm:$0xff]  }
0x2838   :  { %3333 = vrot.lane.b32.xlu0 %v4386_v12, %s4392_s15  ;;  %v3433_v12 = vld [vmem:[%s5361_s6 + $0x8] sm:$0x3] }
0x283b   :  { %3277 = vrot.lane.b32.xlu1 %v3626_v2, %s4392_s15 }
0x283c   :  { %3329 = vrot.lane.b32.xlu0 %v4387_v27, %s4392_s15  ;;  %v3442_v27 = vrot.slane %v3433_v12, %v812_v29 }
0x283f   :  { %3339 = vrot.lane.b32.xlu1 %v3626_v2, %s4402_s29 }
0x2840   :  { %3327 = vrot.lane.b32.xlu0 %v4388_v14, %s4392_s15 }
0x28a7   :  { %v3245_v31 = vpop.xlane.xlu0 %3244 }
0x28a8   :  { %v3249_v33 = vmul.f32 0.03125, %v3245_v31 }
0x28aa   :  { %v3251_v25 = vadd.f32 1e-05, %v3249_v33 }
0x28ab   :  { %v3248_v34 = vpop.xlane.xlu1 %3247  ;;  %v3274_v35 = vpop.permute.xlu0 %3273 }
0x28ac   :  { %4365 = vrsqrt.f32 %v3251_v25  ;;  %v3250_v46 = vmul.f32 0.03125, %v3248_v34  ;;  %4089 = vmatpush3.bf16.msra.mxu1 %v3274_v35 }
0x28ad   :  { %4090 = vmatprep.subr.bf16.mxu1 %v4389_v0 }
0x28ae   :  { %v3252_v47 = vadd.f32 1e-05, %v3250_v46 }
0x28af   :  { %v3272_v61 = vpop.permute.xlu1 %3271  ;;  %v3334_v36 = vpop.permute.xlu0 %3333 }
0x28b0   :  { %4367 = vrsqrt.f32 %v3252_v47  ;;  %4091 = vmatpush3.bf16.msra.mxu1 %v3272_v61  ;;  %4097 = vmatpush3.bf16.msra.mxu0 %v3334_v36 }
0x28b1   :  { %4098 = vmatprep.subr.bf16.mxu0 %v4389_v0  ;;  %4108 = vmatprep.subr.bf16.mxu1 %v4389_v0 }
0x28b3   :  { %v3332_v1 = vpop.permute.xlu1 %3331  ;;  %v3330_v45 = vpop.permute.xlu0 %3329 }
0x28b4   :  { %4099 = vmatpush3.bf16.msra.mxu0 %v3332_v1 }
0x28b5   :  { %4100 = vmatprep.subr.bf16.mxu0 %v4389_v0 }
0x28b7   :  { %v3328_v51 = vpop.permute.xlu0 %3327  ;;  %v3278_v38 = vpop.permute.xlu1 %3277 }
0x28b8   :  { %4101 = vmatpush3.bf16.msra.mxu0 %v3330_v45 }
0x28b9   :  { %v4366_v37 = vpop.eup %4365  ;;  %4102 = vmatprep.subr.bf16.mxu0 %v4389_v0 }
0x28ba   :  { %v3255_v57 = vmul.f32 %v4366_v37, %v3239_v62 }
0x28bb   :  { %v3340_v58 = vpop.permute.xlu1 %3339 }
0x28bc   :  { %v3260_v39 = vmul.f32 %v3258_v30, %v3255_v57  ;;  %4103 = vmatpush3.bf16.msra.mxu0 %v3328_v51 }
0x28bd   :  { %v4368_v24 = vpop.eup %4367 }
0x28be   :  { %v3256_v18 = vmul.f32 %v4368_v24, %v3240_v22  ;;  %v3268_v40 = vadd.f32 %v3626_v2, %v3260_v39 }
0x28c0   :  { %v3261_v55 = vmul.f32 %v3258_v30, %v3256_v18 }
0x28c2   :  { %v3269_v42 = vadd.f32 %v3626_v2, %v3261_v55  ;;  %v3438_v2 = vrot.slane %v3433_v12, %v808_v28 }
0x28c4   :  { %v3270_v43 = vpack.c.bf16 %v3269_v42, %v3268_v40 }
0x28c6   :  { %4093 = vmatmul.mubr.msk.bf16.vlgmr.msra.gmra.mxu1 %vm65_vm1, %v3270_v43 }
0x28c7   :  { %4112 = vmatprep.mubr.msk.bf16.mxu1 %vm4390_vm0, %v4389_v0  ;;  %4109 = vmatpush3.bf16.msra.mxu1 %v4219_v32 }
0x28c8   :  { %4110 = vmatprep.subr.bf16.mxu1 %v4389_v0 }
0x28cb   :  { %4111 = vmatpush3.bf16.msra.mxu1 %v4220_v10 }
0x2986   :  { %v3317_v52 = vpop.f32.mrf.mxu1 }
0x2987   :  { %v3318_v48 = vadd.f32 %v3317_v52, %v3278_v38 }
0x2988   :  { %v4094_v53 = vpop.f32.mrf.mxu1 }
0x2989   :  { %v3324_v56 = vmax.f32 %v3318_v48, 0.0 }
0x298a   :  { %v3320_v16 = vpop.f32.mrf.mxu1 }
0x298b   :  { %v3321_v54 = vadd.f32 %v3320_v16, %v3278_v38 }
0x298c   :  { %v4095_v7 = vpop.f32.mrf.mxu1 }
0x298d   :  { %v3325_v49 = vmax.f32 %v3321_v54, 0.0 }
0x298f   :  { %v3326_v21 = vpack.c.bf16 %v3325_v49, %v3324_v56 }
0x2991   :  { %4105 = vmatmul.mubr.msk.bf16.vlgmr.msra.gmra.mxu0 %vm1647_vm5, %v3326_v21 }
0x2a51   :  { %v3379_v13 = vpop.f32.mrf.mxu0 }
0x2a52   :  { %v3380_v20 = vadd.f32 %v3379_v13, %v3340_v58 }
0x2a53   :  { %v4106_v50 = vpop.f32.mrf.mxu0 }
0x2a54   :  { %v3386_v59 = vadd.f32 %v3380_v20, %v3268_v40 }
0x2a55   :  { %v3382_v15 = vpop.f32.mrf.mxu0 }
0x2a56   :  { %v3383_v3 = vadd.f32 %v3382_v15, %v3340_v58  ;;  %v3389_v44 = vsel %vm65_vm1, %v3386_v59, 0.0 }
0x2a57   :  { %3390 = vadd.xlane.f32.xlu0 %v3389_v44  ;;  %v4107_v41 = vpop.f32.mrf.mxu0 }
0x2a58   :  { %v3387_v63 = vadd.f32 %v3383_v3, %v3269_v42 }
0x2a5a   :  { %v3392_v5 = vsel %vm65_vm1, %v3387_v63, 0.0 }
0x2a5b   :  { %3393 = vadd.xlane.f32.xlu1 %v3392_v5 }
0x2a6c   :  { %3423 = vrot.lane.b32.xlu1 %v3629_v6, %s4392_s15 }
0x2a70   :  { %3457 = vrot.lane.b32.xlu1 %v3442_v27, %s4399_s26 }
0x2ae0   :  { %v3391_v8 = vpop.xlane.xlu0 %3390 }
0x2ae1   :  { %v3395_v9 = vmul.f32 0.03125, %v3391_v8 }
0x2ae3   :  { %v3397_v60 = vsub.f32 %v3386_v59, %v3395_v9 }
0x2ae4   :  { %v3394_v62 = vpop.xlane.xlu1 %3393 }
0x2ae5   :  { %v3396_v11 = vmul.f32 0.03125, %v3394_v62  ;;  %v3399_v17 = vmul.f32 %v3397_v60, %v3397_v60 }
0x2ae7   :  { %v3398_v4 = vsub.f32 %v3387_v63, %v3396_v11  ;;  %v3401_v22 = vsel %vm65_vm1, %v3399_v17, 0.0 }
0x2ae8   :  { %3402 = vadd.xlane.f32.xlu0 %v3401_v22  ;;  %v3424_v61 = vpop.permute.xlu1 %3423 }
0x2ae9   :  { %v3400_v19 = vmul.f32 %v3398_v4, %v3398_v4 }
0x2aeb   :  { %v3404_v23 = vsel %vm65_vm1, %v3400_v19, 0.0 }
0x2aec   :  { %3405 = vadd.xlane.f32.xlu0 %v3404_v23  ;;  %v3458_v57 = vpop.permute.xlu1 %3457 }
0x2b02   :  { %3455 = vrot.lane.b32.xlu0 %v3438_v2, %s4399_s26 }
0x2b71   :  { %v3403_v0 = vpop.xlane.xlu0 %3402 }
0x2b72   :  { %v3407_v14 = vmul.f32 0.03125, %v3403_v0 }
0x2b74   :  { %v3409_v30 = vadd.f32 1e-05, %v3407_v14 }
0x2b75   :  { %v3406_v31 = vpop.xlane.xlu0 %3405 }
0x2b76   :  { %4369 = vrsqrt.f32 %v3409_v30  ;;  %v3408_v33 = vmul.f32 0.03125, %v3406_v31 }
0x2b78   :  { %v3410_v25 = vadd.f32 1e-05, %v3408_v33 }
0x2b79   :  { %v3456_v37 = vpop.permute.xlu0 %3455 }
0x2b7a   :  { %4371 = vrsqrt.f32 %v3410_v25  ;;  %v3459_v24 = vsel %vm1647_vm5, %v3456_v37, %v3458_v57 }
0x2b83   :  { %v4370_v34 = vpop.eup %4369 }
0x2b84   :  { %v3413_v35 = vmul.f32 %v4370_v34, %v3397_v60 }
0x2b86   :  { %v3421_v29 = vmul.f32 %v3629_v6, %v3413_v35 }
0x2b87   :  { %v4372_v46 = vpop.eup %4371 }
0x2b88   :  { %v3414_v47 = vmul.f32 %v4372_v46, %v3398_v4  ;;  %v3426_v28 = vadd.f32 %v3424_v61, %v3421_v29 }
0x2b8a   :  { %v3422_v26 = vmul.f32 %v3629_v6, %v3414_v47 }
0x2b8c   :  { %v3427_v36 = vadd.f32 %v3424_v61, %v3422_v26 }
0x2b8e   :  { %v3428_v1 = vpack.c.bf16 %v3427_v36, %v3426_v28 }
0x2b90   :  { %4113 = vmatmul.mubr.msk.bf16.vlgmr.msra.gmra.mxu1 %vm65_vm1, %v3428_v1 }
0x2c50   :  { %v3498_v18 = vpop.f32.mrf.mxu1 }
0x2c51   :  { %v3499_v39 = vadd.f32 %v3498_v18, %v3459_v24 }
0x2c52   :  { %v4114_v55 = vpop.f32.mrf.mxu1 }
0x2c53   :  { %3505 = vmax.xlane.f32.xlu1 %v3499_v39 }
0x2c54   :  { %v3501_v40 = vpop.f32.mrf.mxu1 }
0x2c55   :  { %v3502_v42 = vadd.f32 %v3501_v40, %v3459_v24 }
0x2c56   :  { %v4115_v43 = vpop.f32.mrf.mxu1 }
0x2c57   :  { %3507 = vmax.xlane.f32.xlu0 %v3502_v42 }
0x2cdc   :  { %v3506_v45 = vpop.xlane.xlu1 %3505 }
0x2cdd   :  { %v3509_v51 = vsub.f32 %v3499_v39, %v3506_v45 }
0x2cdf   :  { %v3511_v38 = vmul.f32 1.442695, %v3509_v51 }
0x2ce0   :  { %v3508_v52 = vpop.xlane.xlu0 %3507 }
0x2ce1   :  { %4373 = vpow2.f32 %v3511_v38  ;;  %v3510_v53 = vsub.f32 %v3502_v42, %v3508_v52 }
0x2ce3   :  { %v3513_v48 = vmul.f32 1.442695, %v3510_v53 }
0x2ce5   :  { %4375 = vpow2.f32 %v3513_v48 }
0x2cee   :  { %v4374_v16 = vpop.eup %4373 }
0x2cef   :  { %3515 = vadd.xlane.f32.xlu0 %v4374_v16 }
0x2cf2   :  { %v4376_v54 = vpop.eup %4375 }
0x2cf3   :  { %3517 = vadd.xlane.f32.xlu1 %v4376_v54 }
0x2d78   :  { %v3516_v7 = vpop.xlane.xlu0 %3515 }
0x2d79   :  { %4377 = vlog2.f32 %v3516_v7 }
0x2d7c   :  { %v3518_v56 = vpop.xlane.xlu1 %3517 }
0x2d7d   :  { %4379 = vlog2.f32 %v3518_v56 }
0x2d86   :  { %v4378_v49 = vpop.eup %4377 }
0x2d87   :  { %v3520_v21 = vmul.f32 0.6931472, %v4378_v49 }
0x2d89   :  { %v3523_v58 = vsub.f32 %v3509_v51, %v3520_v21 }
0x2d8a   :  { %v4380_v13 = vpop.eup %4379 }
0x2d8b   :  { %3525 = vst [vmem:[%s5367_s7] sm:$0xff] %v3523_v58  ;;  %v3522_v20 = vmul.f32 0.6931472, %v4380_v13 }
0x2d8d   :  { %v3524_v50 = vsub.f32 %v3510_v53, %v3522_v20 }
0x2d8f   :  { %3526 = vst [vmem:[%s5367_s7 + $0x8] sm:$0xff] %v3524_v50 }

</bundles_post_ra>
